<compile_context>
chip_gen: v5e
topology: v5e:2x2
jax: 0.10.0
libtpu: 0.0.40
codegen_flags: <defaults>
</compile_context>

<pallas_src>
import jax
import jax.numpy as jnp
from jax.experimental import pallas as pl
from jax.experimental.pallas import tpu as pltpu


def _coattention_body(text_ref, image_ref, wbq_ref, wv_ref, whv_ref, whq_ref,
                      out_ref, ws_ref, *, use_vpu_contract):
    """Shared kernel body.  ws_ref is None when the final w_s projection is hoisted
    to the wrapper (multi-step grids); then out_ref receives context_v + context_q."""
    cdt = wbq_ref.dtype                       # MXU operand dtype (f32 or bf16)
    text = text_ref[...]                      # (Bb, T, E), stored dtype == cdt
    image = image_ref[...]                    # (Bb, V, E)
    Bb, T, E = text.shape
    V = image.shape[1]
    K = wv_ref.shape[1]

    # All elementwise math (tanh / softmax / weighted sums) in f32.
    text_f = text.astype(jnp.float32)
    image_f = image.astype(jnp.float32)

    # ---- Fused text-side projection: w_b and w_q share the same LHS, concatenated
    #      host-side into one (E, E+K) weight -> one MXU weight load, one pass over
    #      the Bb*T stacked rows.
    proj = jnp.dot(text.reshape(Bb * T, E), wbq_ref[...],
                   preferred_element_type=jnp.float32)             # (Bb*T, E+K) f32
    wb_text = proj[:, :E].reshape(Bb, T, E)                        # (Bb, T, E)
    wq_q = proj[:, E:].reshape(Bb, T, K)                           # (Bb, T, K)

    # ---- Image-side projection: one stacked GEMM over Bb*V rows.
    wv_v = jnp.dot(image.reshape(Bb * V, E), wv_ref[...],
                   preferred_element_type=jnp.float32).reshape(Bb, V, K)

    if use_vpu_contract:
        # Small T/V: batched MXU einsums would be weight-load bound (>=128 cycles of
        # RHS load per batch element for a tiny result), so do the affinity and the
        # shallow contractions on the otherwise-idle VPU/XLU slots.  Affinity is
        # computed exactly once, in f32.
        # affinity[b,x,y] = sum_e wb_text[b,x,e] * image[b,y,e]
        affinity = jnp.sum(wb_text[:, :, None, :] * image_f[:, None, :, :],
                           axis=-1)                                # (Bb, T, V)
        # wqqc[b,y,k] = sum_x affinity[b,x,y] * wq_q[b,x,k]
        wqqc = jnp.sum(affinity[:, :, :, None] * wq_q[:, :, None, :],
                       axis=1)                                     # (Bb, V, K)
        # wvvc[b,x,k] = sum_y affinity[b,x,y] * wv_v[b,y,k]
        wvvc = jnp.sum(affinity[:, :, :, None] * wv_v[:, None, :, :],
                       axis=2)                                     # (Bb, T, K)
    else:
        # Large T/V: keep the MXU, but compute the affinity ONCE and derive the
        # (V,T) orientation with an XLU transpose instead of a second full batched
        # einsum (halves the dominant MXU item and the live affinity VMEM).
        affinity = jnp.einsum('bxe,bye->bxy', wb_text.astype(cdt), image,
                              preferred_element_type=jnp.float32)  # (Bb, T, V)
        affinity_vt = jnp.swapaxes(affinity, 1, 2)                 # (Bb, V, T) XLU
        wqqc = jnp.einsum('bvt,btk->bvk', affinity_vt.astype(cdt), wq_q.astype(cdt),
                          preferred_element_type=jnp.float32)      # (Bb, V, K)
        wvvc = jnp.einsum('btv,bvk->btk', affinity.astype(cdt), wv_v.astype(cdt),
                          preferred_element_type=jnp.float32)      # (Bb, T, K)

    h_v = jnp.tanh(wv_v + wqqc)                                    # (Bb, V, K) f32
    h_q = jnp.tanh(wq_q + wvvc)                                    # (Bb, T, K) f32

    # ---- Scores: VPU broadcast-multiply + lane reduce (no N=1 MXU matmul).
    s_v = jnp.sum(h_v * whv_ref[...], axis=-1, keepdims=True)      # (Bb, V, 1)
    s_q = jnp.sum(h_q * whq_ref[...], axis=-1, keepdims=True)      # (Bb, T, 1)

    # Softmax over the token axis (axis=1), max-subtracted, f32 throughout.
    p_v = jnp.exp(s_v - jnp.max(s_v, axis=1, keepdims=True))
    attn_v = p_v / jnp.sum(p_v, axis=1, keepdims=True)             # (Bb, V, 1)
    p_q = jnp.exp(s_q - jnp.max(s_q, axis=1, keepdims=True))
    attn_q = p_q / jnp.sum(p_q, axis=1, keepdims=True)             # (Bb, T, 1)

    # ---- Contexts: VPU multiply + sublane reduce (no M=1 MXU matmul).
    context = (jnp.sum(attn_v * image_f, axis=1)
               + jnp.sum(attn_q * text_f, axis=1))                 # (Bb, E) f32

    if ws_ref is None:
        # Final w_s projection hoisted to the wrapper; emit lane-dense context sum.
        out_ref[...] = context
    else:
        out_ref[...] = jnp.tanh(jnp.dot(context.astype(cdt), ws_ref[...],
                                        preferred_element_type=jnp.float32))


def _make_kernel(apply_final_in_kernel, use_vpu_contract):
    if apply_final_in_kernel:
        def kernel(text_ref, image_ref, wbq_ref, wv_ref, whv_ref, whq_ref,
                   ws_ref, out_ref):
            _coattention_body(text_ref, image_ref, wbq_ref, wv_ref, whv_ref,
                              whq_ref, out_ref, ws_ref,
                              use_vpu_contract=use_vpu_contract)
    else:
        def kernel(text_ref, image_ref, wbq_ref, wv_ref, whv_ref, whq_ref,
                   out_ref):
            _coattention_body(text_ref, image_ref, wbq_ref, wv_ref, whv_ref,
                              whq_ref, out_ref, None,
                              use_vpu_contract=use_vpu_contract)
    return kernel


def _num_tensorcores():
    """TensorCores a 'parallel' grid axis can shard over (2 on v7x, else 1)."""
    try:
        kind = jax.devices()[0].device_kind.lower()
    except Exception:
        return 1
    return 2 if ("v7" in kind or "7x" in kind) else 1


def _default_block_b(B):
    # v5e / v6e: single TensorCore -> one grid step (block_b = B) removes the
    # ~0.35us/step pipeline overhead and maximizes the GEMM M dimension.
    # v7x: two TensorCores shard "parallel" axes -> exactly two steps, but only if
    # the resulting (block_b, E) output tile keeps its sublane dim a multiple of 8.
    if _num_tensorcores() >= 2 and B % 2 == 0 and (B // 2) % 8 == 0:
        return B // 2
    return B


def coattention(text, image, text_attention_mask, params, *, block_b=None,
                compute_dtype=jnp.float32, affinity_on_vpu=None):
    """Pallas forward equivalent of CoAttention.forward.

    text_attention_mask mirrors the PyTorch signature; the reference forward never
    uses it (nor the declared Dropout), so both are intentionally omitted.
    compute_dtype controls the MXU operand dtype (f32 or bf16); accumulation and
    elementwise math stay in f32.
    """
    del text_attention_mask
    B, T, E = text.shape
    _, V, _ = image.shape
    K = params["w_v"].shape[1]

    if block_b is None:
        block_b = _default_block_b(B)
    assert B % block_b == 0, "block_b must divide batch"
    assert block_b == B or block_b % 8 == 0, \
        "block_b must be B or a multiple of 8 (output sublane tiling)"
    n_steps = B // block_b

    if affinity_on_vpu is None:
        # Small token counts -> batched MXU einsums are weight-load bound; use VPU/XLU.
        affinity_on_vpu = (T <= 32 and V <= 32)

    cdt = jnp.dtype(compute_dtype)
    # Fused text-side weight: one (E, E+K) GEMM covers both w_b and w_q.
    w_bq = jnp.concatenate([params["w_b"], params["w_q"]], axis=1).astype(cdt)
    w_v = params["w_v"].astype(cdt)
    w_s = params["w_s"].astype(cdt)
    # (K,1) score weights passed as f32 (1,K) rows -> VPU broadcast, no transpose.
    w_hv_row = params["w_hv"].reshape(1, K).astype(jnp.float32)
    w_hq_row = params["w_hq"].reshape(1, K).astype(jnp.float32)
    text_c = text.astype(cdt)
    image_c = image.astype(cdt)

    # Hoist the final tanh((cv+cq) @ w_s) out of the kernel only when there is more
    # than one grid step (otherwise in-kernel is strictly better: no extra HBM trip).
    apply_final_in_kernel = (n_steps == 1)
    kernel = _make_kernel(apply_final_in_kernel, affinity_on_vpu)

    def full(shape):
        return pl.BlockSpec(shape, lambda g, _s=shape: tuple(0 for _ in _s))

    in_specs = [
        pl.BlockSpec((block_b, T, E), lambda g: (g, 0, 0)),
        pl.BlockSpec((block_b, V, E), lambda g: (g, 0, 0)),
        full((E, E + K)),   # [w_b | w_q] fused
        full((E, K)),       # w_v
        full((1, K)),       # w_hv (row)
        full((1, K)),       # w_hq (row)
    ]
    operands = [text_c, image_c, w_bq, w_v, w_hv_row, w_hq_row]
    if apply_final_in_kernel:
        in_specs.append(full((E, E)))   # w_s
        operands.append(w_s)

    # TODO(synk): for very large T/V (per-step live set ~ 2*Bblk*(T+V)*E*itemsize for
    # double-buffered inputs + Bblk*T*V*4B affinity + Bblk*(T+V)*K*4B intermediates,
    # approaching v7x's 64 MiB physical / 32 MiB scoped VMEM), add an inner
    # "arbitrary" grid axis over V with online-softmax accumulation and raise
    # vmem_limit_bytes via pltpu.CompilerParams accordingly.
    out = pl.pallas_call(
        kernel,
        out_shape=jax.ShapeDtypeStruct((B, E), jnp.float32),
        grid=(n_steps,),
        in_specs=in_specs,
        out_specs=pl.BlockSpec((block_b, E), lambda g: (g, 0)),
        compiler_params=pltpu.CompilerParams(dimension_semantics=("parallel",)),
    )(*operands)

    if not apply_final_in_kernel:
        # One (B, E) @ (E, E) GEMM + tanh amortizes the w_s weight load across steps.
        out = jnp.tanh(jnp.dot(out.astype(cdt), w_s,
                               preferred_element_type=jnp.float32))
    return out


def coattention_ref(text, image, p):
    """Pure-JAX reference mirroring the PyTorch forward exactly."""
    wb_text = text @ p["w_b"]
    affinity = jnp.einsum('bxe,bye->bxy', wb_text, image)
    wv_v = image @ p["w_v"]
    wq_q = text @ p["w_q"]
    wqqc = jnp.einsum('bxk,bxy->byk', wq_q, affinity)
    wvvc = jnp.einsum('byk,bxy->bxk', wv_v, affinity)
    h_v = jnp.tanh(wv_v + wqqc)
    h_q = jnp.tanh(wq_q + wvvc)
    attn_v = jax.nn.softmax((h_v @ p["w_hv"])[..., 0], axis=-1)
    attn_q = jax.nn.softmax((h_q @ p["w_hq"])[..., 0], axis=-1)
    context_v = jnp.einsum('bx,bxd->bd', attn_v, image)
    context_q = jnp.einsum('by,byd->bd', attn_q, text)
    return jnp.tanh((context_v + context_q) @ p["w_s"])


if __name__ == "__main__":
    # Primary shapes: batch, text tokens, image tokens, hidden, k — lane-aligned
    # hidden (E=128) so weight tiles and output stores are unmasked.
    B, T, V, E, K = 16, 8, 8, 128, 32

    key = jax.random.PRNGKey(0)
    ks = jax.random.split(key, 10)
    text = jax.random.normal(ks[0], (B, T, E), dtype=jnp.float32)
    image = jax.random.normal(ks[1], (B, V, E), dtype=jnp.float32)
    text_attention_mask = jnp.ones((B, T), dtype=jnp.float32)  # unused by forward

    scale = 0.1
    params = {
        "w_b":  scale * jax.random.normal(ks[2], (E, E), dtype=jnp.float32),
        "w_v":  scale * jax.random.normal(ks[3], (E, K), dtype=jnp.float32),
        "w_q":  scale * jax.random.normal(ks[4], (E, K), dtype=jnp.float32),
        "w_hv": scale * jax.random.normal(ks[5], (K, 1), dtype=jnp.float32),
        "w_hq": scale * jax.random.normal(ks[6], (K, 1), dtype=jnp.float32),
        "w_s":  scale * jax.random.normal(ks[7], (E, E), dtype=jnp.float32),
    }

    ref = coattention_ref(text, image, params)

    # 1) Auto block_b (1 step on v5e/v6e, 2 parallel steps on v7x), f32, VPU path.
    out = jax.block_until_ready(coattention(text, image, text_attention_mask, params))
    assert out.shape == (B, E), out.shape
    assert jnp.allclose(out, ref, atol=1e-3, rtol=1e-3), "mismatch (auto block_b)"

    # 2) Forced 2-step grid -> exercises the hoisted final-projection path.
    out2 = jax.block_until_ready(
        coattention(text, image, text_attention_mask, params, block_b=B // 2))
    assert jnp.allclose(out2, ref, atol=1e-3, rtol=1e-3), "mismatch (2-step grid)"

    # 3) bf16 MXU operands (f32 accumulation + f32 elementwise); looser tolerance.
    out3 = jax.block_until_ready(
        coattention(text, image, text_attention_mask, params,
                    compute_dtype=jnp.bfloat16))
    assert jnp.allclose(out3, ref, atol=1e-1, rtol=1e-1), "mismatch (bf16)"

    # 4) Larger token counts -> exercises the MXU einsum + XLU-transpose affinity
    #    path (affinity computed once).  Same weights (E, K unchanged).
    B2, T2, V2 = 4, 128, 128
    text_l = jax.random.normal(ks[8], (B2, T2, E), dtype=jnp.float32)
    image_l = jax.random.normal(ks[9], (B2, V2, E), dtype=jnp.float32)
    mask_l = jnp.ones((B2, T2), dtype=jnp.float32)
    ref_l = coattention_ref(text_l, image_l, params)
    out4 = jax.block_until_ready(coattention(text_l, image_l, mask_l, params))
    assert out4.shape == (B2, E), out4.shape
    assert jnp.allclose(out4, ref_l, atol=2e-2, rtol=2e-2), "mismatch (MXU path)"

    print("KERNEL_OK")
</pallas_src>

<mosaic_0001>
module attributes {stable_mosaic.version = 11 : i64} {
  func.func @kernel(%arg0: i32, %arg1: memref<16x8x128xf32, #tpu.memory_space<vmem>>, %arg2: memref<16x8x128xf32, #tpu.memory_space<vmem>>, %arg3: memref<128x160xf32, #tpu.memory_space<vmem>>, %arg4: memref<128x32xf32, #tpu.memory_space<vmem>>, %arg5: memref<1x32xf32, #tpu.memory_space<vmem>>, %arg6: memref<1x32xf32, #tpu.memory_space<vmem>>, %arg7: memref<128x128xf32, #tpu.memory_space<vmem>>, %arg8: memref<16x128xf32, #tpu.memory_space<vmem>>) attributes {dimension_semantics = [#tpu.dimension_semantics<parallel>], iteration_bounds = array<i64: 1>, scalar_prefetch = 0 : i64, scratch_operands = 0 : i64, tpu.core_type = #tpu.core_type<tc>, window_params = [{transform_indices = @transform_0, window_bounds = array<i64: 16, 8, 128>}, {transform_indices = @transform_1, window_bounds = array<i64: 16, 8, 128>}, {pipeline_mode = #tpu.pipeline_mode<synchronous>, transform_indices = @transform_2, window_bounds = array<i64: 128, 160>}, {pipeline_mode = #tpu.pipeline_mode<synchronous>, transform_indices = @transform_3, window_bounds = array<i64: 128, 32>}, {pipeline_mode = #tpu.pipeline_mode<synchronous>, transform_indices = @transform_4, window_bounds = array<i64: 1, 32>}, {pipeline_mode = #tpu.pipeline_mode<synchronous>, transform_indices = @transform_5, window_bounds = array<i64: 1, 32>}, {pipeline_mode = #tpu.pipeline_mode<synchronous>, transform_indices = @transform_6, window_bounds = array<i64: 128, 128>}, {transform_indices = @transform_7, window_bounds = array<i64: 16, 128>}]} {
    %c0 = arith.constant 0 : index
    %c0_0 = arith.constant 0 : index
    %c0_1 = arith.constant 0 : index
    %0 = vector.load %arg1[%c0, %c0_0, %c0_1] : memref<16x8x128xf32, #tpu.memory_space<vmem>>, vector<16x8x128xf32>
    %c0_2 = arith.constant 0 : index
    %c0_3 = arith.constant 0 : index
    %c0_4 = arith.constant 0 : index
    %1 = vector.load %arg2[%c0_2, %c0_3, %c0_4] : memref<16x8x128xf32, #tpu.memory_space<vmem>>, vector<16x8x128xf32>
    %2 = vector.shape_cast %0 : vector<16x8x128xf32> to vector<128x128xf32>
    %c0_5 = arith.constant 0 : index
    %c0_6 = arith.constant 0 : index
    %3 = vector.load %arg3[%c0_5, %c0_6] : memref<128x160xf32, #tpu.memory_space<vmem>>, vector<128x160xf32>
    %cst = arith.constant dense<0.000000e+00> : vector<128x160xf32>
    %4 = tpu.matmul %2, %3, %cst {dimension_numbers = #tpu.dot_dimension_numbers<[1], [0], [0], [1], [0, 0, 1, 1], [], []>} : vector<128x128xf32>, vector<128x160xf32>, vector<128x160xf32> -> vector<128x160xf32>
    %5 = vector.extract_strided_slice %4 {offsets = [0, 0], sizes = [128, 128], strides = [1, 1]} : vector<128x160xf32> to vector<128x128xf32>
    %6 = vector.shape_cast %5 : vector<128x128xf32> to vector<16x8x128xf32>
    %7 = vector.extract_strided_slice %4 {offsets = [0, 128], sizes = [128, 32], strides = [1, 1]} : vector<128x160xf32> to vector<128x32xf32>
    %8 = vector.shape_cast %7 : vector<128x32xf32> to vector<16x8x32xf32>
    %9 = vector.shape_cast %1 : vector<16x8x128xf32> to vector<128x128xf32>
    %c0_7 = arith.constant 0 : index
    %c0_8 = arith.constant 0 : index
    %10 = vector.load %arg4[%c0_7, %c0_8] : memref<128x32xf32, #tpu.memory_space<vmem>>, vector<128x32xf32>
    %cst_9 = arith.constant dense<0.000000e+00> : vector<128x32xf32>
    %11 = tpu.matmul %9, %10, %cst_9 {dimension_numbers = #tpu.dot_dimension_numbers<[1], [0], [0], [1], [0, 0, 1, 1], [], []>} : vector<128x128xf32>, vector<128x32xf32>, vector<128x32xf32> -> vector<128x32xf32>
    %12 = vector.shape_cast %11 : vector<128x32xf32> to vector<16x8x32xf32>
    %13 = vector.shape_cast %6 : vector<16x8x128xf32> to vector<16x8x1x128xf32>
    %14 = vector.shape_cast %1 : vector<16x8x128xf32> to vector<16x1x8x128xf32>
    %15 = vector.broadcast %13 : vector<16x8x1x128xf32> to vector<16x8x8x128xf32>
    %16 = vector.broadcast %14 : vector<16x1x8x128xf32> to vector<16x8x8x128xf32>
    %17 = arith.mulf %15, %16 : vector<16x8x8x128xf32>
    %cst_10 = arith.constant dense<0.000000e+00> : vector<16x8x8xf32>
    %18 = vector.multi_reduction <add>, %17, %cst_10 [3] : vector<16x8x8x128xf32> to vector<16x8x8xf32>
    %19 = vector.shape_cast %18 : vector<16x8x8xf32> to vector<16x8x8x1xf32>
    %20 = vector.shape_cast %8 : vector<16x8x32xf32> to vector<16x8x1x32xf32>
    %21 = vector.broadcast %19 : vector<16x8x8x1xf32> to vector<16x8x8x32xf32>
    %22 = vector.broadcast %20 : vector<16x8x1x32xf32> to vector<16x8x8x32xf32>
    %23 = arith.mulf %21, %22 : vector<16x8x8x32xf32>
    %cst_11 = arith.constant dense<0.000000e+00> : vector<16x8x32xf32>
    %24 = vector.multi_reduction <add>, %23, %cst_11 [1] : vector<16x8x8x32xf32> to vector<16x8x32xf32>
    %25 = vector.shape_cast %18 : vector<16x8x8xf32> to vector<16x8x8x1xf32>
    %26 = vector.shape_cast %12 : vector<16x8x32xf32> to vector<16x1x8x32xf32>
    %27 = vector.broadcast %25 : vector<16x8x8x1xf32> to vector<16x8x8x32xf32>
    %28 = vector.broadcast %26 : vector<16x1x8x32xf32> to vector<16x8x8x32xf32>
    %29 = arith.mulf %27, %28 : vector<16x8x8x32xf32>
    %cst_12 = arith.constant dense<0.000000e+00> : vector<16x8x32xf32>
    %30 = vector.multi_reduction <add>, %29, %cst_12 [2] : vector<16x8x8x32xf32> to vector<16x8x32xf32>
    %31 = arith.addf %12, %24 : vector<16x8x32xf32>
    %32 = math.tanh %31 : vector<16x8x32xf32>
    %33 = arith.addf %8, %30 : vector<16x8x32xf32>
    %34 = math.tanh %33 : vector<16x8x32xf32>
    %c0_13 = arith.constant 0 : index
    %c0_14 = arith.constant 0 : index
    %35 = vector.load %arg5[%c0_13, %c0_14] : memref<1x32xf32, #tpu.memory_space<vmem>>, vector<1x32xf32>
    %36 = vector.shape_cast %35 : vector<1x32xf32> to vector<1x1x32xf32>
    %37 = vector.broadcast %36 : vector<1x1x32xf32> to vector<16x8x32xf32>
    %38 = arith.mulf %32, %37 : vector<16x8x32xf32>
    %cst_15 = arith.constant dense<0.000000e+00> : vector<16x8xf32>
    %39 = vector.multi_reduction <add>, %38, %cst_15 [2] : vector<16x8x32xf32> to vector<16x8xf32>
    %40 = vector.shape_cast %39 : vector<16x8xf32> to vector<16x8x1xf32>
    %c0_16 = arith.constant 0 : index
    %c0_17 = arith.constant 0 : index
    %41 = vector.load %arg6[%c0_16, %c0_17] : memref<1x32xf32, #tpu.memory_space<vmem>>, vector<1x32xf32>
    %42 = vector.shape_cast %41 : vector<1x32xf32> to vector<1x1x32xf32>
    %43 = vector.broadcast %42 : vector<1x1x32xf32> to vector<16x8x32xf32>
    %44 = arith.mulf %34, %43 : vector<16x8x32xf32>
    %cst_18 = arith.constant dense<0.000000e+00> : vector<16x8xf32>
    %45 = vector.multi_reduction <add>, %44, %cst_18 [2] : vector<16x8x32xf32> to vector<16x8xf32>
    %46 = vector.shape_cast %45 : vector<16x8xf32> to vector<16x8x1xf32>
    %cst_19 = arith.constant dense<0xFF800000> : vector<16x1xf32>
    %47 = vector.multi_reduction <maximumf>, %40, %cst_19 [1] : vector<16x8x1xf32> to vector<16x1xf32>
    %48 = vector.shape_cast %47 : vector<16x1xf32> to vector<16x1x1xf32>
    %49 = vector.broadcast %48 : vector<16x1x1xf32> to vector<16x8x1xf32>
    %50 = arith.subf %40, %49 : vector<16x8x1xf32>
    %51 = math.exp %50 : vector<16x8x1xf32>
    %cst_20 = arith.constant dense<0.000000e+00> : vector<16x1xf32>
    %52 = vector.multi_reduction <add>, %51, %cst_20 [1] : vector<16x8x1xf32> to vector<16x1xf32>
    %53 = vector.shape_cast %52 : vector<16x1xf32> to vector<16x1x1xf32>
    %54 = vector.broadcast %53 : vector<16x1x1xf32> to vector<16x8x1xf32>
    %55 = arith.divf %51, %54 : vector<16x8x1xf32>
    %cst_21 = arith.constant dense<0xFF800000> : vector<16x1xf32>
    %56 = vector.multi_reduction <maximumf>, %46, %cst_21 [1] : vector<16x8x1xf32> to vector<16x1xf32>
    %57 = vector.shape_cast %56 : vector<16x1xf32> to vector<16x1x1xf32>
    %58 = vector.broadcast %57 : vector<16x1x1xf32> to vector<16x8x1xf32>
    %59 = arith.subf %46, %58 : vector<16x8x1xf32>
    %60 = math.exp %59 : vector<16x8x1xf32>
    %cst_22 = arith.constant dense<0.000000e+00> : vector<16x1xf32>
    %61 = vector.multi_reduction <add>, %60, %cst_22 [1] : vector<16x8x1xf32> to vector<16x1xf32>
    %62 = vector.shape_cast %61 : vector<16x1xf32> to vector<16x1x1xf32>
    %63 = vector.broadcast %62 : vector<16x1x1xf32> to vector<16x8x1xf32>
    %64 = arith.divf %60, %63 : vector<16x8x1xf32>
    %65 = vector.broadcast %55 : vector<16x8x1xf32> to vector<16x8x128xf32>
    %66 = arith.mulf %65, %1 : vector<16x8x128xf32>
    %cst_23 = arith.constant dense<0.000000e+00> : vector<16x128xf32>
    %67 = vector.multi_reduction <add>, %66, %cst_23 [1] : vector<16x8x128xf32> to vector<16x128xf32>
    %68 = vector.broadcast %64 : vector<16x8x1xf32> to vector<16x8x128xf32>
    %69 = arith.mulf %68, %0 : vector<16x8x128xf32>
    %cst_24 = arith.constant dense<0.000000e+00> : vector<16x128xf32>
    %70 = vector.multi_reduction <add>, %69, %cst_24 [1] : vector<16x8x128xf32> to vector<16x128xf32>
    %71 = arith.addf %67, %70 : vector<16x128xf32>
    %c0_25 = arith.constant 0 : index
    %c0_26 = arith.constant 0 : index
    %72 = vector.load %arg7[%c0_25, %c0_26] : memref<128x128xf32, #tpu.memory_space<vmem>>, vector<128x128xf32>
    %cst_27 = arith.constant dense<0.000000e+00> : vector<16x128xf32>
    %73 = tpu.matmul %71, %72, %cst_27 {dimension_numbers = #tpu.dot_dimension_numbers<[1], [0], [0], [1], [0, 0, 1, 1], [], []>} : vector<16x128xf32>, vector<128x128xf32>, vector<16x128xf32> -> vector<16x128xf32>
    %74 = math.tanh %73 : vector<16x128xf32>
    %c0_28 = arith.constant 0 : index
    %c0_29 = arith.constant 0 : index
    %75 = vector.load %arg8[%c0_28, %c0_29] : memref<16x128xf32, #tpu.memory_space<vmem>>, vector<16x128xf32>
    tpu.vector_store %arg8[%c0_28, %c0_29], %74 {strides = array<i32>} : memref<16x128xf32, #tpu.memory_space<vmem>>, vector<16x128xf32>,
    return
  }
  func.func @transform_0(%arg0: i32) -> (i32, i32, i32) {
    %c0_i32 = arith.constant 0 : i32
    %c0_i32_0 = arith.constant 0 : i32
    %c0_i32_1 = arith.constant 0 : i32
    return %arg0, %c0_i32, %c0_i32_0 : i32, i32, i32
  }
  func.func @transform_1(%arg0: i32) -> (i32, i32, i32) {
    %c0_i32 = arith.constant 0 : i32
    %c0_i32_0 = arith.constant 0 : i32
    %c0_i32_1 = arith.constant 0 : i32
    return %arg0, %c0_i32, %c0_i32_0 : i32, i32, i32
  }
  func.func @transform_2(%arg0: i32) -> (i32, i32) {
    %c0_i32 = arith.constant 0 : i32
    %c0_i32_0 = arith.constant 0 : i32
    %c0_i32_1 = arith.constant 0 : i32
    return %c0_i32, %c0_i32_0 : i32, i32
  }
  func.func @transform_3(%arg0: i32) -> (i32, i32) {
    %c0_i32 = arith.constant 0 : i32
    %c0_i32_0 = arith.constant 0 : i32
    %c0_i32_1 = arith.constant 0 : i32
    return %c0_i32, %c0_i32_0 : i32, i32
  }
  func.func @transform_4(%arg0: i32) -> (i32, i32) {
    %c0_i32 = arith.constant 0 : i32
    %c0_i32_0 = arith.constant 0 : i32
    %c0_i32_1 = arith.constant 0 : i32
    return %c0_i32, %c0_i32_0 : i32, i32
  }
  func.func @transform_5(%arg0: i32) -> (i32, i32) {
    %c0_i32 = arith.constant 0 : i32
    %c0_i32_0 = arith.constant 0 : i32
    %c0_i32_1 = arith.constant 0 : i32
    return %c0_i32, %c0_i32_0 : i32, i32
  }
  func.func @transform_6(%arg0: i32) -> (i32, i32) {
    %c0_i32 = arith.constant 0 : i32
    %c0_i32_0 = arith.constant 0 : i32
    %c0_i32_1 = arith.constant 0 : i32
    return %c0_i32, %c0_i32_0 : i32, i32
  }
  func.func @transform_7(%arg0: i32) -> (i32, i32) {
    %c0_i32 = arith.constant 0 : i32
    %c0_i32_0 = arith.constant 0 : i32
    return %arg0, %c0_i32 : i32, i32
  }
}

</mosaic_0001>

<bundles_post_ra>
// kernel: tpu_custom_call.1
= control target key start
LH: loop header
LB: loop body
LE: loop exit
PB: predicated region body
PF: predicated region fallthrough
CT: control target
= control target key end

     0   :  { %s8526_s0 = inlined_call_operand.vmem [shape: f32[16,8,128], index: 0, kind: input, shape index: {}]   ;;  %s8527_s1 = inlined_call_operand.vmem [shape: f32[16,8,128], index: 1, kind: input, shape index: {}]   ;;  %s8528_s2 = inlined_call_operand.vmem [shape: f32[128,160], index: 2, kind: input, shape index: {}]   ;;  %s8529_s3 = inlined_call_operand.vmem [shape: f32[128,32], index: 3, kind: input, shape index: {}]   ;;  %s8530_s4 = inlined_call_operand.vmem [shape: f32[1,32], index: 4, kind: input, shape index: {}]   ;;  %s8531_s5 = inlined_call_operand.vmem [shape: f32[1,32], index: 5, kind: input, shape index: {}]   ;;  %s8532_s6 = inlined_call_operand.vmem [shape: f32[128,128], index: 6, kind: input, shape index: {}]   ;;  %s8533_s7 = inlined_call_operand.hbm [shape: f32[16,128], index: 7, kind: output, shape index: {}]  }
   0x1   :  { %v89_v0 = vld [vmem:[%s8528_s2 + $0xf0] sm:$0xff]  ;;  %v87_v1 = vld [vmem:[%s8528_s2 + $0xe0] sm:$0xff] }
   0x2   :  { %91 = vmatpush.msra.mxu0 %v89_v0  ;;  %v85_v2 = vld [vmem:[%s8528_s2 + $0xd0] sm:$0xff]  ;;  %v83_v3 = vld [vmem:[%s8528_s2 + $0xc0] sm:$0xff] }
   0x3   :  { %v81_v4 = vld [vmem:[%s8528_s2 + $0xb0] sm:$0xff] }
   0x4   :  { %92 = vmatpush.msra.mxu0 %v87_v1 }
   0x6   :  { %93 = vmatpush.msra.mxu0 %v85_v2 }
   0x7   :  { %12 = vsyncpa [#allocation3], 0  ;;  %v79_v5 = vld [vmem:[%s8528_s2 + $0xa0] sm:$0xff]  ;;  %v77_v6 = vld [vmem:[%s8528_s2 + $0x90] sm:$0xff]  ;;  %vm1582_vm0 = vcmask 261120   ;;  %vm3007_vm1 = vcmask 1041409  }
   0x8   :  { %94 = vmatpush.msra.mxu0 %v83_v3  ;;  %v75_v7 = vld [vmem:[%s8528_s2 + $0x80] sm:$0xff]  ;;  %v73_v8 = vld [vmem:[%s8528_s2 + $0x70] sm:$0xff]  ;;  %v236_v17 = vld [vmem:[%s8529_s3 + $0x78] sm:$0xff]  ;;  %vm3009_vm2 = vcmask 1042434   ;;  %vm3011_vm3 = vcmask 1043459   ;;  %vm3013_vm4 = vcmask 1044484  }
   0x9   :  { %v71_v9 = vld [vmem:[%s8528_s2 + $0x60] sm:$0xff]  ;;  %v69_v10 = vld [vmem:[%s8528_s2 + $0x50] sm:$0xff]  ;;  %v90_v19 = vld [vmem:[%s8528_s2 + $0xf8] sm:$0xff]  ;;  %237 = vmatpush.msra.mxu2 %v236_v17  ;;  %vm3015_vm5 = vcmask 1045509   ;;  %vm8557_vm6 = vcmask 1046534   ;;  %vm8553_vm7 = vcmask 1047559  }
   0xa   :  { %95 = vmatpush.msra.mxu0 %v81_v4  ;;  %v67_v11 = vld [vmem:[%s8528_s2 + $0x40] sm:$0xff]  ;;  %v65_v12 = vld [vmem:[%s8528_s2 + $0x30] sm:$0xff]  ;;  %156 = vmatpush.msra.mxu1 %v90_v19  ;;  %v88_v20 = vld [vmem:[%s8528_s2 + $0xe8] sm:$0xff]  ;;  %s4871_s25 = smov 128   ;;  %s4872_s26 = smov 8  }
   0xb   :  { %v63_v13 = vld [vmem:[%s8528_s2 + $0x20] sm:$0xff]  ;;  %v61_v14 = vld [vmem:[%s8528_s2 + $0x10] sm:$0xff]  ;;  %v234_v21 = vld [vmem:[%s8529_s3 + $0x68] sm:$0xff] }
   0xc   :  { %96 = vmatpush.msra.mxu0 %v79_v5  ;;  %v59_v15 = vld [vmem:[%s8528_s2] sm:$0xff]  ;;  %v235_v18 = vld [vmem:[%s8529_s3 + $0x70] sm:$0xff]  ;;  %v86_v22 = vld [vmem:[%s8528_s2 + $0xd8] sm:$0xff]  ;;  %157 = vmatpush.msra.mxu1 %v88_v20 }
   0xd   :  { %v4964_v16 = vld [vmem:[%s8526_s0] sm:$0xff]  ;;  %238 = vmatpush.msra.mxu2 %v235_v18  ;;  %v84_v24 = vld [vmem:[%s8528_s2 + $0xc8] sm:$0xff]  ;;  %v232_v26 = vld [vmem:[%s8529_s3 + $0x58] sm:$0xff] }
   0xe   :  { %97 = vmatpush.msra.mxu0 %v77_v6  ;;  %v233_v23 = vld [vmem:[%s8529_s3 + $0x60] sm:$0xff]  ;;  %v4994_v25 = vld [vmem:[%s8526_s0 + $0x8] sm:$0xff]  ;;  %158 = vmatpush.msra.mxu1 %v86_v22  ;;  %v82_v27 = vld [vmem:[%s8528_s2 + $0xb8] sm:$0xff] }
   0xf   :  { %239 = vmatpush.msra.mxu2 %v234_v21  ;;  %v231_v28 = vld [vmem:[%s8529_s3 + $0x50] sm:$0xff]  ;;  %v80_v29 = vld [vmem:[%s8528_s2 + $0xa8] sm:$0xff]  ;;  %v78_v31 = vld [vmem:[%s8528_s2 + $0x98] sm:$0xff] }
  0x10   :  { %98 = vmatpush.msra.mxu0 %v75_v7  ;;  %159 = vmatpush.msra.mxu1 %v84_v24  ;;  %v230_v30 = vld [vmem:[%s8529_s3 + $0x48] sm:$0xff]  ;;  %v229_v32 = vld [vmem:[%s8529_s3 + $0x40] sm:$0xff]  ;;  %v29_v34 = vld [vmem:[%s8526_s0 + $0x10] sm:$0xff] }
  0x11   :  { %240 = vmatpush.msra.mxu2 %v233_v23  ;;  %v76_v33 = vld [vmem:[%s8528_s2 + $0x88] sm:$0xff]  ;;  %v228_v35 = vld [vmem:[%s8529_s3 + $0x38] sm:$0xff]  ;;  %v227_v37 = vld [vmem:[%s8529_s3 + $0x30] sm:$0xff] }
  0x12   :  { %99 = vmatpush.msra.mxu0 %v73_v8  ;;  %160 = vmatpush.msra.mxu1 %v82_v27  ;;  %v74_v36 = vld [vmem:[%s8528_s2 + $0x78] sm:$0xff]  ;;  %v72_v38 = vld [vmem:[%s8528_s2 + $0x68] sm:$0xff]  ;;  %v225_v41 = vld [vmem:[%s8529_s3 + $0x20] sm:$0xff] }
  0x13   :  { %241 = vmatpush.msra.mxu2 %v232_v26  ;;  %v226_v39 = vld [vmem:[%s8529_s3 + $0x28] sm:$0xff]  ;;  %v70_v40 = vld [vmem:[%s8528_s2 + $0x58] sm:$0xff]  ;;  %v223_v46 = vld [vmem:[%s8529_s3 + $0x10] sm:$0xff] }
  0x14   :  { %100 = vmatpush.msra.mxu0 %v71_v9  ;;  %161 = vmatpush.msra.mxu1 %v80_v29  ;;  %v68_v42 = vld [vmem:[%s8528_s2 + $0x48] sm:$0xff]  ;;  %v30_v43 = vld [vmem:[%s8526_s0 + $0x18] sm:$0xff]  ;;  %v221_v50 = vld [vmem:[%s8529_s3] sm:$0xff] }
  0x15   :  { %242 = vmatpush.msra.mxu2 %v231_v28  ;;  %v224_v44 = vld [vmem:[%s8529_s3 + $0x18] sm:$0xff]  ;;  %v64_v47 = vld [vmem:[%s8528_s2 + $0x28] sm:$0xff]  ;;  %v31_v52 = vld [vmem:[%s8526_s0 + $0x20] sm:$0xff] }
  0x16   :  { %101 = vmatpush.msra.mxu0 %v69_v10  ;;  %162 = vmatpush.msra.mxu1 %v78_v31  ;;  %v66_v45 = vld [vmem:[%s8528_s2 + $0x38] sm:$0xff]  ;;  %v222_v48 = vld [vmem:[%s8529_s3 + $0x8] sm:$0xff]  ;;  %v5081_v53 = vld [vmem:[%s8527_s1] sm:$0xff] }
  0x17   :  { %243 = vmatpush.msra.mxu2 %v230_v30  ;;  %v62_v49 = vld [vmem:[%s8528_s2 + $0x18] sm:$0xff]  ;;  %v60_v51 = vld [vmem:[%s8528_s2 + $0x8] sm:$0xff]  ;;  %v33_v55 = vld [vmem:[%s8526_s0 + $0x30] sm:$0xff] }
  0x18   :  { %102 = vmatpush.msra.mxu0 %v67_v11  ;;  %163 = vmatpush.msra.mxu1 %v76_v33  ;;  %v32_v54 = vld [vmem:[%s8526_s0 + $0x28] sm:$0xff]  ;;  %v34_v57 = vld [vmem:[%s8526_s0 + $0x38] sm:$0xff]  ;;  %v5104_v58 = vld [vmem:[%s8527_s1 + $0x10] sm:$0xff] }
  0x19   :  { %244 = vmatpush.msra.mxu2 %v229_v32  ;;  %v5095_v56 = vld [vmem:[%s8527_s1 + $0x8] sm:$0xff]  ;;  %v35_v59 = vld [vmem:[%s8526_s0 + $0x40] sm:$0xff]  ;;  %v5119_v19 = vld [vmem:[%s8527_s1 + $0x18] sm:$0xff] }
  0x1a   :  { %103 = vmatpush.msra.mxu0 %v65_v12  ;;  %164 = vmatpush.msra.mxu1 %v74_v36 }
  0x1b   :  { %245 = vmatpush.msra.mxu2 %v228_v35 }
  0x1c   :  { %104 = vmatpush.msra.mxu0 %v63_v13  ;;  %165 = vmatpush.msra.mxu1 %v72_v38 }
  0x1d   :  { %246 = vmatpush.msra.mxu2 %v227_v37  ;;  %v36_v37 = vld [vmem:[%s8526_s0 + $0x48] sm:$0xff] }
  0x1e   :  { %105 = vmatpush.msra.mxu0 %v61_v14  ;;  %166 = vmatpush.msra.mxu1 %v70_v40 }
  0x1f   :  { %247 = vmatpush.msra.mxu2 %v226_v39 }
  0x20   :  { %106 = vmatpush.msra.mxu0 %v59_v15  ;;  %167 = vmatpush.msra.mxu1 %v68_v42 }
  0x21   :  { %107 = vmatmul.f32.vlgmr.msra.gmra.mxu0 %v4964_v16  ;;  %248 = vmatpush.msra.mxu2 %v225_v41 }
  0x22   :  { %168 = vmatpush.msra.mxu1 %v66_v45 }
  0x23   :  { %249 = vmatpush.msra.mxu2 %v224_v44 }
  0x24   :  { %169 = vmatpush.msra.mxu1 %v64_v47 }
  0x25   :  { %250 = vmatpush.msra.mxu2 %v223_v46  ;;  %v5137_v46 = vld [vmem:[%s8527_s1 + $0x20] sm:$0xff] }
  0x26   :  { %170 = vmatpush.msra.mxu1 %v62_v49 }
  0x27   :  { %251 = vmatpush.msra.mxu2 %v222_v48 }
  0x28   :  { %171 = vmatpush.msra.mxu1 %v60_v51 }
  0x29   :  { %110 = vmatmul.f32.gmra.mxu0 %v4994_v25  ;;  %252 = vmatpush.msra.mxu2 %v221_v50 }
  0x2a   :  { %253 = vmatmul.f32.vlgmr.msra.gmra.mxu2 %v5081_v53  ;;  %172 = vmatmul.f32.vlgmr.msra.gmra.mxu1 %v4964_v16 }
  0x31   :  { %113 = vmatmul.f32.gmra.mxu0 %v29_v34 }
  0x32   :  { %175 = vmatmul.f32.gmra.mxu1 %v4994_v25  ;;  %256 = vmatmul.f32.gmra.mxu2 %v5095_v56 }
  0x39   :  { %116 = vmatmul.f32.gmra.mxu0 %v30_v43 }
  0x3a   :  { %178 = vmatmul.f32.gmra.mxu1 %v29_v34  ;;  %259 = vmatmul.f32.gmra.mxu2 %v5104_v58 }
  0x41   :  { %119 = vmatmul.f32.gmra.mxu0 %v31_v52 }
  0x42   :  { %181 = vmatmul.f32.gmra.mxu1 %v30_v43  ;;  %262 = vmatmul.f32.gmra.mxu2 %v5119_v19 }
  0x49   :  { %122 = vmatmul.f32.gmra.mxu0 %v32_v54 }
  0x4a   :  { %184 = vmatmul.f32.gmra.mxu1 %v31_v52  ;;  %265 = vmatmul.f32.gmra.mxu2 %v5137_v46 }
  0x51   :  { %125 = vmatmul.f32.gmra.mxu0 %v33_v55 }
  0x52   :  { %187 = vmatmul.f32.gmra.mxu1 %v32_v54 }
  0x59   :  { %128 = vmatmul.f32.gmra.mxu0 %v34_v57 }
  0x5a   :  { %190 = vmatmul.f32.gmra.mxu1 %v33_v55 }
  0x61   :  { %131 = vmatmul.f32.gmra.mxu0 %v35_v59 }
  0x62   :  { %193 = vmatmul.f32.gmra.mxu1 %v34_v57 }
  0x69   :  { %134 = vmatmul.f32.gmra.mxu0 %v36_v37 }
  0x6a   :  { %196 = vmatmul.f32.gmra.mxu1 %v35_v59  ;;  %v37_v59 = vld [vmem:[%s8526_s0 + $0x50] sm:$0xff] }
  0x71   :  { %137 = vmatmul.f32.gmra.mxu0 %v37_v59 }
  0x72   :  { %199 = vmatmul.f32.gmra.mxu1 %v36_v37 }
  0x7a   :  { %202 = vmatmul.f32.gmra.mxu1 %v37_v59 }
  0x9e   :  { %v108_v60 = vpop.f32.mrf.mxu0 }
  0x9f   :  { %v430_v61 = vperm.slane %v108_v60, 0  ;;  %v321_v62 = vrot.slane %v108_v60, 4  ;;  %v319_v63 = vrot.slane %v108_v60, 2  ;;  %v318_v3 = vrot.slane %v108_v60, 1 }
  0xa0   :  { %v322_v6 = vrot.slane %v108_v60, 5  ;;  %v320_v7 = vrot.slane %v108_v60, 3  ;;  %v323_v12 = vrot.slane %v108_v60, 6  ;;  %v324_v16 = vrot.slane %v108_v60, 7 }
  0xa1   :  { %v686_v0 = vmul.f32 %v430_v61, %v5081_v53  ;;  %v434_v1 = vperm.slane %v321_v62, 0  ;;  %v432_v2 = vperm.slane %v319_v63, 0  ;;  %v431_v8 = vperm.slane %v318_v3, 0 }
  0xa2   :  { %v435_v9 = vperm.slane %v322_v6, 0  ;;  %v433_v10 = vperm.slane %v320_v7, 0  ;;  %v436_v17 = vperm.slane %v323_v12, 0  ;;  %v437_v20 = vperm.slane %v324_v16, 0 }
  0xa3   :  { %814 = vadd.xlane.f32.xlu0 %v686_v0  ;;  %v690_v4 = vmul.f32 %v434_v1, %v5081_v53  ;;  %v688_v5 = vmul.f32 %v432_v2, %v5081_v53  ;;  %v687_v11 = vmul.f32 %v431_v8, %v5081_v53 }
  0xa4   :  { %v691_v14 = vmul.f32 %v435_v9, %v5081_v53  ;;  %v689_v15 = vmul.f32 %v433_v10, %v5081_v53  ;;  %v692_v22 = vmul.f32 %v436_v17, %v5081_v53  ;;  %v693_v26 = vmul.f32 %v437_v20, %v5081_v53 }
  0xa5   :  { %822 = vadd.xlane.f32.xlu2 %v690_v4  ;;  %818 = vadd.xlane.f32.xlu1 %v688_v5 }
  0xa6   :  { %v111_v13 = vpop.f32.mrf.mxu0 }
  0xa7   :  { %v438_v18 = vperm.slane %v111_v13, 0  ;;  %v325_v21 = vrot.slane %v111_v13, 1  ;;  %v327_v24 = vrot.slane %v111_v13, 3  ;;  %v326_v25 = vrot.slane %v111_v13, 2 }
  0xa8   :  { %v328_v33 = vrot.slane %v111_v13, 4  ;;  %v330_v34 = vrot.slane %v111_v13, 6  ;;  %v329_v35 = vrot.slane %v111_v13, 5  ;;  %v331_v42 = vrot.slane %v111_v13, 7  ;;  %v5155_v13 = vld [vmem:[%s8527_s1 + $0x28] sm:$0xff] }
  0xa9   :  { %v694_v23 = vmul.f32 %v438_v18, %v5095_v56  ;;  %v439_v27 = vperm.slane %v325_v21, 0  ;;  %v441_v28 = vperm.slane %v327_v24, 0  ;;  %v440_v29 = vperm.slane %v326_v25, 0  ;;  %268 = vmatmul.f32.gmra.mxu2 %v5155_v13 }
  0xaa   :  { %v442_v36 = vperm.slane %v328_v33, 0  ;;  %v444_v39 = vperm.slane %v330_v34, 0  ;;  %v443_v40 = vperm.slane %v329_v35, 0  ;;  %v445_v47 = vperm.slane %v331_v42, 0  ;;  %v5170_v34 = vld [vmem:[%s8527_s1 + $0x30] sm:$0xff] }
  0xab   :  { %816 = vadd.xlane.f32.xlu0 %v687_v11  ;;  %v695_v30 = vmul.f32 %v439_v27, %v5095_v56  ;;  %v697_v31 = vmul.f32 %v441_v28, %v5095_v56  ;;  %v696_v32 = vmul.f32 %v440_v29, %v5095_v56 }
  0xac   :  { %v698_v41 = vmul.f32 %v442_v36, %v5095_v56  ;;  %v700_v44 = vmul.f32 %v444_v39, %v5095_v56  ;;  %v699_v45 = vmul.f32 %v443_v40, %v5095_v56  ;;  %v701_v50 = vmul.f32 %v445_v47, %v5095_v56  ;;  %v39_v47 = vld [vmem:[%s8526_s0 + $0x60] sm:$0xff] }
  0xad   :  { %824 = vadd.xlane.f32.xlu2 %v691_v14  ;;  %820 = vadd.xlane.f32.xlu1 %v689_v15 }
  0xae   :  { %v114_v38 = vpop.f32.mrf.mxu0 }
  0xaf   :  { %v332_v43 = vrot.slane %v114_v38, 1  ;;  %v446_v48 = vperm.slane %v114_v38, 0  ;;  %v333_v53 = vrot.slane %v114_v38, 2  ;;  %v334_v54 = vrot.slane %v114_v38, 3 }
  0xb0   :  { %v335_v55 = vrot.slane %v114_v38, 4  ;;  %v336_v62 = vrot.slane %v114_v38, 5  ;;  %v337_v1 = vrot.slane %v114_v38, 6  ;;  %v338_v2 = vrot.slane %v114_v38, 7 }
  0xb1   :  { %v447_v49 = vperm.slane %v332_v43, 0  ;;  %v702_v51 = vmul.f32 %v446_v48, %v5104_v58  ;;  %v448_v57 = vperm.slane %v333_v53, 0  ;;  %v449_v60 = vperm.slane %v334_v54, 0  ;;  %271 = vmatmul.f32.gmra.mxu2 %v5170_v34 }
  0xb2   :  { %v450_v61 = vperm.slane %v335_v55, 0  ;;  %v451_v3 = vperm.slane %v336_v62, 0  ;;  %v452_v5 = vperm.slane %v337_v1, 0  ;;  %v453_v6 = vperm.slane %v338_v2, 0 }
  0xb3   :  { %826 = vadd.xlane.f32.xlu0 %v692_v22  ;;  %v703_v52 = vmul.f32 %v447_v49, %v5104_v58  ;;  %v704_v56 = vmul.f32 %v448_v57, %v5104_v58  ;;  %v705_v63 = vmul.f32 %v449_v60, %v5104_v58 }
  0xb4   :  { %v706_v0 = vmul.f32 %v450_v61, %v5104_v58  ;;  %v707_v7 = vmul.f32 %v451_v3, %v5104_v58  ;;  %v708_v10 = vmul.f32 %v452_v5, %v5104_v58  ;;  %v709_v11 = vmul.f32 %v453_v6, %v5104_v58 }
  0xb5   :  { %828 = vadd.xlane.f32.xlu1 %v693_v26  ;;  %830 = vadd.xlane.f32.xlu2 %v694_v23  ;;  %v38_v23 = vld [vmem:[%s8526_s0 + $0x58] sm:$0xff] }
  0xb6   :  { %v117_v4 = vpop.f32.mrf.mxu0  ;;  %140 = vmatmul.f32.gmra.mxu0 %v38_v23  ;;  %205 = vmatmul.f32.gmra.mxu1 %v38_v23 }
  0xb7   :  { %v340_v8 = vrot.slane %v117_v4, 2  ;;  %v339_v9 = vrot.slane %v117_v4, 1  ;;  %v454_v12 = vperm.slane %v117_v4, 0  ;;  %v341_v20 = vrot.slane %v117_v4, 3 }
  0xb8   :  { %v343_v58 = vrot.slane %v117_v4, 5  ;;  %v342_v21 = vrot.slane %v117_v4, 4  ;;  %v344_v27 = vrot.slane %v117_v4, 6 }
  0xb9   :  { %v456_v14 = vperm.slane %v340_v8, 0  ;;  %v455_v15 = vperm.slane %v339_v9, 0  ;;  %v710_v16 = vmul.f32 %v454_v12, %v5119_v19  ;;  %v457_v22 = vperm.slane %v341_v20, 0  ;;  %v5198_v20 = vpop.f32.mrf.mxu1 }
  0xba   :  { %v459_v24 = vperm.slane %v343_v58, 0  ;;  %v458_v25 = vperm.slane %v342_v21, 0  ;;  %8558 = vst [vmem:[#allocation5_spill] sm:$0xff] %v5198_v20 }
  0xbb   :  { %832 = vadd.xlane.f32.xlu0 %v695_v30  ;;  %v712_v17 = vmul.f32 %v456_v14, %v5119_v19  ;;  %v711_v18 = vmul.f32 %v455_v15, %v5119_v19  ;;  %v713_v26 = vmul.f32 %v457_v22, %v5119_v19 }
  0xbc   :  { %v715_v29 = vmul.f32 %v459_v24, %v5119_v19  ;;  %v714_v30 = vmul.f32 %v458_v25, %v5119_v19 }
  0xbd   :  { %836 = vadd.xlane.f32.xlu2 %v697_v31  ;;  %834 = vadd.xlane.f32.xlu1 %v696_v32  ;;  %v345_v31 = vrot.slane %v117_v4, 7  ;;  %v460_v32 = vperm.slane %v344_v27, 0 }
  0xbe   :  { %v120_v28 = vpop.f32.mrf.mxu0  ;;  %143 = vmatmul.f32.gmra.mxu0 %v39_v47  ;;  %208 = vmatmul.f32.gmra.mxu1 %v39_v47 }
  0xbf   :  { %v462_v33 = vperm.slane %v120_v28, 0  ;;  %v461_v35 = vperm.slane %v345_v31, 0  ;;  %v346_v36 = vrot.slane %v120_v28, 1  ;;  %v716_v37 = vmul.f32 %v460_v32, %v5119_v19 }
  0xc0   :  { %v348_v39 = vrot.slane %v120_v28, 3  ;;  %v347_v40 = vrot.slane %v120_v28, 2  ;;  %v352_v60 = vrot.slane %v120_v28, 7  ;;  %v1086_v32 = vrot.slane %v5198_v20, 1 }
  0xc1   :  { %v718_v38 = vmul.f32 %v462_v33, %v5137_v46  ;;  %v463_v42 = vperm.slane %v346_v36, 0 }
  0xc2   :  { %v465_v43 = vperm.slane %v348_v39, 0 }
  0xc3   :  { %838 = vadd.xlane.f32.xlu0 %v698_v41  ;;  %v717_v41 = vmul.f32 %v461_v35, %v5119_v19  ;;  %v351_v19 = vrot.slane %v120_v28, 6  ;;  %v5215_v35 = vld [vmem:[%s8527_s1 + $0x40] sm:$0xff] }
  0xc4   :  { %v721_v48 = vmul.f32 %v465_v43, %v5137_v46 }
  0xc5   :  { %842 = vadd.xlane.f32.xlu2 %v700_v44  ;;  %840 = vadd.xlane.f32.xlu1 %v699_v45  ;;  %v464_v44 = vperm.slane %v347_v40, 0  ;;  %v719_v45 = vmul.f32 %v463_v42, %v5137_v46  ;;  %v468_v55 = vperm.slane %v351_v19, 0  ;;  %v1090_v42 = vrot.slane %v5198_v20, 5 }
  0xc6   :  { %v123_v54 = vpop.f32.mrf.mxu0 }
  0xc7   :  { %v720_v49 = vmul.f32 %v464_v44, %v5137_v46  ;;  %v353_v61 = vrot.slane %v123_v54, 1  ;;  %v470_v1 = vperm.slane %v123_v54, 0  ;;  %v354_v6 = vrot.slane %v123_v54, 2 }
  0xc8   :  { %v356_v8 = vrot.slane %v123_v54, 4  ;;  %v359_v15 = vrot.slane %v123_v54, 7  ;;  %v1088_v44 = vrot.slane %v5198_v20, 3 }
  0xc9   :  { %v471_v2 = vperm.slane %v353_v61, 0  ;;  %v726_v4 = vmul.f32 %v470_v1, %v5155_v13  ;;  %v472_v9 = vperm.slane %v354_v6, 0  ;;  %v1092_v61 = vrot.slane %v5198_v20, 7 }
  0xca   :  { %v474_v14 = vperm.slane %v356_v8, 0  ;;  %v477_v22 = vperm.slane %v359_v15, 0  ;;  %v42_v8 = vld [vmem:[%s8526_s0 + $0x78] sm:$0xff] }
  0xcb   :  { %844 = vadd.xlane.f32.xlu0 %v701_v50  ;;  %v349_v50 = vrot.slane %v120_v28, 4  ;;  %v727_v5 = vmul.f32 %v471_v2, %v5155_v13 }
  0xcc   :  { %v730_v21 = vmul.f32 %v474_v14, %v5155_v13 }
  0xcd   :  { %846 = vadd.xlane.f32.xlu1 %v702_v51  ;;  %848 = vadd.xlane.f32.xlu2 %v703_v52  ;;  %v350_v51 = vrot.slane %v120_v28, 5  ;;  %v5185_v52 = vld [vmem:[%s8527_s1 + $0x38] sm:$0xff]  ;;  %v466_v53 = vperm.slane %v349_v50, 0  ;;  %v1089_v28 = vrot.slane %v5198_v20, 4 }
  0xce   :  { %274 = vmatmul.f32.gmra.mxu2 %v5185_v52 }
  0xcf   :  { %v467_v57 = vperm.slane %v350_v51, 0  ;;  %v722_v59 = vmul.f32 %v466_v53, %v5137_v46  ;;  %v1199_v53 = vperm.slane %v1086_v32, 0 }
  0xd1   :  { %v723_v62 = vmul.f32 %v467_v57, %v5137_v46 }
  0xd3   :  { %850 = vadd.xlane.f32.xlu0 %v704_v56  ;;  %v724_v56 = vmul.f32 %v468_v55, %v5137_v46 }
  0xd5   :  { %852 = vadd.xlane.f32.xlu1 %v705_v63  ;;  %854 = vadd.xlane.f32.xlu2 %v706_v0  ;;  %v40_v63 = vld [vmem:[%s8526_s0 + $0x68] sm:$0xff]  ;;  %v469_v0 = vperm.slane %v352_v60, 0  ;;  %v1091_v60 = vrot.slane %v5198_v20, 6 }
  0xd6   :  { %146 = vmatmul.f32.gmra.mxu0 %v40_v63  ;;  %211 = vmatmul.f32.gmra.mxu1 %v40_v63 }
  0xd7   :  { %v725_v3 = vmul.f32 %v469_v0, %v5137_v46  ;;  %277 = vmatmul.f32.gmra.mxu2 %v5215_v35  ;;  %v5240_v0 = vperm.slane %v1088_v44, 0 }
  0xdb   :  { %856 = vadd.xlane.f32.xlu0 %v707_v7  ;;  %v355_v7 = vrot.slane %v123_v54, 3 }
  0xdd   :  { %858 = vadd.xlane.f32.xlu1 %v708_v10  ;;  %860 = vadd.xlane.f32.xlu2 %v709_v11  ;;  %v357_v10 = vrot.slane %v123_v54, 5  ;;  %v358_v11 = vrot.slane %v123_v54, 6  ;;  %v473_v12 = vperm.slane %v355_v7, 0 }
  0xdf   :  { %v476_v46 = vperm.slane %v358_v11, 0  ;;  %v729_v58 = vmul.f32 %v473_v12, %v5155_v13 }
  0xe1   :  { %v732_v24 = vmul.f32 %v476_v46, %v5155_v13  ;;  %v5267_v46 = vperm.slane %v1092_v61, 0 }
  0xe3   :  { %862 = vadd.xlane.f32.xlu0 %v710_v16  ;;  %v728_v16 = vmul.f32 %v472_v9, %v5155_v13 }
  0xe5   :  { %866 = vadd.xlane.f32.xlu2 %v712_v17  ;;  %864 = vadd.xlane.f32.xlu1 %v711_v18  ;;  %v475_v17 = vperm.slane %v357_v10, 0  ;;  %v126_v18 = vpop.f32.mrf.mxu0 }
  0xe6   :  { %v361_v25 = vrot.slane %v126_v18, 2  ;;  %v362_v31 = vrot.slane %v126_v18, 3  ;;  %v363_v33 = vrot.slane %v126_v18, 4  ;;  %v366_v36 = vrot.slane %v126_v18, 7 }
  0xe7   :  { %v731_v23 = vmul.f32 %v475_v17, %v5155_v13  ;;  %v365_v43 = vrot.slane %v126_v18, 6  ;;  %v5265_v17 = vperm.slane %v1091_v60, 0 }
  0xe8   :  { %v480_v47 = vperm.slane %v361_v25, 0  ;;  %v481_v51 = vperm.slane %v362_v31, 0  ;;  %v482_v54 = vperm.slane %v363_v33, 0  ;;  %v485_v55 = vperm.slane %v366_v36, 0 }
  0xea   :  { %v736_v2 = vmul.f32 %v480_v47, %v5170_v34  ;;  %v5247_v6 = vmul.f32 %v481_v51, %v5170_v34  ;;  %v5254_v9 = vmul.f32 %v482_v54, %v5170_v34  ;;  %v5258_v11 = vmul.f32 %v485_v55, %v5170_v34 }
  0xeb   :  { %868 = vadd.xlane.f32.xlu0 %v713_v26  ;;  %v41_v26 = vld [vmem:[%s8526_s0 + $0x70] sm:$0xff] }
  0xec   :  { %149 = vmatmul.f32.gmra.mxu0 %v41_v26  ;;  %214 = vmatmul.f32.gmra.mxu1 %v41_v26 }
  0xed   :  { %872 = vadd.xlane.f32.xlu2 %v715_v29  ;;  %870 = vadd.xlane.f32.xlu1 %v714_v30  ;;  %v1087_v29 = vrot.slane %v5198_v20, 2  ;;  %v360_v30 = vrot.slane %v126_v18, 1 }
  0xef   :  { %v1200_v50 = vperm.slane %v1087_v29, 0  ;;  %v479_v19 = vperm.slane %v360_v30, 0 }
  0xf3   :  { %874 = vadd.xlane.f32.xlu0 %v716_v37  ;;  %v364_v37 = vrot.slane %v126_v18, 5 }
  0xf4   :  { %152 = vmatmul.f32.gmra.mxu0 %v42_v8  ;;  %217 = vmatmul.f32.gmra.mxu1 %v42_v8 }
  0xf5   :  { %876 = vadd.xlane.f32.xlu1 %v717_v41  ;;  %878 = vadd.xlane.f32.xlu2 %v718_v38  ;;  %v1198_v38 = vperm.slane %v5198_v20, 0  ;;  %v733_v41 = vmul.f32 %v477_v22, %v5155_v13  ;;  %v5230_v13 = vpop.f32.mrf.mxu0  ;;  %v483_v57 = vperm.slane %v364_v37, 0 }
  0xf6   :  { %v368_v7 = vrot.slane %v5230_v13, 2  ;;  %v372_v22 = vrot.slane %v5230_v13, 6  ;;  %v370_v31 = vrot.slane %v5230_v13, 4  ;;  %v367_v36 = vrot.slane %v5230_v13, 1 }
  0xf7   :  { %v5261_v12 = vmul.f32 %v483_v57, %v5170_v34 }
  0xf8   :  { %v490_v55 = vperm.slane %v370_v31, 0 }
  0xfb   :  { %880 = vadd.xlane.f32.xlu0 %v719_v45  ;;  %v478_v45 = vperm.slane %v126_v18, 0 }
  0xfd   :  { %884 = vadd.xlane.f32.xlu2 %v721_v48  ;;  %882 = vadd.xlane.f32.xlu1 %v720_v49  ;;  %v5226_v48 = vpop.f32.mrf.mxu2  ;;  %v5228_v49 = vperm.slane %v1089_v28, 0  ;;  %v734_v1 = vmul.f32 %v478_v45, %v5170_v34  ;;  %v488_v28 = vperm.slane %v368_v7, 0 }
 0x103   :  { %886 = vadd.xlane.f32.xlu0 %v722_v59  ;;  %v5232_v59 = vperm.slane %v1090_v42, 0 }
 0x105   :  { %890 = vadd.xlane.f32.xlu2 %v724_v56  ;;  %888 = vadd.xlane.f32.xlu1 %v723_v62  ;;  %v5236_v56 = vpop.f32.mrf.mxu1  ;;  %v484_v62 = vperm.slane %v365_v43, 0 }
 0x106   :  { %v1093_v10 = vrot.slane %v5236_v56, 1  ;;  %v1206_v26 = vperm.slane %v5236_v56, 0  ;;  %v1095_v30 = vrot.slane %v5236_v56, 3 }
 0x107   :  { %v5270_v18 = vmul.f32 %v484_v62, %v5170_v34 }
 0x108   :  { %v5298_v54 = vperm.slane %v1095_v30, 0  ;;  %v1097_v30 = vrot.slane %v5236_v56, 5 }
 0x10b   :  { %892 = vadd.xlane.f32.xlu0 %v725_v3 }
 0x10d   :  { %894 = vadd.xlane.f32.xlu1 %v726_v4  ;;  %896 = vadd.xlane.f32.xlu2 %v727_v5  ;;  %v735_v4 = vmul.f32 %v479_v19, %v5170_v34  ;;  %v486_v5 = vperm.slane %v5230_v13, 0  ;;  %v5281_v34 = vperm.slane %v1093_v10, 0  ;;  %v744_v19 = vmul.f32 %v488_v28, %v5185_v52  ;;  %v5322_v28 = vpop.f32.mrf.mxu2 }
 0x10f   :  { %v742_v25 = vmul.f32 %v486_v5, %v5185_v52 }
 0x113   :  { %898 = vadd.xlane.f32.xlu0 %v728_v16 }
 0x115   :  { %900 = vadd.xlane.f32.xlu1 %v729_v58  ;;  %902 = vadd.xlane.f32.xlu2 %v730_v21 }
 0x116   :  { %v5207_v27 = vpop.xlane.xlu0 %814 }
 0x117   :  { %v1823_v63 = vmul.f32 %v5207_v27, %v5226_v48 }
 0x118   :  { %v5218_v39 = vpop.xlane.xlu2 %822  ;;  %v5220_v40 = vpop.xlane.xlu1 %818 }
 0x119   :  { %v1951_v58 = vsel %vm1582_vm0, %v1823_v63, 0.0  ;;  %v1827_v29 = vmul.f32 %v5218_v39, %v5226_v48  ;;  %v1825_v33 = vmul.f32 %v5220_v40, %v5226_v48  ;;  %v1456_v44 = vmul.f32 %v1200_v50, %v5220_v40 }
 0x11a   :  { %v1952_v32 = vrot.slane %v1951_v58, 4  ;;  %v487_v40 = vperm.slane %v367_v36, 0 }
 0x11b   :  { %904 = vadd.xlane.f32.xlu0 %v731_v23  ;;  %v369_v23 = vrot.slane %v5230_v13, 3  ;;  %v1979_v51 = vsel %vm1582_vm0, %v1827_v29, 0.0  ;;  %v1965_v60 = vsel %vm1582_vm0, %v1825_v33, 0.0  ;;  %v1586_v5 = vsel %vm1582_vm0, %v1456_v44, 0.0 }
 0x11c   :  { %v1953_v57 = vadd.f32 %v1952_v32, %v1951_v58  ;;  %v1966_v10 = vrot.slane %v1965_v60, 4  ;;  %v1096_v58 = vrot.slane %v5236_v56, 4  ;;  %v5325_v29 = vmul.f32 %v487_v40, %v5185_v52 }
 0x11d   :  { %906 = vadd.xlane.f32.xlu1 %v732_v24  ;;  %908 = vadd.xlane.f32.xlu2 %v733_v41  ;;  %v1454_v24 = vmul.f32 %v1198_v38, %v5207_v27  ;;  %v1094_v38 = vrot.slane %v5236_v56, 2  ;;  %v492_v41 = vperm.slane %v372_v22, 0  ;;  %v489_v42 = vperm.slane %v369_v23, 0 }
 0x11e   :  { %v817_v3 = vpop.xlane.xlu0 %816  ;;  %v1954_v22 = vrot.slane %v1953_v57, 2  ;;  %v1458_v23 = vmul.f32 %v5228_v49, %v5218_v39 }
 0x11f   :  { %v1455_v14 = vmul.f32 %v1199_v53, %v817_v3  ;;  %v1824_v21 = vmul.f32 %v817_v3, %v5226_v48  ;;  %v1583_v43 = vsel %vm1582_vm0, %v1454_v24, 0.0  ;;  %v5311_v3 = vmul.f32 %v489_v42, %v5185_v52 }
 0x120   :  { %v5263_v15 = vpop.xlane.xlu2 %824  ;;  %v821_v16 = vpop.xlane.xlu1 %820 }
 0x121   :  { %v1584_v27 = vsel %vm1582_vm0, %v1455_v14, 0.0  ;;  %v1958_v37 = vsel %vm1582_vm0, %v1824_v21, 0.0  ;;  %v1826_v45 = vmul.f32 %v821_v16, %v5226_v48  ;;  %v1828_v50 = vmul.f32 %v5263_v15, %v5226_v48 }
 0x122   :  { %v1585_v53 = vadd.f32 %v1584_v27, %v1583_v43  ;;  %v1959_v61 = vrot.slane %v1958_v37, 4  ;;  %v1457_v7 = vmul.f32 %v5240_v0, %v821_v16  ;;  %v5318_v21 = vmul.f32 %v490_v55, %v5185_v52 }
 0x123   :  { %910 = vadd.xlane.f32.xlu0 %v734_v1  ;;  %v5305_v1 = vperm.slane %v1094_v38, 0  ;;  %v1972_v8 = vsel %vm1582_vm0, %v1826_v45, 0.0  ;;  %v1986_v0 = vsel %vm1582_vm0, %v1828_v50, 0.0  ;;  %v1967_v27 = vadd.f32 %v1966_v10, %v1965_v60 }
 0x124   :  { %v1587_v14 = vadd.f32 %v1586_v5, %v1585_v53  ;;  %v1960_v24 = vadd.f32 %v1959_v61, %v1958_v37  ;;  %v1973_v16 = vrot.slane %v1972_v8, 4  ;;  %v1588_v39 = vsel %vm1582_vm0, %v1457_v7, 0.0 }
 0x125   :  { %914 = vadd.xlane.f32.xlu2 %v736_v2  ;;  %912 = vadd.xlane.f32.xlu1 %v735_v4  ;;  %v5308_v2 = vmul.f32 %v492_v41, %v5185_v52  ;;  %v1980_v4 = vrot.slane %v1979_v51, 4  ;;  %v1955_v38 = vadd.f32 %v1954_v22, %v1953_v57  ;;  %v1987_v42 = vrot.slane %v1986_v0, 4 }
 0x126   :  { %v5294_v47 = vpop.xlane.xlu0 %826  ;;  %v1589_v36 = vadd.f32 %v1588_v39, %v1587_v14  ;;  %v1961_v41 = vrot.slane %v1960_v24, 2  ;;  %v1974_v45 = vadd.f32 %v1973_v16, %v1972_v8  ;;  %v1211_v53 = vperm.slane %v1097_v30, 0 }
 0x127   :  { %v1981_v31 = vadd.f32 %v1980_v4, %v1979_v51  ;;  %v1829_v49 = vmul.f32 %v5294_v47, %v5226_v48  ;;  %v1459_v60 = vmul.f32 %v5232_v59, %v5263_v15  ;;  %v1956_v5 = vrot.slane %v1955_v38, 1 }
 0x128   :  { %v5301_v62 = vpop.xlane.xlu1 %828  ;;  %v831_v63 = vpop.xlane.xlu2 %830  ;;  %v1962_v7 = vadd.f32 %v1961_v41, %v1960_v24  ;;  %v1975_v10 = vrot.slane %v1974_v45, 2  ;;  %v1460_v59 = vmul.f32 %v5265_v17, %v5294_v47 }
 0x129   :  { %v1462_v32 = vmul.f32 %v1206_v26, %v831_v63  ;;  %v1831_v37 = vmul.f32 %v831_v63, %v5322_v28  ;;  %v1982_v55 = vrot.slane %v1981_v31, 2  ;;  %v1993_v57 = vsel %vm1582_vm0, %v1829_v49, 0.0 }
 0x12a   :  { %v1968_v63 = vrot.slane %v1967_v27, 2  ;;  %v1830_v8 = vmul.f32 %v5301_v62, %v5226_v48  ;;  %v1994_v15 = vrot.slane %v1993_v57, 4 }
 0x12b   :  { %926 = vadd.xlane.f32.xlu0 %v742_v25  ;;  %v1098_v25 = vrot.slane %v5236_v56, 6  ;;  %v1598_v61 = vsel %vm1582_vm0, %v1462_v32, 0.0  ;;  %v2007_v50 = vsel %vm1582_vm0, %v1831_v37, 0.0 }
 0x12c   :  { %v1969_v17 = vadd.f32 %v1968_v63, %v1967_v27  ;;  %v1995_v49 = vadd.f32 %v1994_v15, %v1993_v57 }
 0x12d   :  { %916 = vadd.xlane.f32.xlu2 %v5247_v6  ;;  %918 = vadd.xlane.f32.xlu1 %v5254_v9  ;;  %v1210_v6 = vperm.slane %v1096_v58, 0  ;;  %v1590_v9 = vsel %vm1582_vm0, %v1458_v23, 0.0  ;;  %v1212_v51 = vperm.slane %v1098_v25, 0  ;;  %v1592_v58 = vsel %vm1582_vm0, %v1459_v60, 0.0 }
 0x12e   :  { %v5335_v33 = vpop.xlane.xlu0 %832  ;;  %v1591_v40 = vadd.f32 %v1590_v9, %v1589_v36  ;;  %v1957_v9 = vadd.f32 %v1956_v5, %v1955_v38 }
 0x12f   :  { %v1463_v26 = vmul.f32 %v5281_v34, %v5335_v33  ;;  %v1988_v34 = vadd.f32 %v1987_v42, %v1986_v0  ;;  %v5364_v0 = vadd.f32 %v1982_v55, %v1981_v31  ;;  %v1461_v31 = vmul.f32 %v5267_v46, %v5301_v62 }
 0x130   :  { %v5339_v43 = vpop.xlane.xlu2 %836  ;;  %v5341_v44 = vpop.xlane.xlu1 %834  ;;  %v1593_v47 = vadd.f32 %v1592_v58, %v1591_v40  ;;  %v1996_v62 = vrot.slane %v1995_v49, 2 }
 0x131   :  { %v1599_v4 = vsel %vm1582_vm0, %v1463_v26, 0.0  ;;  %v1465_v22 = vmul.f32 %v5298_v54, %v5339_v43  ;;  %v1464_v23 = vmul.f32 %v5305_v1, %v5341_v44  ;;  %v1989_v25 = vrot.slane %v1988_v34, 2 }
 0x132   :  { %v1600_v14 = vadd.f32 %v1599_v4, %v1598_v61  ;;  %v1976_v54 = vadd.f32 %v1975_v10, %v1974_v45  ;;  %v1594_v1 = vsel %vm1582_vm0, %v1460_v59, 0.0  ;;  %v1970_v45 = vrot.slane %v1969_v17, 1 }
 0x133   :  { %930 = vadd.xlane.f32.xlu0 %v744_v19  ;;  %v2008_v19 = vrot.slane %v2007_v50, 4  ;;  %v1601_v30 = vsel %vm1582_vm0, %v1464_v23, 0.0  ;;  %v1603_v36 = vsel %vm1582_vm0, %v1465_v22, 0.0  ;;  %v1595_v41 = vadd.f32 %v1594_v1, %v1593_v47  ;;  %v5395_v23 = vpop.f32.mrf.mxu2 }
 0x134   :  { %v1602_v32 = vadd.f32 %v1601_v30, %v1600_v14  ;;  %v1990_v60 = vadd.f32 %v1989_v25, %v1988_v34  ;;  %v1977_v46 = vrot.slane %v1976_v54, 1  ;;  %v1596_v38 = vsel %vm1582_vm0, %v1461_v31, 0.0 }
 0x135   :  { %924 = vadd.xlane.f32.xlu2 %v5258_v11  ;;  %920 = vadd.xlane.f32.xlu1 %v5261_v12  ;;  %v1963_v11 = vrot.slane %v1962_v7, 1  ;;  %v2000_v12 = vsel %vm1582_vm0, %v1830_v8, 0.0  ;;  %v2009_v27 = vadd.f32 %v2008_v19, %v2007_v50  ;;  %v1597_v4 = vadd.f32 %v1596_v38, %v1595_v41 }
 0x136   :  { %v5362_v24 = vpop.xlane.xlu0 %838  ;;  %v2001_v42 = vrot.slane %v2000_v12, 4  ;;  %v1604_v26 = vadd.f32 %v1603_v36, %v1602_v32  ;;  %v1991_v8 = vrot.slane %v1990_v60, 1  ;;  %v1978_v10 = vadd.f32 %v1977_v46, %v1976_v54 }
 0x137   :  { %v1466_v16 = vmul.f32 %v1210_v6, %v5362_v24  ;;  %v1964_v55 = vadd.f32 %v1963_v11, %v1962_v7  ;;  %v2010_v40 = vrot.slane %v2009_v27, 2  ;;  %v371_v7 = vrot.slane %v5230_v13, 5 }
 0x138   :  { %v5369_v39 = vpop.xlane.xlu1 %840  ;;  %v5376_v6 = vpop.xlane.xlu2 %842  ;;  %v2002_v5 = vadd.f32 %v2001_v42, %v2000_v12  ;;  %v1997_v59 = vadd.f32 %v1996_v62, %v1995_v49  ;;  %v2847_v11 = vadd.f32 %v1597_v4, %v5226_v48  ;;  %v1834_v25 = vmul.f32 %v5339_v43, %v5322_v28 }
 0x139   :  { %v1605_v37 = vsel %vm1582_vm0, %v1466_v16, 0.0  ;;  %v1467_v57 = vmul.f32 %v1211_v53, %v5369_v39  ;;  %v1468_v63 = vmul.f32 %v1212_v51, %v5376_v6  ;;  %v1984_v53 = vrot.slane %v5364_v0, 1  ;;  %v5401_v12 = vpop.f32.mrf.mxu1 }
 0x13a   :  { %v1606_v61 = vadd.f32 %v1605_v37, %v1604_v26  ;;  %v1971_v51 = vadd.f32 %v1970_v45, %v1969_v17  ;;  %v2011_v14 = vadd.f32 %v2010_v40, %v2009_v27  ;;  %v2003_v16 = vrot.slane %v2002_v5, 2  ;;  %8559 = vst [vmem:[#allocation6_spill] sm:$0xff] %v5401_v12 }
 0x13b   :  { %938 = vadd.xlane.f32.xlu0 %v5308_v2  ;;  %v1832_v2 = vmul.f32 %v5335_v33, %v5322_v28  ;;  %v1607_v50 = vsel %vm1582_vm0, %v1467_v57, 0.0  ;;  %v1609_v15 = vsel %vm1582_vm0, %v1468_v63, 0.0  ;;  %v1833_v30 = vmul.f32 %v5341_v44, %v5322_v28 }
 0x13c   :  { %v1608_v34 = vadd.f32 %v1607_v50, %v1606_v61  ;;  %v1214_v1 = vperm.slane %v5401_v12, 0  ;;  %v5407_v49 = vperm.slane %v371_v7, 0  ;;  %v1985_v32 = vadd.f32 %v1984_v53, %v5364_v0 }
 0x13d   :  { %922 = vadd.xlane.f32.xlu1 %v5270_v18  ;;  %932 = vadd.xlane.f32.xlu2 %v5311_v3  ;;  %v3008_v18 = vsel %vm3007_vm1, %v1964_v55, %v1957_v9  ;;  %v1099_v3 = vrot.slane %v5236_v56, 7  ;;  %v2014_v58 = vsel %vm1582_vm0, %v1832_v2, 0.0  ;;  %v1998_v31 = vrot.slane %v1997_v59, 1 }
 0x13e   :  { %v5392_v33 = vpop.xlane.xlu0 %844  ;;  %v1610_v22 = vadd.f32 %v1609_v15, %v1608_v34  ;;  %v3010_v47 = vsel %vm3009_vm2, %v1971_v51, %v3008_v18  ;;  %v2015_v27 = vrot.slane %v2014_v58, 4  ;;  %v5412_v43 = vadd.f32 %v1991_v8, %v1990_v60 }
 0x13f   :  { %v1213_v19 = vperm.slane %v1099_v3, 0  ;;  %v3012_v36 = vsel %vm3011_vm3, %v1978_v10, %v3010_v47  ;;  %v2012_v37 = vrot.slane %v2011_v14, 1  ;;  %v5417_v9 = vadd.f32 %v2003_v16, %v2002_v5 }
 0x140   :  { %v847_v17 = vpop.xlane.xlu1 %846  ;;  %4608 = vtanh.f32 %v2847_v11  ;;  %v2028_v0 = vsel %vm1582_vm0, %v1834_v25, 0.0  ;;  %v849_v42 = vpop.xlane.xlu2 %848  ;;  %v2021_v26 = vsel %vm1582_vm0, %v1833_v30, 0.0  ;;  %v1100_v60 = vrot.slane %v5401_v12, 1 }
 0x141   :  { %v1469_v54 = vmul.f32 %v1213_v19, %v5392_v33  ;;  %v1839_v48 = vmul.f32 %v847_v17, %v5395_v23  ;;  %v1470_v45 = vmul.f32 %v1214_v1, %v847_v17  ;;  %v5428_v57 = vsel %vm3013_vm4, %v1985_v32, %v3012_v36 }
 0x142   :  { %v5432_v46 = vadd.f32 %v2015_v27, %v2014_v58  ;;  %v5434_v61 = vadd.f32 %v2012_v37, %v2011_v14  ;;  %v1835_v63 = vmul.f32 %v5362_v24, %v5322_v28  ;;  %v1215_v38 = vperm.slane %v1100_v60, 0  ;;  %v5450_v14 = vld [vmem:[%s8527_s1 + $0x48] sm:$0xff] }
 0x143   :  { %v1611_v44 = vsel %vm1582_vm0, %v1469_v54, 0.0  ;;  %v2063_v55 = vsel %vm1582_vm0, %v1839_v48, 0.0  ;;  %v1840_v40 = vmul.f32 %v849_v42, %v5395_v23  ;;  %v2029_v2 = vrot.slane %v2028_v0, 4  ;;  %280 = vmatmul.f32.gmra.mxu2 %v5450_v14 }
 0x144   :  { %v5420_v41 = vadd.f32 %v1611_v44, %v1610_v22  ;;  %v2064_v62 = vrot.slane %v2063_v55, 4  ;;  %v2022_v50 = vrot.slane %v2021_v26, 4  ;;  %v1613_v7 = vsel %vm1582_vm0, %v1470_v45, 0.0 }
 0x145   :  { %934 = vadd.xlane.f32.xlu2 %v5318_v21  ;;  %928 = vadd.xlane.f32.xlu1 %v5325_v29  ;;  %v5423_v21 = vpop.f32.mrf.mxu0  ;;  %v5430_v29 = vadd.f32 %v1998_v31, %v1997_v59  ;;  %v1471_v51 = vmul.f32 %v1215_v38, %v849_v42  ;;  %v2070_v18 = vsel %vm1582_vm0, %v1840_v40, 0.0  ;;  %v1101_v34 = vrot.slane %v5401_v12, 2 }
 0x146   :  { %v2065_v53 = vadd.f32 %v2064_v62, %v2063_v55  ;;  %v494_v4 = vperm.slane %v5423_v21, 0  ;;  %v851_v5 = vpop.xlane.xlu0 %850  ;;  %v5443_v3 = vpop.eup %4608  ;;  %v2017_v24 = vrot.slane %v5432_v46, 2  ;;  %v2071_v10 = vrot.slane %v2070_v18, 4 }
 0x147   :  { %v5453_v58 = vsel %vm1582_vm0, %v1835_v63, 0.0  ;;  %v1614_v19 = vsel %vm1582_vm0, %v1471_v51, 0.0  ;;  %v1216_v22 = vperm.slane %v1101_v34, 0  ;;  %v1841_v17 = vmul.f32 %v851_v5, %v5395_v23 }
 0x148   :  { %v2066_v8 = vrot.slane %v2065_v53, 2  ;;  %v750_v59 = vmul.f32 %v494_v4, %v5215_v35  ;;  %v853_v15 = vpop.xlane.xlu1 %852  ;;  %v5458_v47 = vadd.f32 %v2029_v2, %v2028_v0  ;;  %v1615_v11 = vadd.f32 %v1614_v19, %v1613_v7  ;;  %v855_v37 = vpop.xlane.xlu2 %854 }
 0x149   :  { %v2072_v25 = vadd.f32 %v2071_v10, %v2070_v18  ;;  %v1472_v30 = vmul.f32 %v1216_v22, %v851_v5  ;;  %v2077_v54 = vsel %vm1582_vm0, %v1841_v17, 0.0  ;;  %v1102_v1 = vrot.slane %v5401_v12, 3 }
 0x14a   :  { %v2067_v16 = vadd.f32 %v2066_v8, %v2065_v53  ;;  %942 = vadd.xlane.f32.xlu0 %v750_v59  ;;  %v1842_v32 = vmul.f32 %v853_v15, %v5395_v23  ;;  %v5463_v31 = vadd.f32 %v2022_v50, %v2021_v26  ;;  %v2078_v36 = vrot.slane %v2077_v54, 4 }
 0x14b   :  { %v2073_v48 = vrot.slane %v2072_v25, 2  ;;  %v1616_v44 = vsel %vm1582_vm0, %v1472_v30, 0.0  ;;  %v1217_v0 = vperm.slane %v1102_v1, 0  ;;  %v1103_v45 = vrot.slane %v5401_v12, 4 }
 0x14c   :  { %v2068_v27 = vrot.slane %v2067_v16, 1  ;;  %v2084_v42 = vsel %vm1582_vm0, %v1842_v32, 0.0  ;;  %v1617_v62 = vadd.f32 %v1616_v44, %v1615_v11  ;;  %v2079_v63 = vadd.f32 %v2078_v36, %v2077_v54 }
 0x14d   :  { %v2074_v60 = vadd.f32 %v2073_v48, %v2072_v25  ;;  %v1473_v38 = vmul.f32 %v1217_v0, %v853_v15  ;;  %v2085_v40 = vrot.slane %v2084_v42, 4  ;;  %v1218_v2 = vperm.slane %v1103_v45, 0 }
 0x14e   :  { %v2069_v55 = vadd.f32 %v2068_v27, %v2067_v16  ;;  %v1843_v26 = vmul.f32 %v855_v37, %v5395_v23  ;;  %v2080_v53 = vrot.slane %v2079_v63, 2  ;;  %v375_v4 = vrot.slane %v5423_v21, 2  ;;  %v857_v11 = vpop.xlane.xlu0 %856 }
 0x14f   :  { %v2075_v50 = vrot.slane %v2074_v60, 1  ;;  %v747_v5 = vmul.f32 %v5407_v49, %v5185_v52  ;;  %v1618_v7 = vsel %vm1582_vm0, %v1473_v38, 0.0  ;;  %v2086_v51 = vadd.f32 %v2085_v40, %v2084_v42 }
 0x150   :  { %v1474_v18 = vmul.f32 %v1218_v2, %v855_v37  ;;  %v2091_v34 = vsel %vm1582_vm0, %v1843_v26, 0.0  ;;  %v2081_v10 = vadd.f32 %v2080_v53, %v2079_v63  ;;  %v1619_v59 = vadd.f32 %v1618_v7, %v1617_v62 }
 0x151   :  { %v2076_v8 = vadd.f32 %v2075_v50, %v2074_v60  ;;  %v2092_v15 = vrot.slane %v2091_v34, 4  ;;  %936 = vadd.xlane.f32.xlu2 %v747_v5  ;;  %v2087_v19 = vrot.slane %v2086_v51, 2  ;;  %v496_v17 = vperm.slane %v375_v4, 0  ;;  %v5483_v60 = vpop.xlane.xlu1 %858  ;;  %v5490_v4 = vpop.xlane.xlu2 %860 }
 0x152   :  { %v1620_v22 = vsel %vm1582_vm0, %v1474_v18, 0.0  ;;  %v373_v16 = vrot.slane %v5230_v13, 7  ;;  %v2082_v25 = vrot.slane %v2081_v10, 1  ;;  %v1104_v48 = vrot.slane %v5401_v12, 5 }
 0x153   :  { %v3028_v49 = vsel %vm3007_vm1, %v2076_v8, %v2069_v55  ;;  %v1621_v30 = vadd.f32 %v1620_v22, %v1619_v59  ;;  %v2093_v54 = vadd.f32 %v2092_v15, %v2091_v34  ;;  %v2088_v1 = vadd.f32 %v2087_v19, %v2086_v51 }
 0x154   :  { %v752_v32 = vmul.f32 %v496_v17, %v5215_v35  ;;  %v493_v27 = vperm.slane %v373_v16, 0  ;;  %v2083_v36 = vadd.f32 %v2082_v25, %v2081_v10  ;;  %v1844_v44 = vmul.f32 %v857_v11, %v5395_v23 }
 0x155   :  { %v2094_v37 = vrot.slane %v2093_v54, 2  ;;  %v1105_v0 = vrot.slane %v5401_v12, 6  ;;  %v2036_v13 = vrot.slane %v5453_v58, 4  ;;  %v2089_v42 = vrot.slane %v2088_v1, 1 }
 0x156   :  { %946 = vadd.xlane.f32.xlu0 %v752_v32  ;;  %v749_v45 = vmul.f32 %v493_v27, %v5185_v52  ;;  %v1219_v55 = vperm.slane %v1104_v48, 0  ;;  %v3029_v62 = vsel %vm3009_vm2, %v2083_v36, %v3028_v49  ;;  %v2098_v38 = vsel %vm1582_vm0, %v1844_v44, 0.0  ;;  %v5506_v27 = vpop.f32.mrf.mxu1  ;;  %v5518_v44 = vpop.f32.mrf.mxu2 }
 0x157   :  { %v2095_v63 = vadd.f32 %v2094_v37, %v2093_v54  ;;  %v1220_v40 = vperm.slane %v1105_v0, 0  ;;  %v2018_v2 = vadd.f32 %v2017_v24, %v5432_v46  ;;  %v2090_v26 = vadd.f32 %v2089_v42, %v2088_v1  ;;  %8560 = vst [vmem:[#allocation7_spill] sm:$0xff] %v5506_v27  ;;  %v863_v0 = vpop.xlane.xlu0 %862 }
 0x158   :  { %940 = vadd.xlane.f32.xlu1 %v749_v45  ;;  %v1475_v50 = vmul.f32 %v1219_v55, %v857_v11  ;;  %v2099_v53 = vrot.slane %v2098_v38, 4  ;;  %v1837_v52 = vmul.f32 %v5376_v6, %v5322_v28  ;;  %v1106_v51 = vrot.slane %v5401_v12, 7 }
 0x159   :  { %v2096_v5 = vrot.slane %v2095_v63, 1  ;;  %v1476_v7 = vmul.f32 %v1220_v40, %v5483_v60  ;;  %v2031_v18 = vrot.slane %v5458_v47, 2  ;;  %v3030_v34 = vsel %vm3011_vm3, %v2090_v26, %v3029_v62 }
 0x15a   :  { %v1622_v46 = vsel %vm1582_vm0, %v1475_v50, 0.0  ;;  %v2100_v24 = vadd.f32 %v2099_v53, %v2098_v38  ;;  %v2024_v8 = vrot.slane %v5463_v31, 2  ;;  %v2037_v6 = vadd.f32 %v2036_v13, %v5453_v58  ;;  %v867_v53 = vpop.xlane.xlu2 %866 }
 0x15b   :  { %v2097_v10 = vadd.f32 %v2096_v5, %v2095_v63  ;;  %v1623_v59 = vadd.f32 %v1622_v46, %v1621_v30  ;;  %v1624_v15 = vsel %vm1582_vm0, %v1476_v7, 0.0  ;;  %v1221_v22 = vperm.slane %v1106_v51, 0 }
 0x15c   :  { %v2101_v19 = vrot.slane %v2100_v24, 2  ;;  %v376_v17 = vrot.slane %v5423_v21, 3  ;;  %v2019_v16 = vrot.slane %v2018_v2, 1  ;;  %v2049_v11 = vsel %vm1582_vm0, %v1837_v52, 0.0 }
 0x15d   :  { %v3031_v49 = vsel %vm3013_vm4, %v2097_v10, %v3030_v34  ;;  %v1625_v25 = vadd.f32 %v1624_v15, %v1623_v59  ;;  %v1477_v1 = vmul.f32 %v1221_v22, %v5490_v4  ;;  %v378_v30 = vrot.slane %v5423_v21, 5 }
 0x15e   :  { %v2102_v54 = vadd.f32 %v2101_v19, %v2100_v24  ;;  %v497_v32 = vperm.slane %v376_v17, 0  ;;  %v5510_v58 = vadd.f32 %v2031_v18, %v5458_v47  ;;  %v5513_v48 = vadd.f32 %v2024_v8, %v5463_v31  ;;  %v865_v18 = vpop.xlane.xlu1 %864 }
 0x15f   :  { %v1836_v36 = vmul.f32 %v5369_v39, %v5322_v28  ;;  %v374_v37 = vrot.slane %v5423_v21, 1  ;;  %v1626_v42 = vsel %vm1582_vm0, %v1477_v1, 0.0  ;;  %v499_v55 = vperm.slane %v378_v30, 0  ;;  %v5528_v39 = vld [vmem:[%s8527_s1 + $0x50] sm:$0xff] }
 0x160   :  { %v2103_v13 = vrot.slane %v2102_v54, 1  ;;  %v753_v45 = vmul.f32 %v497_v32, %v5215_v35  ;;  %v2038_v62 = vrot.slane %v2037_v6, 2  ;;  %v5522_v47 = vadd.f32 %v1626_v42, %v1625_v25  ;;  %283 = vmatmul.f32.gmra.mxu2 %v5528_v39 }
 0x161   :  { %v495_v63 = vperm.slane %v374_v37, 0  ;;  %v1222_v31 = vperm.slane %v5506_v27, 0  ;;  %v2050_v38 = vrot.slane %v2049_v11, 4  ;;  %v755_v26 = vmul.f32 %v499_v55, %v5215_v35 }
 0x162   :  { %v2104_v40 = vadd.f32 %v2103_v13, %v2102_v54  ;;  %948 = vadd.xlane.f32.xlu0 %v753_v45  ;;  %v1847_v50 = vmul.f32 %v863_v0, %v5518_v44  ;;  %v5532_v52 = vadd.f32 %v2019_v16, %v2018_v2  ;;  %v2033_v5 = vrot.slane %v5510_v58, 1 }
 0x163   :  { %v5536_v7 = vsel %vm1582_vm0, %v1836_v36, 0.0  ;;  %v751_v51 = vmul.f32 %v495_v63, %v5215_v35  ;;  %v2026_v34 = vrot.slane %v5513_v48, 1  ;;  %952 = vadd.xlane.f32.xlu2 %v755_v26  ;;  %v1108_v2 = vrot.slane %v5506_v27, 2  ;;  %v869_v63 = vpop.xlane.xlu0 %868 }
 0x164   :  { %v5542_v46 = vsel %vm3015_vm5, %v2104_v40, %v3031_v49  ;;  %v2119_v24 = vsel %vm1582_vm0, %v1847_v50, 0.0  ;;  %v5546_v8 = vadd.f32 %v2038_v62, %v2037_v6  ;;  %v1478_v10 = vmul.f32 %v1222_v31, %v863_v0 }
 0x165   :  { %8561 = vst [vmem:[#allocation8_spill] sm:$0xff] %v5542_v46  ;;  %944 = vadd.xlane.f32.xlu1 %v751_v51  ;;  %v2120_v59 = vrot.slane %v2119_v24, 4  ;;  %v1849_v15 = vmul.f32 %v867_v53, %v5518_v44  ;;  %v1224_v19 = vperm.slane %v1108_v2, 0  ;;  %v1107_v22 = vrot.slane %v5506_v27, 1 }
 0x166   :  { %v1848_v17 = vmul.f32 %v865_v18, %v5518_v44  ;;  %v379_v16 = vrot.slane %v5423_v21, 6  ;;  %v5552_v49 = vadd.f32 %v2050_v38, %v2049_v11  ;;  %v380_v6 = vrot.slane %v5423_v21, 7 }
 0x167   :  { %v2121_v25 = vadd.f32 %v2120_v59, %v2119_v24  ;;  %v2133_v54 = vsel %vm1582_vm0, %v1849_v15, 0.0  ;;  %v1480_v1 = vmul.f32 %v1224_v19, %v867_v53  ;;  %v1223_v30 = vperm.slane %v1107_v22, 0 }
 0x168   :  { %v2134_v32 = vrot.slane %v2133_v54, 4  ;;  %v2126_v36 = vsel %vm1582_vm0, %v1848_v17, 0.0  ;;  %v500_v13 = vperm.slane %v379_v16, 0  ;;  %v501_v42 = vperm.slane %v380_v6, 0  ;;  %v871_v17 = vpop.xlane.xlu1 %870 }
 0x169   :  { %v2122_v37 = vrot.slane %v2121_v25, 2  ;;  %v2127_v0 = vrot.slane %v2126_v36, 4  ;;  %v1628_v45 = vsel %vm1582_vm0, %v1478_v10, 0.0  ;;  %v1479_v62 = vmul.f32 %v1223_v30, %v865_v18 }
 0x16a   :  { %v2135_v55 = vadd.f32 %v2134_v32, %v2133_v54  ;;  %v377_v11 = vrot.slane %v5423_v21, 4  ;;  %v756_v40 = vmul.f32 %v500_v13, %v5215_v35  ;;  %v757_v26 = vmul.f32 %v501_v42, %v5215_v35 }
 0x16b   :  { %v2123_v31 = vadd.f32 %v2122_v37, %v2121_v25  ;;  %v2128_v38 = vadd.f32 %v2127_v0, %v2126_v36  ;;  %v1629_v53 = vsel %vm1582_vm0, %v1479_v62, 0.0  ;;  %v1109_v24 = vrot.slane %v5506_v27, 3  ;;  %v5576_v62 = vpop.f32.mrf.mxu0 }
 0x16c   :  { %v2136_v50 = vrot.slane %v2135_v55, 2  ;;  %v498_v51 = vperm.slane %v377_v11, 0  ;;  %v1631_v2 = vsel %vm1582_vm0, %v1480_v1, 0.0  ;;  %v1630_v10 = vadd.f32 %v1629_v53, %v1628_v45  ;;  %954 = vadd.xlane.f32.xlu0 %v756_v40  ;;  %956 = vadd.xlane.f32.xlu2 %v757_v26 }
 0x16d   :  { %v2129_v59 = vrot.slane %v2128_v38, 2  ;;  %v1850_v21 = vmul.f32 %v869_v63, %v5518_v44  ;;  %v1225_v19 = vperm.slane %v1109_v24, 0  ;;  %v1111_v22 = vrot.slane %v5506_v27, 5 }
 0x16e   :  { %v2137_v18 = vadd.f32 %v2136_v50, %v2135_v55  ;;  %v754_v15 = vmul.f32 %v498_v51, %v5215_v35  ;;  %v2124_v16 = vrot.slane %v2123_v31, 1  ;;  %v1632_v54 = vadd.f32 %v1631_v2, %v1630_v10  ;;  %v5571_v35 = vpop.xlane.xlu2 %872 }
 0x16f   :  { %v2130_v25 = vadd.f32 %v2129_v59, %v2128_v38  ;;  %v2140_v6 = vsel %vm1582_vm0, %v1850_v21, 0.0  ;;  %v1481_v1 = vmul.f32 %v1225_v19, %v869_v63  ;;  %v1227_v36 = vperm.slane %v1111_v22, 0 }
 0x170   :  { %v2138_v32 = vrot.slane %v2137_v18, 1  ;;  %950 = vadd.xlane.f32.xlu1 %v754_v15  ;;  %v2141_v30 = vrot.slane %v2140_v6, 4  ;;  %v3021_v37 = vsel %vm3007_vm1, %v5532_v52, %v5434_v61  ;;  %v1110_v13 = vrot.slane %v5506_v27, 4 }
 0x171   :  { %v2131_v0 = vrot.slane %v2130_v25, 1  ;;  %v1851_v42 = vmul.f32 %v871_v17, %v5518_v44  ;;  %v2043_v45 = vrot.slane %v5536_v7, 4  ;;  %v1633_v11 = vsel %vm1582_vm0, %v1481_v1, 0.0 }
 0x172   :  { %v2139_v55 = vadd.f32 %v2138_v32, %v2137_v18  ;;  %v2142_v63 = vadd.f32 %v2141_v30, %v2140_v6  ;;  %v2125_v38 = vadd.f32 %v2124_v16, %v2123_v31  ;;  %v1634_v26 = vadd.f32 %v1633_v11, %v1632_v54 }
 0x173   :  { %v2132_v40 = vadd.f32 %v2131_v0, %v2130_v25  ;;  %v1226_v50 = vperm.slane %v1110_v13, 0  ;;  %v2034_v61 = vadd.f32 %v2033_v5, %v5510_v58  ;;  %v1483_v53 = vmul.f32 %v1227_v36, %v5571_v35  ;;  %v5599_v0 = vpop.xlane.xlu0 %874 }
 0x174   :  { %v2143_v52 = vrot.slane %v2142_v63, 2  ;;  %v2147_v51 = vsel %vm1582_vm0, %v1851_v42, 0.0  ;;  %v381_v59 = vrot.slane %v5576_v62, 1  ;;  %v2027_v31 = vadd.f32 %v2026_v34, %v5513_v48 }
 0x175   :  { %v3035_v24 = vsel %vm3007_vm1, %v2132_v40, %v2125_v38  ;;  %v1482_v2 = vmul.f32 %v1226_v50, %v871_v17  ;;  %v2148_v10 = vrot.slane %v2147_v51, 4  ;;  %v502_v58 = vperm.slane %v5576_v62, 0 }
 0x176   :  { %v2144_v21 = vadd.f32 %v2143_v52, %v2142_v63  ;;  %v3036_v18 = vsel %vm3009_vm2, %v2139_v55, %v3035_v24  ;;  %v503_v19 = vperm.slane %v381_v59, 0  ;;  %v382_v22 = vrot.slane %v5576_v62, 2  ;;  %v5602_v63 = vpop.f32.mrf.mxu2  ;;  %v879_v40 = vpop.xlane.xlu2 %878 }
 0x177   :  { %v1635_v5 = vsel %vm1582_vm0, %v1482_v2, 0.0  ;;  %v2149_v15 = vadd.f32 %v2148_v10, %v2147_v51  ;;  %v1637_v17 = vsel %vm1582_vm0, %v1483_v53, 0.0  ;;  %v758_v54 = vmul.f32 %v502_v58, %v5450_v14  ;;  %v5610_v51 = vpop.xlane.xlu1 %876 }
 0x178   :  { %v2145_v16 = vrot.slane %v2144_v21, 1  ;;  %v1636_v25 = vadd.f32 %v1635_v5, %v1634_v26  ;;  %v759_v48 = vmul.f32 %v503_v19, %v5450_v14  ;;  %v504_v34 = vperm.slane %v382_v22, 0  ;;  %v5623_v22 = vpop.f32.mrf.mxu1 }
 0x179   :  { %v2150_v6 = vrot.slane %v2149_v15, 2  ;;  %v1112_v32 = vrot.slane %v5506_v27, 6  ;;  %v2040_v1 = vrot.slane %v5546_v8, 1  ;;  %v2052_v30 = vrot.slane %v5552_v49, 2  ;;  %958 = vadd.xlane.f32.xlu2 %v758_v54  ;;  %8562 = vst [vmem:[#allocation9_spill] sm:$0xff] %v5623_v22 }
 0x17a   :  { %v2146_v36 = vadd.f32 %v2145_v16, %v2144_v21  ;;  %v1638_v13 = vadd.f32 %v1637_v17, %v1636_v25  ;;  %960 = vadd.xlane.f32.xlu0 %v759_v48  ;;  %v760_v55 = vmul.f32 %v504_v34, %v5450_v14  ;;  %v1113_v38 = vrot.slane %v5506_v27, 7 }
 0x17b   :  { %v2151_v42 = vadd.f32 %v2150_v6, %v2149_v15  ;;  %v1228_v11 = vperm.slane %v1112_v32, 0  ;;  %v2005_v26 = vrot.slane %v5417_v9, 1  ;;  %v3022_v50 = vsel %vm3009_vm2, %v2027_v31, %v3021_v37 }
 0x17c   :  { %v1838_v52 = vmul.f32 %v5392_v33, %v5322_v28  ;;  %v3037_v53 = vsel %vm3011_vm3, %v2146_v36, %v3036_v18  ;;  %v2044_v24 = vadd.f32 %v2043_v45, %v5536_v7  ;;  %962 = vadd.xlane.f32.xlu1 %v760_v55  ;;  %v1229_v59 = vperm.slane %v1113_v38, 0 }
 0x17d   :  { %v2152_v2 = vrot.slane %v2151_v42, 1  ;;  %v1484_v10 = vmul.f32 %v1228_v11, %v5599_v0  ;;  %v2041_v21 = vadd.f32 %v2040_v1, %v5546_v8  ;;  %v2053_v58 = vadd.f32 %v2052_v30, %v5552_v49  ;;  %v881_v11 = vpop.xlane.xlu0 %880 }
 0x17e   :  { %v1855_v37 = vmul.f32 %v879_v40, %v5602_v63  ;;  %v385_v31 = vrot.slane %v5576_v62, 5  ;;  %v3023_v33 = vsel %vm3011_vm3, %v2034_v61, %v3022_v50  ;;  %v1485_v7 = vmul.f32 %v1229_v59, %v5610_v51  ;;  %v885_v59 = vpop.xlane.xlu2 %884 }
 0x17f   :  { %v2153_v18 = vadd.f32 %v2152_v2, %v2151_v42  ;;  %v1639_v5 = vsel %vm1582_vm0, %v1484_v10, 0.0  ;;  %v2056_v45 = vsel %vm1582_vm0, %v1838_v52, 0.0  ;;  %v2045_v49 = vrot.slane %v2044_v24, 2 }
 0x180   :  { %v1640_v15 = vadd.f32 %v1639_v5, %v1638_v13  ;;  %v2175_v19 = vsel %vm1582_vm0, %v1855_v37, 0.0  ;;  %v507_v8 = vperm.slane %v385_v31, 0  ;;  %v1641_v17 = vsel %vm1582_vm0, %v1485_v7, 0.0 }
 0x181   :  { %v5626_v16 = vsel %vm3013_vm4, %v2153_v18, %v3037_v53  ;;  %v2176_v61 = vrot.slane %v2175_v19, 4  ;;  %v2054_v25 = vrot.slane %v2053_v58, 1  ;;  %v384_v48 = vrot.slane %v5576_v62, 4 }
 0x182   :  { %8563 = vst [vmem:[#allocation10_spill] sm:$0xff] %v5626_v16  ;;  %v5629_v54 = vadd.f32 %v1641_v17, %v1640_v15  ;;  %v763_v6 = vmul.f32 %v507_v8, %v5450_v14  ;;  %v2057_v34 = vrot.slane %v2056_v45, 4  ;;  %v383_v1 = vrot.slane %v5576_v62, 3  ;;  %v5673_v17 = vpop.f32.mrf.mxu0 }
 0x183   :  { %v2177_v32 = vadd.f32 %v2176_v61, %v2175_v19  ;;  %v1114_v30 = vrot.slane %v5623_v22, 1  ;;  %v5636_v36 = vadd.f32 %v2005_v26, %v5417_v9  ;;  %v5639_v13 = vsel %vm3013_vm4, %v2041_v21, %v3023_v33 }
 0x184   :  { %968 = vadd.xlane.f32.xlu0 %v763_v6  ;;  %v506_v42 = vperm.slane %v384_v48, 0  ;;  %v1230_v55 = vperm.slane %v5623_v22, 0  ;;  %v5642_v38 = vadd.f32 %v2045_v49, %v2044_v24  ;;  %v505_v52 = vperm.slane %v383_v1, 0 }
 0x185   :  { %8564 = vst [vmem:[#allocation11_spill] sm:$0xff] %v5636_v36  ;;  %v2178_v50 = vrot.slane %v2177_v32, 2  ;;  %v1231_v53 = vperm.slane %v1114_v30, 0  ;;  %v5644_v2 = vadd.f32 %v2054_v25, %v2053_v58  ;;  %v1845_v10 = vmul.f32 %v5483_v60, %v5395_v23 }
 0x186   :  { %v762_v9 = vmul.f32 %v506_v42, %v5450_v14  ;;  %v1486_v26 = vmul.f32 %v1230_v55, %v879_v40  ;;  %v5649_v21 = vadd.f32 %v2057_v34, %v2056_v45  ;;  %v761_v31 = vmul.f32 %v505_v52, %v5450_v14  ;;  %v5662_v40 = vld [vmem:[%s8527_s1 + $0x58] sm:$0xff]  ;;  %v883_v45 = vpop.xlane.xlu1 %882 }
 0x187   :  { %v2179_v37 = vadd.f32 %v2178_v50, %v2177_v32  ;;  %v1487_v33 = vmul.f32 %v1231_v53, %v881_v11  ;;  %v5654_v24 = vadd.f32 %v5420_v41, %v5322_v28  ;;  %v1856_v18 = vmul.f32 %v881_v11, %v5602_v63  ;;  %286 = vmatmul.f32.gmra.mxu2 %v5662_v40 }
 0x188   :  { %966 = vadd.xlane.f32.xlu2 %v762_v9  ;;  %v1643_v58 = vsel %vm1582_vm0, %v1486_v26, 0.0  ;;  %v1116_v60 = vrot.slane %v5623_v22, 3  ;;  %v2047_v5 = vrot.slane %v5642_v38, 1  ;;  %964 = vadd.xlane.f32.xlu1 %v761_v31  ;;  %v1858_v28 = vmul.f32 %v885_v59, %v5602_v63 }
 0x189   :  { %v1644_v7 = vsel %vm1582_vm0, %v1487_v33, 0.0  ;;  %v1115_v41 = vrot.slane %v5623_v22, 2  ;;  %v5670_v15 = vsel %vm1582_vm0, %v1845_v10, 0.0  ;;  %v2182_v8 = vsel %vm1582_vm0, %v1856_v18, 0.0 }
 0x18a   :  { %v1645_v19 = vadd.f32 %v1644_v7, %v1643_v58  ;;  %v1233_v49 = vperm.slane %v1116_v60, 0  ;;  %v2180_v61 = vrot.slane %v2179_v37, 1  ;;  %v2183_v25 = vrot.slane %v2182_v8, 4  ;;  %v887_v58 = vpop.xlane.xlu0 %886 }
 0x18b   :  { %v2196_v6 = vsel %vm1582_vm0, %v1858_v28, 0.0  ;;  %v1232_v48 = vperm.slane %v1115_v41, 0  ;;  %v1857_v1 = vmul.f32 %v883_v45, %v5602_v63  ;;  %v387_v30 = vrot.slane %v5576_v62, 7 }
 0x18c   :  { %v1489_v34 = vmul.f32 %v1233_v49, %v885_v59  ;;  %v2197_v32 = vrot.slane %v2196_v6, 4  ;;  %v2184_v42 = vadd.f32 %v2183_v25, %v2182_v8  ;;  %v386_v11 = vrot.slane %v5576_v62, 6 }
 0x18d   :  { %v1488_v55 = vmul.f32 %v1232_v48, %v883_v45  ;;  %v510_v50 = vperm.slane %v5673_v17, 0  ;;  %v2189_v10 = vsel %vm1582_vm0, %v1857_v1, 0.0  ;;  %v509_v9 = vperm.slane %v387_v30, 0 }
 0x18e   :  { %v1648_v52 = vsel %vm1582_vm0, %v1489_v34, 0.0  ;;  %v2198_v53 = vadd.f32 %v2197_v32, %v2196_v6  ;;  %v2185_v26 = vrot.slane %v2184_v42, 2  ;;  %v2190_v31 = vrot.slane %v2189_v10, 4 }
 0x18f   :  { %v1646_v59 = vsel %vm1582_vm0, %v1488_v55, 0.0  ;;  %v508_v33 = vperm.slane %v386_v11, 0  ;;  %v765_v7 = vmul.f32 %v509_v9, %v5450_v14  ;;  %v766_v62 = vmul.f32 %v510_v50, %v5528_v39  ;;  %v889_v11 = vpop.xlane.xlu1 %888  ;;  %v5691_v9 = vpop.xlane.xlu2 %890 }
 0x190   :  { %v2199_v18 = vrot.slane %v2198_v53, 2  ;;  %v1647_v60 = vadd.f32 %v1646_v59, %v1645_v19  ;;  %v2186_v28 = vadd.f32 %v2185_v26, %v2184_v42  ;;  %v2191_v41 = vadd.f32 %v2190_v31, %v2189_v10 }
 0x191   :  { %v764_v45 = vmul.f32 %v508_v33, %v5450_v14  ;;  %v1117_v8 = vrot.slane %v5623_v22, 4  ;;  %972 = vadd.xlane.f32.xlu0 %v765_v7  ;;  %974 = vadd.xlane.f32.xlu2 %v766_v62  ;;  %v1859_v6 = vmul.f32 %v887_v58, %v5602_v63  ;;  %v1119_v48 = vrot.slane %v5623_v22, 6 }
 0x192   :  { %v2200_v49 = vadd.f32 %v2199_v18, %v2198_v53  ;;  %v1649_v25 = vadd.f32 %v1648_v52, %v1647_v60  ;;  %v2181_v34 = vadd.f32 %v2180_v61, %v2179_v37  ;;  %v2187_v19 = vrot.slane %v2186_v28, 1 }
 0x193   :  { %v2192_v32 = vrot.slane %v2191_v41, 2  ;;  %970 = vadd.xlane.f32.xlu1 %v764_v45  ;;  %v1234_v1 = vperm.slane %v1117_v8, 0  ;;  %v2203_v42 = vsel %vm1582_vm0, %v1859_v6, 0.0  ;;  %v1236_v55 = vperm.slane %v1119_v48, 0 }
 0x194   :  { %v2201_v30 = vrot.slane %v2200_v49, 1  ;;  %v1118_v14 = vrot.slane %v5623_v22, 5  ;;  %v2188_v50 = vadd.f32 %v2187_v19, %v2186_v28  ;;  %v2204_v52 = vrot.slane %v2203_v42, 4 }
 0x195   :  { %v2193_v53 = vadd.f32 %v2192_v32, %v2191_v41  ;;  %v1490_v10 = vmul.f32 %v1234_v1, %v887_v58  ;;  %v2048_v26 = vadd.f32 %v2047_v5, %v5642_v38  ;;  %v2059_v37 = vrot.slane %v5649_v21, 2 }
 0x196   :  { %v2106_v61 = vrot.slane %v5670_v15, 4  ;;  %v1235_v59 = vperm.slane %v1118_v14, 0  ;;  %v3042_v31 = vsel %vm3007_vm1, %v2188_v50, %v2181_v34  ;;  %v2205_v60 = vadd.f32 %v2204_v52, %v2203_v42 }
 0x197   :  { %v2194_v33 = vrot.slane %v2193_v53, 1  ;;  %v1650_v18 = vsel %vm1582_vm0, %v1490_v10, 0.0  ;;  %v2202_v7 = vadd.f32 %v2201_v30, %v2200_v49  ;;  %v1492_v58 = vmul.f32 %v1236_v55, %v5691_v9  ;;  %v5713_v10 = vpop.xlane.xlu0 %892 }
 0x198   :  { %v1651_v62 = vadd.f32 %v1650_v18, %v1649_v25  ;;  %v1491_v28 = vmul.f32 %v1235_v59, %v889_v11  ;;  %v2206_v45 = vrot.slane %v2205_v60, 2  ;;  %v1860_v38 = vmul.f32 %v889_v11, %v5602_v63  ;;  %v5717_v18 = vpop.f32.mrf.mxu2 }
 0x199   :  { %v2195_v41 = vadd.f32 %v2194_v33, %v2193_v53  ;;  %v388_v5 = vrot.slane %v5673_v17, 1  ;;  %v1846_v8 = vmul.f32 %v5490_v4, %v5395_v23  ;;  %v391_v48 = vrot.slane %v5673_v17, 4  ;;  %v5710_v4 = vpop.f32.mrf.mxu1 }
 0x19a   :  { %v1652_v6 = vsel %vm1582_vm0, %v1491_v28, 0.0  ;;  %v389_v34 = vrot.slane %v5673_v17, 2  ;;  %v2207_v25 = vadd.f32 %v2206_v45, %v2205_v60  ;;  %v2210_v32 = vsel %vm1582_vm0, %v1860_v38, 0.0  ;;  %8565 = vst [vmem:[#allocation12_spill] sm:$0xff] %v5710_v4  ;;  %v895_v60 = vpop.xlane.xlu1 %894 }
 0x19b   :  { %v3043_v49 = vsel %vm3009_vm2, %v2195_v41, %v3042_v31  ;;  %v1653_v19 = vadd.f32 %v1652_v6, %v1651_v62  ;;  %v1654_v30 = vsel %vm1582_vm0, %v1492_v58, 0.0  ;;  %v2211_v42 = vrot.slane %v2210_v32, 4 }
 0x19c   :  { %v3044_v1 = vsel %vm3011_vm3, %v2202_v7, %v3043_v49  ;;  %v511_v55 = vperm.slane %v388_v5, 0  ;;  %v2208_v14 = vrot.slane %v2207_v25, 1  ;;  %v514_v11 = vperm.slane %v391_v48, 0  ;;  %v5722_v7 = vld [vmem:[%s8527_s1 + $0x60] sm:$0xff]  ;;  %v897_v49 = vpop.xlane.xlu2 %896 }
 0x19d   :  { %v512_v50 = vperm.slane %v389_v34, 0  ;;  %v1120_v53 = vrot.slane %v5623_v22, 7  ;;  %v2107_v52 = vadd.f32 %v2106_v61, %v5670_v15  ;;  %v2212_v59 = vadd.f32 %v2211_v42, %v2210_v32  ;;  %289 = vmatmul.f32.gmra.mxu2 %v5722_v7 }
 0x19e   :  { %v767_v31 = vmul.f32 %v511_v55, %v5528_v39  ;;  %v1655_v33 = vadd.f32 %v1654_v30, %v1653_v19  ;;  %v2209_v62 = vadd.f32 %v2208_v14, %v2207_v25  ;;  %v770_v58 = vmul.f32 %v514_v11, %v5528_v39 }
 0x19f   :  { %v768_v28 = vmul.f32 %v512_v50, %v5528_v39  ;;  %v1237_v41 = vperm.slane %v1120_v53, 0  ;;  %v5728_v15 = vadd.f32 %v2059_v37, %v5649_v21  ;;  %4610 = vtanh.f32 %v5654_v24 }
 0x1a0   :  { %v2213_v61 = vrot.slane %v2212_v59, 2  ;;  %976 = vadd.xlane.f32.xlu0 %v767_v31  ;;  %v1238_v45 = vperm.slane %v5710_v4, 0  ;;  %v3045_v38 = vsel %vm3013_vm4, %v2209_v62, %v3044_v1  ;;  %982 = vadd.xlane.f32.xlu1 %v770_v58  ;;  %v1863_v6 = vmul.f32 %v895_v60, %v5717_v18 }
 0x1a1   :  { %978 = vadd.xlane.f32.xlu2 %v768_v28  ;;  %v1493_v5 = vmul.f32 %v1237_v41, %v5713_v10  ;;  %v1121_v48 = vrot.slane %v5710_v4, 1  ;;  %v5738_v21 = vsel %vm3015_vm5, %v2048_v26, %v5639_v13  ;;  %v2112_v24 = vsel %vm1582_vm0, %v1846_v8, 0.0  ;;  %v899_v28 = vpop.xlane.xlu0 %898 }
 0x1a2   :  { %v2214_v37 = vadd.f32 %v2213_v61, %v2212_v59  ;;  %v1494_v34 = vmul.f32 %v1238_v45, %v895_v60  ;;  %v2108_v25 = vrot.slane %v2107_v52, 2  ;;  %v2231_v32 = vsel %vm1582_vm0, %v1863_v6, 0.0 }
 0x1a3   :  { %v1656_v19 = vsel %vm1582_vm0, %v1493_v5, 0.0  ;;  %v1239_v1 = vperm.slane %v1121_v48, 0  ;;  %v1852_v30 = vmul.f32 %v5571_v35, %v5518_v44  ;;  %v2232_v14 = vrot.slane %v2231_v32, 4 }
 0x1a4   :  { %v2215_v42 = vrot.slane %v2214_v37, 1  ;;  %v5745_v55 = vadd.f32 %v1656_v19, %v1655_v33  ;;  %v1658_v13 = vsel %vm1582_vm0, %v1494_v34, 0.0  ;;  %v1864_v8 = vmul.f32 %v897_v49, %v5717_v18 }
 0x1a5   :  { %v1495_v26 = vmul.f32 %v1239_v1, %v897_v49  ;;  %v390_v11 = vrot.slane %v5673_v17, 3  ;;  %v5750_v50 = vpop.eup %4610  ;;  %v2233_v31 = vadd.f32 %v2232_v14, %v2231_v32  ;;  %v393_v60 = vrot.slane %v5673_v17, 6  ;;  %v5775_v14 = vld [vmem:[%s8527_s1 + $0x68] sm:$0xff] }
 0x1a6   :  { %v2216_v59 = vadd.f32 %v2215_v42, %v2214_v37  ;;  %v2113_v35 = vrot.slane %v2112_v24, 4  ;;  %v2238_v62 = vsel %vm1582_vm0, %v1864_v8, 0.0  ;;  %v5756_v41 = vadd.f32 %v2108_v25, %v2107_v52  ;;  %v901_v42 = vpop.xlane.xlu1 %900  ;;  %292 = vmatmul.f32.gmra.mxu2 %v5775_v14 }
 0x1a7   :  { %v1659_v33 = vsel %vm1582_vm0, %v1495_v26, 0.0  ;;  %v513_v58 = vperm.slane %v390_v11, 0  ;;  %v2234_v45 = vrot.slane %v2233_v31, 2  ;;  %v5762_v6 = vsel %vm1582_vm0, %v1852_v30, 0.0 }
 0x1a8   :  { %v5759_v61 = vsel %vm3015_vm5, %v2216_v59, %v3045_v38  ;;  %v1660_v5 = vadd.f32 %v1659_v33, %v1658_v13  ;;  %v2239_v48 = vrot.slane %v2238_v62, 4  ;;  %v516_v34 = vperm.slane %v393_v60, 0  ;;  %v5780_v60 = vpop.f32.mrf.mxu0  ;;  %v903_v33 = vpop.xlane.xlu2 %902 }
 0x1a9   :  { %8566 = vst [vmem:[#allocation13_spill] sm:$0xff] %v5759_v61  ;;  %v769_v37 = vmul.f32 %v513_v58, %v5528_v39  ;;  %v2235_v49 = vadd.f32 %v2234_v45, %v2233_v31  ;;  %v392_v19 = vrot.slane %v5673_v17, 5  ;;  %v1122_v32 = vrot.slane %v5710_v4, 2 }
 0x1aa   :  { %v1865_v52 = vmul.f32 %v899_v28, %v5717_v18  ;;  %v5768_v25 = vadd.f32 %v2113_v35, %v2112_v24  ;;  %v2240_v38 = vadd.f32 %v2239_v48, %v2238_v62  ;;  %v772_v1 = vmul.f32 %v516_v34, %v5528_v39 }
 0x1ab   :  { %980 = vadd.xlane.f32.xlu0 %v769_v37  ;;  %v1123_v30 = vrot.slane %v5710_v4, 3  ;;  %v2236_v13 = vrot.slane %v2235_v49, 1  ;;  %v515_v26 = vperm.slane %v392_v19, 0  ;;  %v1240_v8 = vperm.slane %v1122_v32, 0 }
 0x1ac   :  { %v2245_v11 = vsel %vm1582_vm0, %v1865_v52, 0.0  ;;  %v2241_v59 = vrot.slane %v2240_v38, 2  ;;  %986 = vadd.xlane.f32.xlu1 %v772_v1  ;;  %v1866_v48 = vmul.f32 %v901_v42, %v5717_v18  ;;  %v1124_v32 = vrot.slane %v5710_v4, 4 }
 0x1ad   :  { %v2246_v31 = vrot.slane %v2245_v11, 4  ;;  %v1241_v35 = vperm.slane %v1123_v30, 0  ;;  %v2237_v62 = vadd.f32 %v2236_v13, %v2235_v49  ;;  %v771_v58 = vmul.f32 %v515_v26, %v5528_v39 }
 0x1ae   :  { %v1496_v45 = vmul.f32 %v1240_v8, %v899_v28  ;;  %v2242_v37 = vadd.f32 %v2241_v59, %v2240_v38  ;;  %v2252_v1 = vsel %vm1582_vm0, %v1866_v48, 0.0  ;;  %v1867_v53 = vmul.f32 %v903_v33, %v5717_v18 }
 0x1af   :  { %v2247_v34 = vadd.f32 %v2246_v31, %v2245_v11  ;;  %v1497_v19 = vmul.f32 %v1241_v35, %v901_v42  ;;  %984 = vadd.xlane.f32.xlu2 %v771_v58  ;;  %v518_v30 = vperm.slane %v5780_v60, 0  ;;  %v2253_v26 = vrot.slane %v2252_v1, 4 }
 0x1b0   :  { %v1661_v52 = vsel %vm1582_vm0, %v1496_v45, 0.0  ;;  %v2243_v49 = vrot.slane %v2242_v37, 1  ;;  %v1242_v38 = vperm.slane %v1124_v32, 0  ;;  %v2259_v42 = vsel %vm1582_vm0, %v1867_v53, 0.0  ;;  %v905_v53 = vpop.xlane.xlu0 %904 }
 0x1b1   :  { %v1662_v13 = vadd.f32 %v1661_v52, %v1660_v5  ;;  %v2248_v39 = vrot.slane %v2247_v34, 2  ;;  %v1663_v28 = vsel %vm1582_vm0, %v1497_v19, 0.0  ;;  %v774_v8 = vmul.f32 %v518_v30, %v5662_v40 }
 0x1b2   :  { %v2244_v11 = vadd.f32 %v2243_v49, %v2242_v37  ;;  %v2260_v35 = vrot.slane %v2259_v42, 4  ;;  %v2254_v58 = vadd.f32 %v2253_v26, %v2252_v1  ;;  %v1498_v45 = vmul.f32 %v1242_v38, %v903_v33 }
 0x1b3   :  { %v2249_v59 = vadd.f32 %v2248_v39, %v2247_v34  ;;  %v1664_v31 = vadd.f32 %v1663_v28, %v1662_v13  ;;  %990 = vadd.xlane.f32.xlu0 %v774_v8  ;;  %v397_v48 = vrot.slane %v5780_v60, 3  ;;  %v395_v5 = vrot.slane %v5780_v60, 1 }
 0x1b4   :  { %v3049_v52 = vsel %vm3007_vm1, %v2244_v11, %v2237_v62  ;;  %v2261_v24 = vadd.f32 %v2260_v35, %v2259_v42  ;;  %v1125_v32 = vrot.slane %v5710_v4, 5  ;;  %v2255_v22 = vrot.slane %v2254_v58, 2 }
 0x1b5   :  { %v2250_v19 = vrot.slane %v2249_v59, 1  ;;  %v1665_v37 = vsel %vm1582_vm0, %v1498_v45, 0.0  ;;  %v521_v34 = vperm.slane %v397_v48, 0  ;;  %v519_v30 = vperm.slane %v395_v5, 0 }
 0x1b6   :  { %v1666_v1 = vadd.f32 %v1665_v37, %v1664_v31  ;;  %v2262_v33 = vrot.slane %v2261_v24, 2  ;;  %v1243_v13 = vperm.slane %v1125_v32, 0  ;;  %v2256_v39 = vadd.f32 %v2255_v22, %v2254_v58  ;;  %v5804_v22 = vpop.xlane.xlu1 %906 }
 0x1b7   :  { %v2251_v49 = vadd.f32 %v2250_v19, %v2249_v59  ;;  %v777_v28 = vmul.f32 %v521_v34, %v5662_v40  ;;  %v775_v26 = vmul.f32 %v519_v30, %v5662_v40  ;;  %v1868_v62 = vmul.f32 %v905_v53, %v5717_v18 }
 0x1b8   :  { %v2263_v42 = vadd.f32 %v2262_v33, %v2261_v24  ;;  %v1499_v8 = vmul.f32 %v1243_v13, %v905_v53  ;;  %v1126_v11 = vrot.slane %v5710_v4, 6  ;;  %v2115_v35 = vrot.slane %v5768_v25, 2  ;;  %v5808_v24 = vpop.xlane.xlu2 %908 }
 0x1b9   :  { %v3050_v38 = vsel %vm3009_vm2, %v2251_v49, %v3049_v52  ;;  %v2257_v45 = vrot.slane %v2256_v39, 1  ;;  %996 = vadd.xlane.f32.xlu2 %v777_v28  ;;  %992 = vadd.xlane.f32.xlu1 %v775_v26  ;;  %v2266_v59 = vsel %vm1582_vm0, %v1868_v62, 0.0  ;;  %v1127_v31 = vrot.slane %v5710_v4, 7  ;;  %v5819_v28 = vld [vmem:[%s8527_s1 + $0x70] sm:$0xff] }
 0x1ba   :  { %v2264_v58 = vrot.slane %v2263_v42, 1  ;;  %v1667_v48 = vsel %vm1582_vm0, %v1499_v8, 0.0  ;;  %v2267_v5 = vrot.slane %v2266_v59, 4  ;;  %v1244_v52 = vperm.slane %v1126_v11, 0  ;;  %295 = vmatmul.f32.gmra.mxu2 %v5819_v28 }
 0x1bb   :  { %v1853_v19 = vmul.f32 %v5599_v0, %v5518_v44  ;;  %v2258_v32 = vadd.f32 %v2257_v45, %v2256_v39  ;;  %v1668_v53 = vadd.f32 %v1667_v48, %v1666_v1  ;;  %v1245_v37 = vperm.slane %v1127_v31, 0 }
 0x1bc   :  { %v8567_v34 = vrot.slane %v5762_v6, 4  ;;  %v2265_v49 = vadd.f32 %v2264_v58, %v2263_v42  ;;  %v2268_v33 = vadd.f32 %v2267_v5, %v2266_v59  ;;  %v1500_v13 = vmul.f32 %v1244_v52, %v5804_v22 }
 0x1bd   :  { %v2110_v26 = vrot.slane %v5756_v41, 1  ;;  %v3051_v0 = vsel %vm3011_vm3, %v2258_v32, %v3050_v38  ;;  %v1501_v1 = vmul.f32 %v1245_v37, %v5808_v24  ;;  %v398_v39 = vrot.slane %v5780_v60, 4 }
 0x1be   :  { %v2156_v30 = vadd.f32 %v8567_v34, %v5762_v6  ;;  %v5827_v6 = vadd.f32 %v2115_v35, %v5768_v25  ;;  %v3052_v62 = vsel %vm3013_vm4, %v2265_v49, %v3051_v0  ;;  %v2269_v42 = vrot.slane %v2268_v33, 2  ;;  %v5836_v25 = vpop.f32.mrf.mxu2  ;;  %v911_v35 = vpop.xlane.xlu0 %910 }
 0x1bf   :  { %v1669_v8 = vsel %vm1582_vm0, %v1500_v13, 0.0  ;;  %v2849_v11 = vadd.f32 %v5522_v47, %v5395_v23  ;;  %v2161_v45 = vsel %vm1582_vm0, %v1853_v19, 0.0  ;;  %v522_v59 = vperm.slane %v398_v39, 0  ;;  %v5843_v47 = vpop.f32.mrf.mxu1 }
 0x1c0   :  { %v1670_v38 = vadd.f32 %v1669_v8, %v1668_v53  ;;  %v2157_v31 = vrot.slane %v2156_v30, 2  ;;  %v2270_v58 = vadd.f32 %v2269_v42, %v2268_v33  ;;  %v1671_v48 = vsel %vm1582_vm0, %v1501_v1, 0.0  ;;  %8568 = vst [vmem:[#allocation14_spill] sm:$0xff] %v5843_v47 }
 0x1c1   :  { %v399_v5 = vrot.slane %v5780_v60, 5  ;;  %v1854_v52 = vmul.f32 %v5610_v51, %v5518_v44  ;;  %v778_v23 = vmul.f32 %v522_v59, %v5662_v40  ;;  %v396_v19 = vrot.slane %v5780_v60, 2 }
 0x1c2   :  { %v5840_v32 = vadd.f32 %v1671_v48, %v1670_v38  ;;  %v8569_v53 = vrot.slane %v5728_v15, 1  ;;  %v2162_v34 = vrot.slane %v2161_v45, 4  ;;  %v2271_v49 = vrot.slane %v2270_v58, 1  ;;  %v913_v38 = vpop.xlane.xlu1 %912 }
 0x1c3   :  { %v523_v33 = vperm.slane %v399_v5, 0  ;;  %v5852_v13 = vadd.f32 %v2110_v26, %v5756_v41  ;;  %998 = vadd.xlane.f32.xlu0 %v778_v23  ;;  %v520_v0 = vperm.slane %v396_v19, 0  ;;  %v1871_v1 = vmul.f32 %v911_v35, %v5836_v25  ;;  %v5861_v41 = vpop.f32.mrf.mxu0 }
 0x1c4   :  { %v5849_v37 = vadd.f32 %v8569_v53, %v5728_v15  ;;  %4612 = vtanh.f32 %v2849_v11  ;;  %v2272_v39 = vadd.f32 %v2271_v49, %v2270_v58  ;;  %v1246_v8 = vperm.slane %v5843_v47, 0  ;;  %v915_v15 = vpop.xlane.xlu2 %914 }
 0x1c5   :  { %8570 = vst [vmem:[#allocation15_spill] sm:$0xff] %v5852_v13  ;;  %v779_v42 = vmul.f32 %v523_v33, %v5662_v40  ;;  %v5858_v59 = vadd.f32 %v2157_v31, %v2156_v30  ;;  %v2168_v48 = vsel %vm1582_vm0, %v1854_v52, 0.0  ;;  %v776_v26 = vmul.f32 %v520_v0, %v5662_v40 }
 0x1c6   :  { %v2287_v5 = vsel %vm1582_vm0, %v1871_v1, 0.0  ;;  %v5865_v23 = vadd.f32 %v2162_v34, %v2161_v45  ;;  %v1861_v11 = vmul.f32 %v5691_v9, %v5602_v63  ;;  %v5870_v58 = vsel %vm3015_vm5, %v2272_v39, %v3052_v62  ;;  %v5883_v1 = vld [vmem:[%s8527_s1 + $0x78] sm:$0xff] }
 0x1c7   :  { %8571 = vst [vmem:[#allocation16_spill] sm:$0xff] %v5870_v58  ;;  %1000 = vadd.xlane.f32.xlu2 %v779_v42  ;;  %v2288_v19 = vrot.slane %v2287_v5, 4  ;;  %994 = vadd.xlane.f32.xlu1 %v776_v26  ;;  %v1129_v30 = vrot.slane %v5843_v47, 2  ;;  %v1873_v31 = vmul.f32 %v915_v15, %v5836_v25  ;;  %v1128_v52 = vrot.slane %v5843_v47, 1 }
 0x1c8   :  { %v1872_v40 = vmul.f32 %v913_v38, %v5836_v25  ;;  %v1502_v53 = vmul.f32 %v1246_v8, %v911_v35  ;;  %v402_v34 = vrot.slane %v5861_v41, 1  ;;  %v526_v9 = vperm.slane %v5861_v41, 0  ;;  %298 = vmatmul.f32.gmra.mxu2 %v5883_v1 }
 0x1c9   :  { %v2289_v45 = vadd.f32 %v2288_v19, %v2287_v5  ;;  %v1248_v49 = vperm.slane %v1129_v30, 0  ;;  %v2301_v62 = vsel %vm1582_vm0, %v1873_v31, 0.0  ;;  %v1247_v33 = vperm.slane %v1128_v52, 0 }
 0x1ca   :  { %v2294_v0 = vsel %vm1582_vm0, %v1872_v40, 0.0  ;;  %v5885_v39 = vpop.eup %4612  ;;  %v2169_v42 = vrot.slane %v2168_v48, 4  ;;  %v2302_v8 = vrot.slane %v2301_v62, 4  ;;  %v527_v30 = vperm.slane %v402_v34, 0 }
 0x1cb   :  { %8572 = vst [vmem:[#allocation17_spill] sm:$0xff] %v5885_v39  ;;  %v2290_v35 = vrot.slane %v2289_v45, 2  ;;  %v2295_v26 = vrot.slane %v2294_v0, 4  ;;  %v1504_v5 = vmul.f32 %v1248_v49, %v915_v15  ;;  %v1503_v19 = vmul.f32 %v1247_v33, %v913_v38 }
 0x1cc   :  { %v782_v31 = vmul.f32 %v526_v9, %v5722_v7  ;;  %v2303_v40 = vadd.f32 %v2302_v8, %v2301_v62  ;;  %v404_v4 = vrot.slane %v5861_v41, 3  ;;  %v2217_v58 = vsel %vm1582_vm0, %v1861_v11, 0.0 }
 0x1cd   :  { %v2291_v52 = vadd.f32 %v2290_v35, %v2289_v45  ;;  %v2296_v51 = vadd.f32 %v2295_v26, %v2294_v0  ;;  %v1673_v61 = vsel %vm1582_vm0, %v1502_v53, 0.0  ;;  %v1674_v27 = vsel %vm1582_vm0, %v1503_v19, 0.0  ;;  %v917_v53 = vpop.xlane.xlu2 %916  ;;  %v5899_v26 = vpop.xlane.xlu1 %918 }
 0x1ce   :  { %v783_v16 = vmul.f32 %v527_v30, %v5722_v7  ;;  %v1862_v15 = vmul.f32 %v5713_v10, %v5602_v63  ;;  %v2304_v38 = vrot.slane %v2303_v40, 2  ;;  %v1675_v34 = vadd.f32 %v1674_v27, %v1673_v61 }
 0x1cf   :  { %v2297_v49 = vrot.slane %v2296_v51, 2  ;;  %1006 = vadd.xlane.f32.xlu2 %v782_v31  ;;  %v2164_v45 = vrot.slane %v5865_v23, 2  ;;  %v1676_v9 = vsel %vm1582_vm0, %v1504_v5, 0.0  ;;  %v529_v62 = vperm.slane %v404_v4, 0 }
 0x1d0   :  { %1008 = vadd.xlane.f32.xlu0 %v783_v16  ;;  %v1130_v11 = vrot.slane %v5843_v47, 3  ;;  %v2292_v33 = vrot.slane %v2291_v52, 1  ;;  %v2305_v0 = vadd.f32 %v2304_v38, %v2303_v40  ;;  %v1677_v8 = vadd.f32 %v1676_v9, %v1675_v34  ;;  %v5910_v9 = vpop.f32.mrf.mxu0 }
 0x1d1   :  { %v2298_v35 = vadd.f32 %v2297_v49, %v2296_v51  ;;  %v2170_v10 = vadd.f32 %v2169_v42, %v2168_v48  ;;  %v2218_v19 = vrot.slane %v2217_v58, 4  ;;  %v785_v27 = vmul.f32 %v529_v62, %v5722_v7 }
 0x1d2   :  { %v1249_v61 = vperm.slane %v1130_v11, 0  ;;  %v2224_v30 = vsel %vm1582_vm0, %v1862_v15, 0.0  ;;  %v2306_v31 = vrot.slane %v2305_v0, 1  ;;  %v1874_v16 = vmul.f32 %v917_v53, %v5836_v25 }
 0x1d3   :  { %v2299_v5 = vrot.slane %v2298_v35, 1  ;;  %v1869_v4 = vmul.f32 %v5804_v22, %v5717_v18  ;;  %1012 = vadd.xlane.f32.xlu1 %v785_v27  ;;  %v1875_v51 = vmul.f32 %v5899_v26, %v5836_v25  ;;  %v403_v48 = vrot.slane %v5861_v41, 2 }
 0x1d4   :  { %v1505_v40 = vmul.f32 %v1249_v61, %v917_v53  ;;  %v2293_v42 = vadd.f32 %v2292_v33, %v2291_v52  ;;  %v2307_v38 = vadd.f32 %v2306_v31, %v2305_v0  ;;  %v2308_v49 = vsel %vm1582_vm0, %v1874_v16, 0.0  ;;  %v5917_v52 = vpop.f32.mrf.mxu2  ;;  %v5919_v33 = vpop.xlane.xlu0 %926 }
 0x1d5   :  { %v2300_v34 = vadd.f32 %v2299_v5, %v2298_v35  ;;  %v2171_v15 = vrot.slane %v2170_v10, 2  ;;  %v2309_v11 = vrot.slane %v2308_v49, 4  ;;  %v2315_v22 = vsel %vm1582_vm0, %v1875_v51, 0.0 }
 0x1d6   :  { %v1678_v62 = vsel %vm1582_vm0, %v1505_v40, 0.0  ;;  %v2219_v27 = vadd.f32 %v2218_v19, %v2217_v58  ;;  %v2316_v12 = vrot.slane %v2315_v22, 4  ;;  %v2225_v13 = vrot.slane %v2224_v30, 4 }
 0x1d7   :  { %v3056_v53 = vsel %vm3007_vm1, %v2300_v34, %v2293_v42  ;;  %v5915_v61 = vadd.f32 %v1678_v62, %v1677_v8  ;;  %v2310_v0 = vadd.f32 %v2309_v11, %v2308_v49  ;;  %v528_v31 = vperm.slane %v403_v48, 0 }
 0x1d8   :  { %v3057_v35 = vsel %vm3009_vm2, %v2307_v38, %v3056_v53  ;;  %v2273_v5 = vsel %vm1582_vm0, %v1869_v4, 0.0  ;;  %v2317_v16 = vadd.f32 %v2316_v12, %v2315_v22  ;;  %v534_v40 = vperm.slane %v5910_v9, 0 }
 0x1d9   :  { %v409_v58 = vrot.slane %v5910_v9, 1  ;;  %v8573_v8 = vrot.slane %v5827_v6, 1  ;;  %v2165_v51 = vadd.f32 %v2164_v45, %v5865_v23  ;;  %v2311_v42 = vrot.slane %v2310_v0, 2 }
 0x1da   :  { %v784_v34 = vmul.f32 %v528_v31, %v5722_v7  ;;  %v1870_v48 = vmul.f32 %v5808_v24, %v5717_v18  ;;  %v1879_v12 = vmul.f32 %v5919_v33, %v5917_v52  ;;  %v2318_v4 = vrot.slane %v2317_v16, 2 }
 0x1db   :  { %v5928_v19 = vadd.f32 %v8573_v8, %v5827_v6  ;;  %v790_v38 = vmul.f32 %v534_v40, %v5775_v14  ;;  %v2220_v49 = vrot.slane %v2219_v27, 2  ;;  %v2274_v62 = vrot.slane %v2273_v5, 4 }
 0x1dc   :  { %v2312_v11 = vadd.f32 %v2311_v42, %v2310_v0  ;;  %1010 = vadd.xlane.f32.xlu0 %v784_v34  ;;  %v535_v6 = vperm.slane %v409_v58, 0  ;;  %v2159_v22 = vrot.slane %v5858_v59, 1  ;;  %v2172_v23 = vadd.f32 %v2171_v15, %v2170_v10  ;;  %v5944_v42 = vpop.xlane.xlu2 %924 }
 0x1dd   :  { %8574 = vst [vmem:[#allocation18_spill] sm:$0xff] %v5928_v19  ;;  %v2226_v45 = vadd.f32 %v2225_v13, %v2224_v30  ;;  %v2319_v53 = vadd.f32 %v2318_v4, %v2317_v16  ;;  %1022 = vadd.xlane.f32.xlu1 %v790_v38  ;;  %v2166_v31 = vrot.slane %v2165_v51, 1  ;;  %v2850_v24 = vadd.f32 %v5629_v54, %v5518_v44  ;;  %v5947_v16 = vpop.xlane.xlu1 %920 }
 0x1de   :  { %v2313_v8 = vrot.slane %v2312_v11, 1  ;;  %v791_v19 = vmul.f32 %v535_v6, %v5775_v14  ;;  %v2280_v40 = vsel %vm1582_vm0, %v1870_v48, 0.0  ;;  %v2343_v46 = vsel %vm1582_vm0, %v1879_v12, 0.0 }
 0x1df   :  { %v1131_v0 = vrot.slane %v5843_v47, 4  ;;  %v2320_v58 = vrot.slane %v2319_v53, 1  ;;  %v2221_v10 = vadd.f32 %v2220_v49, %v2219_v27  ;;  %v2275_v13 = vadd.f32 %v2274_v62, %v2273_v5 }
 0x1e0   :  { %v2314_v30 = vadd.f32 %v2313_v8, %v2312_v11  ;;  %1024 = vadd.xlane.f32.xlu2 %v791_v19  ;;  %v1132_v15 = vrot.slane %v5843_v47, 5  ;;  %v5950_v44 = vadd.f32 %v2159_v22, %v5858_v59  ;;  %v2173_v54 = vrot.slane %v2172_v23, 1  ;;  %v5957_v19 = vpop.xlane.xlu0 %930 }
 0x1e1   :  { %v2227_v34 = vrot.slane %v2226_v45, 2  ;;  %v2321_v48 = vadd.f32 %v2320_v58, %v2319_v53  ;;  %v2281_v12 = vrot.slane %v2280_v40, 4  ;;  %v2344_v4 = vrot.slane %v2343_v46, 4 }
 0x1e2   :  { %8575 = vst [vmem:[#allocation19_spill] sm:$0xff] %v5950_v44  ;;  %v3058_v38 = vsel %vm3011_vm3, %v2314_v30, %v3057_v35  ;;  %v405_v6 = vrot.slane %v5861_v41, 4  ;;  %4614 = vtanh.f32 %v2850_v24  ;;  %v1250_v27 = vperm.slane %v1131_v0, 0 }
 0x1e3   :  { %v5955_v5 = vsel %vm3013_vm4, %v2321_v48, %v3058_v38  ;;  %v1251_v49 = vperm.slane %v1132_v15, 0  ;;  %v5959_v62 = vadd.f32 %v2166_v31, %v2165_v51  ;;  %v2222_v59 = vrot.slane %v2221_v10, 1 }
 0x1e4   :  { %v2276_v11 = vrot.slane %v2275_v13, 2  ;;  %v530_v22 = vperm.slane %v405_v6, 0  ;;  %v5961_v53 = vadd.f32 %v2173_v54, %v2172_v23  ;;  %v1134_v8 = vrot.slane %v5843_v47, 7 }
 0x1e5   :  { %8576 = vst [vmem:[#allocation20_spill] sm:$0xff] %v5959_v62  ;;  %v411_v35 = vrot.slane %v5910_v9, 3  ;;  %v410_v24 = vrot.slane %v5910_v9, 2  ;;  %v5966_v0 = vadd.f32 %v2227_v34, %v2226_v45  ;;  %v2282_v58 = vadd.f32 %v2281_v12, %v2280_v40  ;;  %v5983_v34 = vpop.f32.mrf.mxu0  ;;  %v5986_v12 = vpop.xlane.xlu2 %932 }
 0x1e6   :  { %8577 = vst [vmem:[#allocation21_spill] sm:$0xff] %v5961_v53  ;;  %v2345_v30 = vadd.f32 %v2344_v4, %v2343_v46  ;;  %v786_v48 = vmul.f32 %v530_v22, %v5722_v7  ;;  %v1506_v51 = vmul.f32 %v1250_v27, %v5899_v26  ;;  %v1507_v31 = vmul.f32 %v1251_v49, %v5947_v16  ;;  %v5993_v49 = vpop.xlane.xlu1 %922 }
 0x1e7   :  { %v537_v15 = vperm.slane %v411_v35, 0  ;;  %v536_v38 = vperm.slane %v410_v24, 0  ;;  %v5971_v23 = vadd.f32 %v2222_v59, %v2221_v10  ;;  %v2851_v54 = vadd.f32 %v5745_v55, %v5602_v63 }
 0x1e8   :  { %v5975_v6 = vadd.f32 %v2276_v11, %v2275_v13  ;;  %v1881_v45 = vmul.f32 %v5957_v19, %v5917_v52  ;;  %1014 = vadd.xlane.f32.xlu0 %v786_v48  ;;  %v5979_v46 = vpop.eup %4614  ;;  %v1253_v7 = vperm.slane %v1134_v8, 0  ;;  %v1133_v10 = vrot.slane %v5843_v47, 6  ;;  %v5989_v13 = vpop.f32.mrf.mxu1 }
 0x1e9   :  { %8578 = vst [vmem:[#allocation22_spill] sm:$0xff] %v5971_v23  ;;  %v793_v26 = vmul.f32 %v537_v15, %v5775_v14  ;;  %v792_v40 = vmul.f32 %v536_v38, %v5775_v14  ;;  %v2229_v63 = vrot.slane %v5966_v0, 1  ;;  %v2283_v55 = vrot.slane %v2282_v58, 2 }
 0x1ea   :  { %8579 = vst [vmem:[#allocation23_spill] sm:$0xff] %v5979_v46  ;;  %v2346_v4 = vrot.slane %v2345_v30, 2  ;;  %v1878_v27 = vmul.f32 %v5944_v42, %v5836_v25  ;;  %v1680_v59 = vsel %vm1582_vm0, %v1506_v51, 0.0  ;;  %v1136_v11 = vrot.slane %v5989_v13, 2 }
 0x1eb   :  { %8580 = vst [vmem:[#allocation24_spill] sm:$0xff] %v5989_v13  ;;  %v1682_v22 = vsel %vm1582_vm0, %v1507_v31, 0.0  ;;  %1028 = vadd.xlane.f32.xlu1 %v793_v26  ;;  %1026 = vadd.xlane.f32.xlu2 %v792_v40  ;;  %v1252_v8 = vperm.slane %v1133_v10, 0  ;;  %v1681_v35 = vadd.f32 %v1680_v59, %v5915_v61  ;;  %v2357_v24 = vsel %vm1582_vm0, %v1881_v45, 0.0  ;;  %v6007_v31 = vpop.xlane.xlu0 %938 }
 0x1ec   :  { %v1882_v48 = vmul.f32 %v5986_v12, %v5917_v52  ;;  %v542_v15 = vperm.slane %v5983_v34, 0  ;;  %v2278_v38 = vrot.slane %v5975_v6, 1  ;;  %v2852_v51 = vadd.f32 %v5840_v32, %v5717_v18 }
 0x1ed   :  { %v1509_v47 = vmul.f32 %v1253_v7, %v5944_v42  ;;  %v1508_v26 = vmul.f32 %v1252_v8, %v5993_v49  ;;  %v1254_v61 = vperm.slane %v5989_v13, 0  ;;  %v2336_v45 = vsel %vm1582_vm0, %v1878_v27, 0.0 }
 0x1ee   :  { %v1683_v40 = vadd.f32 %v1682_v22, %v1681_v35  ;;  %v798_v10 = vmul.f32 %v542_v15, %v5819_v28  ;;  %v2347_v59 = vadd.f32 %v2346_v4, %v2345_v30  ;;  %v2358_v23 = vrot.slane %v2357_v24, 4 }
 0x1ef   :  { %v1684_v53 = vsel %vm1582_vm0, %v1508_v26, 0.0  ;;  %v2364_v62 = vsel %vm1582_vm0, %v1882_v48, 0.0  ;;  %v6015_v18 = vadd.f32 %v2283_v55, %v2282_v58  ;;  %v1256_v32 = vperm.slane %v1136_v11, 0 }
 0x1f0   :  { %v1685_v42 = vadd.f32 %v1684_v53, %v1683_v40  ;;  %1038 = vadd.xlane.f32.xlu0 %v798_v10  ;;  %v417_v7 = vrot.slane %v5983_v34, 2  ;;  %v1686_v8 = vsel %vm1582_vm0, %v1509_v47, 0.0  ;;  %v2337_v44 = vrot.slane %v2336_v45, 4 }
 0x1f1   :  { %v1876_v27 = vmul.f32 %v5947_v16, %v5836_v25  ;;  %v416_v30 = vrot.slane %v5983_v34, 1  ;;  %v1510_v4 = vmul.f32 %v1254_v61, %v5919_v33  ;;  %v2365_v35 = vrot.slane %v2364_v62, 4 }
 0x1f2   :  { %v6023_v22 = vadd.f32 %v1686_v8, %v1685_v42  ;;  %v544_v58 = vperm.slane %v417_v7, 0  ;;  %4616 = vtanh.f32 %v2851_v54  ;;  %v2348_v55 = vrot.slane %v2347_v59, 1  ;;  %v6035_v54 = vpop.f32.mrf.mxu0 }
 0x1f3   :  { %v2359_v53 = vadd.f32 %v2358_v23, %v2357_v24  ;;  %v543_v11 = vperm.slane %v416_v30, 0  ;;  %v6026_v48 = vadd.f32 %v2229_v63, %v5966_v0  ;;  %4618 = vtanh.f32 %v2852_v51  ;;  %v929_v23 = vpop.xlane.xlu1 %928 }
 0x1f4   :  { %v1512_v47 = vmul.f32 %v1256_v32, %v5957_v19  ;;  %v800_v16 = vmul.f32 %v544_v58, %v5819_v28  ;;  %v6030_v15 = vadd.f32 %v2337_v44, %v2336_v45  ;;  %v2322_v33 = vsel %vm1582_vm0, %v1876_v27, 0.0  ;;  %v6044_v45 = vpop.xlane.xlu0 %942  ;;  %v935_v58 = vpop.xlane.xlu2 %934 }
 0x1f5   :  { %8581 = vst [vmem:[#allocation25_spill] sm:$0xff] %v6026_v48  ;;  %v1137_v26 = vrot.slane %v5989_v13, 3  ;;  %v799_v61 = vmul.f32 %v543_v11, %v5819_v28  ;;  %v6038_v24 = vadd.f32 %v2278_v38, %v5975_v6  ;;  %v1688_v19 = vsel %vm1582_vm0, %v1510_v4, 0.0 }
 0x1f6   :  { %v2366_v63 = vadd.f32 %v2365_v35, %v2364_v62  ;;  %1042 = vadd.xlane.f32.xlu2 %v800_v16  ;;  %v6042_v44 = vadd.f32 %v2348_v55, %v2347_v59  ;;  %v2360_v51 = vrot.slane %v2359_v53, 2  ;;  %v1138_v40 = vrot.slane %v5989_v13, 4 }
 0x1f7   :  { %8582 = vst [vmem:[#allocation26_spill] sm:$0xff] %v6038_v24  ;;  %1040 = vadd.xlane.f32.xlu1 %v799_v61  ;;  %v1135_v10 = vrot.slane %v5989_v13, 1  ;;  %v2323_v32 = vrot.slane %v2322_v33, 4  ;;  %v1885_v6 = vmul.f32 %v6007_v31, %v5917_v52  ;;  %v1880_v38 = vmul.f32 %v929_v23, %v5917_v52 }
 0x1f8   :  { %v550_v42 = vperm.slane %v6035_v54, 0  ;;  %v6052_v62 = vpop.eup %4616  ;;  %v1691_v59 = vsel %vm1582_vm0, %v1512_v47, 0.0  ;;  %v2339_v7 = vrot.slane %v6030_v15, 2  ;;  %v1257_v8 = vperm.slane %v1137_v26, 0 }
 0x1f9   :  { %8583 = vst [vmem:[#allocation27_spill] sm:$0xff] %v6052_v62  ;;  %v1255_v27 = vperm.slane %v1135_v10, 0  ;;  %v6056_v30 = vpop.eup %4618  ;;  %v1877_v4 = vmul.f32 %v5993_v49, %v5836_v25  ;;  %v2367_v35 = vrot.slane %v2366_v63, 2  ;;  %v2350_v55 = vsel %vm1582_vm0, %v1880_v38, 0.0  ;;  %v6064_v10 = vpop.f32.mrf.mxu2 }
 0x1fa   :  { %8584 = vst [vmem:[#allocation28_spill] sm:$0xff] %v6056_v30  ;;  %v806_v11 = vmul.f32 %v550_v42, %v5883_v1  ;;  %v1258_v16 = vperm.slane %v1138_v40, 0  ;;  %v2351_v0 = vrot.slane %v2350_v55, 4  ;;  %v394_v47 = vrot.slane %v5673_v17, 7 }
 0x1fb   :  { %v1511_v61 = vmul.f32 %v1255_v27, %v929_v23  ;;  %v2361_v24 = vadd.f32 %v2360_v51, %v2359_v53  ;;  %v2324_v62 = vadd.f32 %v2323_v32, %v2322_v33  ;;  %v2385_v26 = vsel %vm1582_vm0, %v1885_v6, 0.0  ;;  %8585 = vst [vmem:[#allocation29_spill] sm:$0xff] %v6064_v10  ;;  %v4804_v32 = vld [vmem:[%s8527_s1 + $0x50] sm:$0xff] }
 0x1fc   :  { %1054 = vadd.xlane.f32.xlu0 %v806_v11  ;;  %v423_v49 = vrot.slane %v6035_v54, 1  ;;  %v1513_v30 = vmul.f32 %v1257_v8, %v5986_v12  ;;  %v2352_v48 = vadd.f32 %v2351_v0, %v2350_v55  ;;  %v517_v42 = vperm.slane %v394_v47, 0 }
 0x1fd   :  { %v1689_v38 = vsel %vm1582_vm0, %v1511_v61, 0.0  ;;  %v2329_v23 = vsel %vm1582_vm0, %v1877_v4, 0.0  ;;  %v2368_v40 = vadd.f32 %v2367_v35, %v2366_v63  ;;  %v1887_v53 = vmul.f32 %v6044_v45, %v6064_v10  ;;  %v6078_v35 = vpop.xlane.xlu0 %946 }
 0x1fe   :  { %v1690_v27 = vadd.f32 %v1689_v38, %v1688_v19  ;;  %v551_v17 = vperm.slane %v423_v49, 0  ;;  %v1514_v33 = vmul.f32 %v1258_v16, %v935_v58  ;;  %v2353_v51 = vrot.slane %v2352_v48, 2 }
 0x1ff   :  { %v773_v6 = vmul.f32 %v4804_v32, %v517_v42  ;;  %v2325_v12 = vrot.slane %v2324_v62, 2  ;;  %v2386_v8 = vrot.slane %v2385_v26, 4  ;;  %v2362_v55 = vrot.slane %v2361_v24, 1 }
 0x200   :  { %v1692_v11 = vadd.f32 %v1691_v59, %v1690_v27  ;;  %v807_v0 = vmul.f32 %v551_v17, %v5883_v1  ;;  %v1140_v63 = vrot.slane %v5989_v13, 6  ;;  %v1693_v19 = vsel %vm1582_vm0, %v1513_v30, 0.0 }
 0x201   :  { %v2354_v4 = vadd.f32 %v2353_v51, %v2352_v48  ;;  %988 = vadd.xlane.f32.xlu2 %v773_v6  ;;  %v6081_v16 = vadd.f32 %v2339_v7, %v6030_v15  ;;  %v2330_v61 = vrot.slane %v2329_v23, 4  ;;  %v2369_v47 = vrot.slane %v2368_v40, 1  ;;  %v937_v51 = vpop.xlane.xlu2 %936 }
 0x202   :  { %1056 = vadd.xlane.f32.xlu1 %v807_v0  ;;  %v1694_v49 = vadd.f32 %v1693_v19, %v1692_v11  ;;  %v2399_v59 = vsel %vm1582_vm0, %v1887_v53, 0.0  ;;  %v1695_v38 = vsel %vm1582_vm0, %v1514_v33, 0.0  ;;  %v1883_v42 = vmul.f32 %v935_v58, %v5917_v52 }
 0x203   :  { %v2355_v27 = vrot.slane %v2354_v4, 1  ;;  %v2326_v17 = vadd.f32 %v2325_v12, %v2324_v62  ;;  %v2387_v30 = vadd.f32 %v2386_v8, %v2385_v26  ;;  %v1889_v48 = vmul.f32 %v6078_v35, %v6064_v10  ;;  %v6096_v12 = vpop.xlane.xlu1 %940 }
 0x204   :  { %v6088_v32 = vadd.f32 %v1695_v38, %v1694_v49  ;;  %v2363_v15 = vadd.f32 %v2362_v55, %v2361_v24  ;;  %v1260_v7 = vperm.slane %v1140_v63, 0  ;;  %v1139_v11 = vrot.slane %v5989_v13, 5  ;;  %v6110_v38 = vpop.f32.mrf.mxu1 }
 0x205   :  { %v2356_v6 = vadd.f32 %v2355_v27, %v2354_v4  ;;  %v2331_v0 = vadd.f32 %v2330_v61, %v2329_v23  ;;  %v2370_v53 = vadd.f32 %v2369_v47, %v2368_v40  ;;  %v2400_v19 = vrot.slane %v2399_v59, 4  ;;  %8588 = vst [vmem:[#allocation31_spill] sm:$0xff] %v6110_v38 }
 0x206   :  { %v400_v33 = vrot.slane %v5780_v60, 6  ;;  %v2371_v58 = vsel %vm1582_vm0, %v1883_v42, 0.0  ;;  %v1884_v26 = vmul.f32 %v937_v51, %v5917_v52  ;;  %v412_v24 = vrot.slane %v5910_v9, 4 }
 0x207   :  { %v3063_v62 = vsel %vm3007_vm1, %v2356_v6, %v6042_v44  ;;  %v2327_v8 = vrot.slane %v2326_v17, 1  ;;  %v2388_v55 = vrot.slane %v2387_v30, 2  ;;  %v2413_v23 = vsel %vm1582_vm0, %v1889_v48, 0.0 }
 0x208   :  { %v3064_v63 = vsel %vm3009_vm2, %v2363_v15, %v3063_v62  ;;  %v8586_v40 = vrot.slane %v6015_v18, 1  ;;  %v2341_v61 = vrot.slane %v6081_v16, 1  ;;  %v1259_v44 = vperm.slane %v1139_v11, 0  ;;  %v4805_v11 = vld [vmem:[%s8527_s1 + $0x58] sm:$0xff] }
 0x209   :  { %v6108_v47 = vsel %vm3011_vm3, %v2370_v53, %v3064_v63  ;;  %v2332_v49 = vrot.slane %v2331_v0, 2  ;;  %v2401_v42 = vadd.f32 %v2400_v19, %v2399_v59  ;;  %v2372_v27 = vrot.slane %v2371_v58, 4 }
 0x20a   :  { %v6104_v4 = vadd.f32 %v8586_v40, %v6015_v18  ;;  %v524_v6 = vperm.slane %v400_v33, 0  ;;  %v2414_v15 = vrot.slane %v2413_v23, 4  ;;  %v2378_v48 = vsel %vm1582_vm0, %v1884_v26, 0.0 }
 0x20b   :  { %v538_v62 = vperm.slane %v412_v24, 0  ;;  %v406_v46 = vrot.slane %v5861_v41, 5  ;;  %v2328_v18 = vadd.f32 %v2327_v8, %v2326_v17  ;;  %v1516_v40 = vmul.f32 %v1260_v7, %v6007_v31  ;;  %v6127_v7 = vld [vmem:[%s8527_s1 + $0x60] sm:$0xff] }
 0x20c   :  { %8587 = vst [vmem:[#allocation30_spill] sm:$0xff] %v6104_v4  ;;  %v6115_v4 = vadd.f32 %v2388_v55, %v2387_v30  ;;  %v780_v53 = vmul.f32 %v4805_v11, %v524_v6  ;;  %v1262_v59 = vperm.slane %v6110_v38, 0  ;;  %v1515_v19 = vmul.f32 %v1259_v44, %v937_v51  ;;  %v6147_v6 = vpop.xlane.xlu0 %948 }
 0x20d   :  { %v794_v33 = vmul.f32 %v538_v62, %v5775_v14  ;;  %v531_v63 = vperm.slane %v406_v46, 0  ;;  %v2333_v26 = vadd.f32 %v2332_v49, %v2331_v0  ;;  %v2402_v24 = vrot.slane %v2401_v42, 2 }
 0x20e   :  { %v2373_v39 = vadd.f32 %v2372_v27, %v2371_v58  ;;  %v2379_v20 = vrot.slane %v2378_v48, 4  ;;  %1002 = vadd.xlane.f32.xlu0 %v780_v53  ;;  %v1143_v31 = vrot.slane %v6110_v38, 2  ;;  %v2415_v17 = vadd.f32 %v2414_v15, %v2413_v23  ;;  %v6149_v15 = vpop.xlane.xlu2 %952 }
 0x20f   :  { %v1141_v30 = vrot.slane %v5989_v13, 7  ;;  %1030 = vadd.xlane.f32.xlu2 %v794_v33  ;;  %v787_v51 = vmul.f32 %v6127_v7, %v531_v63  ;;  %v6131_v14 = vadd.f32 %v2341_v61, %v6081_v16  ;;  %v6135_v46 = vsel %vm3015_vm5, %v2328_v18, %v5955_v5  ;;  %v6145_v16 = vpop.xlane.xlu1 %944 }
 0x210   :  { %8590 = vst [vmem:[#allocation33_spill] sm:$0xff] %v6135_v46  ;;  %v1699_v0 = vsel %vm1582_vm0, %v1516_v40, 0.0  ;;  %v1886_v58 = vmul.f32 %v6096_v12, %v5917_v52  ;;  %v2390_v8 = vrot.slane %v6115_v4, 1  ;;  %v2853_v55 = vadd.f32 %v6023_v22, %v5836_v25 }
 0x211   :  { %8589 = vst [vmem:[#allocation32_spill] sm:$0xff] %v6131_v14  ;;  %v1518_v23 = vmul.f32 %v1262_v59, %v6044_v45  ;;  %v1697_v44 = vsel %vm1582_vm0, %v1515_v19, 0.0  ;;  %1016 = vadd.xlane.f32.xlu1 %v787_v51  ;;  %v2334_v61 = vrot.slane %v2333_v26, 1  ;;  %v2403_v5 = vadd.f32 %v2402_v24, %v2401_v42 }
 0x212   :  { %v2374_v49 = vrot.slane %v2373_v39, 2  ;;  %v2380_v27 = vadd.f32 %v2379_v20, %v2378_v48  ;;  %v1264_v62 = vperm.slane %v1143_v31, 0  ;;  %v2416_v18 = vrot.slane %v2415_v17, 2 }
 0x213   :  { %v1261_v40 = vperm.slane %v1141_v30, 0  ;;  %v418_v25 = vrot.slane %v5983_v34, 3  ;;  %v1698_v22 = vadd.f32 %v1697_v44, %v6088_v32  ;;  %v2392_v45 = vsel %vm1582_vm0, %v1886_v58, 0.0 }
 0x214   :  { %v1888_v53 = vmul.f32 %v6145_v16, %v6064_v10  ;;  %v401_v42 = vrot.slane %v5780_v60, 7  ;;  %v1890_v20 = vmul.f32 %v6147_v6, %v6064_v10  ;;  %v1892_v48 = vmul.f32 %v6149_v15, %v6064_v10 }
 0x215   :  { %v545_v59 = vperm.slane %v418_v25, 0  ;;  %v424_v19 = vrot.slane %v6035_v54, 2  ;;  %v2404_v33 = vrot.slane %v2403_v5, 1  ;;  %v2375_v63 = vadd.f32 %v2374_v49, %v2373_v39 }
 0x216   :  { %v2381_v24 = vrot.slane %v2380_v27, 2  ;;  %v525_v32 = vperm.slane %v401_v42, 0  ;;  %v1520_v31 = vmul.f32 %v1264_v62, %v6078_v35  ;;  %v1517_v30 = vmul.f32 %v1261_v40, %v6096_v12 }
 0x217   :  { %v801_v51 = vmul.f32 %v545_v59, %v5819_v28  ;;  %v552_v60 = vperm.slane %v424_v19, 0  ;;  %v2417_v58 = vadd.f32 %v2416_v18, %v2415_v17  ;;  %v2393_v44 = vrot.slane %v2392_v45, 4 }
 0x218   :  { %v2406_v13 = vsel %vm1582_vm0, %v1888_v53, 0.0  ;;  %v781_v14 = vmul.f32 %v4805_v11, %v525_v32  ;;  %v1700_v46 = vadd.f32 %v1699_v0, %v1698_v22  ;;  %v2420_v25 = vsel %vm1582_vm0, %v1890_v20, 0.0 }
 0x219   :  { %v2434_v36 = vsel %vm1582_vm0, %v1892_v48, 0.0  ;;  %1044 = vadd.xlane.f32.xlu0 %v801_v51  ;;  %v808_v39 = vmul.f32 %v552_v60, %v5883_v1  ;;  %v6170_v35 = vadd.f32 %v2390_v8, %v6115_v4  ;;  %v2376_v12 = vrot.slane %v2375_v63, 1  ;;  %v6179_v4 = vpop.xlane.xlu0 %954  ;;  %v6181_v8 = vpop.xlane.xlu2 %956 }
 0x21a   :  { %v2382_v49 = vadd.f32 %v2381_v24, %v2380_v27  ;;  %v1142_v62 = vrot.slane %v6110_v38, 1  ;;  %1004 = vadd.xlane.f32.xlu2 %v781_v14  ;;  %v6173_v17 = vadd.f32 %v2334_v61, %v2333_v26  ;;  %4620 = vtanh.f32 %v2853_v55 }
 0x21b   :  { %v6176_v11 = vsel %vm1582_vm0, %v1518_v23, 0.0  ;;  %v2407_v0 = vrot.slane %v2406_v13, 4  ;;  %1058 = vadd.xlane.f32.xlu1 %v808_v39  ;;  %v1701_v18 = vsel %vm1582_vm0, %v1517_v30, 0.0  ;;  %v2394_v40 = vadd.f32 %v2393_v44, %v2392_v45 }
 0x21c   :  { %v2421_v22 = vrot.slane %v2420_v25, 4  ;;  %v2435_v53 = vrot.slane %v2434_v36, 4  ;;  %v6183_v27 = vadd.f32 %v2404_v33, %v2403_v5  ;;  %v6186_v26 = vsel %vm1582_vm0, %v1520_v31, 0.0 }
 0x21d   :  { %v2418_v14 = vrot.slane %v2417_v58, 1  ;;  %v1702_v55 = vadd.f32 %v1701_v18, %v1700_v46  ;;  %v2377_v23 = vadd.f32 %v2376_v12, %v2375_v63  ;;  %v2383_v61 = vrot.slane %v2382_v49, 1 }
 0x21e   :  { %v1144_v42 = vrot.slane %v6110_v38, 3  ;;  %v1263_v20 = vperm.slane %v1142_v62, 0  ;;  %v2408_v48 = vadd.f32 %v2407_v0, %v2406_v13  ;;  %v1893_v45 = vmul.f32 %v6179_v4, %v6064_v10  ;;  %v951_v62 = vpop.xlane.xlu1 %950 }
 0x21f   :  { %v1894_v59 = vmul.f32 %v6181_v8, %v6064_v10  ;;  %v407_v5 = vrot.slane %v5861_v41, 6  ;;  %v2395_v19 = vrot.slane %v2394_v40, 2  ;;  %v2422_v33 = vadd.f32 %v2421_v22, %v2420_v25 }
 0x220   :  { %v2436_v24 = vadd.f32 %v2435_v53, %v2434_v36  ;;  %v419_v32 = vrot.slane %v5983_v34, 4  ;;  %v6195_v46 = vpop.eup %4620  ;;  %v6197_v63 = vadd.f32 %v2418_v14, %v2417_v58  ;;  %v3066_v13 = vsel %vm3013_vm4, %v2377_v23, %v6108_v47 }
 0x221   :  { %v2854_v31 = vadd.f32 %v1702_v55, %v5917_v52  ;;  %v532_v30 = vperm.slane %v407_v5, 0  ;;  %v1265_v51 = vperm.slane %v1144_v42, 0  ;;  %v1146_v60 = vrot.slane %v6110_v38, 5 }
 0x222   :  { %v1519_v44 = vmul.f32 %v1263_v20, %v6145_v16  ;;  %v546_v39 = vperm.slane %v419_v32, 0  ;;  %v2409_v25 = vrot.slane %v2408_v48, 2  ;;  %v2441_v36 = vsel %vm1582_vm0, %v1893_v45, 0.0 }
 0x223   :  { %v2448_v12 = vsel %vm1582_vm0, %v1894_v59, 0.0  ;;  %v788_v58 = vmul.f32 %v6127_v7, %v532_v30  ;;  %v2384_v0 = vadd.f32 %v2383_v61, %v2382_v49  ;;  %v6207_v18 = vadd.f32 %v2395_v19, %v2394_v40  ;;  %v6221_v19 = vpop.f32.mrf.mxu2 }
 0x224   :  { %v2423_v47 = vrot.slane %v2422_v33, 2  ;;  %v2437_v52 = vrot.slane %v2436_v24, 2  ;;  %v1147_v22 = vrot.slane %v6110_v38, 6  ;;  %v1145_v53 = vrot.slane %v6110_v38, 4 }
 0x225   :  { %1018 = vadd.xlane.f32.xlu0 %v788_v58  ;;  %v802_v16 = vmul.f32 %v546_v39, %v5819_v28  ;;  %v413_v14 = vrot.slane %v5910_v9, 5  ;;  %v1704_v55 = vsel %vm1582_vm0, %v1519_v44, 0.0  ;;  %v2442_v23 = vrot.slane %v2441_v36, 4 }
 0x226   :  { %v2449_v42 = vrot.slane %v2448_v12, 4  ;;  %v1891_v20 = vmul.f32 %v951_v62, %v6064_v10  ;;  %v1521_v49 = vmul.f32 %v1265_v51, %v6147_v6  ;;  %v1267_v40 = vperm.slane %v1146_v60, 0  ;;  %v6228_v6 = vld [vmem:[%s8527_s1 + $0x68] sm:$0xff]  ;;  %v6258_v10 = vpop.f32.mrf.mxu1 }
 0x227   :  { %v2410_v61 = vadd.f32 %v2409_v25, %v2408_v48  ;;  %1046 = vadd.xlane.f32.xlu2 %v802_v16  ;;  %v539_v45 = vperm.slane %v413_v14, 0  ;;  %v6217_v59 = vsel %vm3015_vm5, %v2384_v0, %v3066_v13  ;;  %4622 = vtanh.f32 %v2854_v31  ;;  %v6231_v13 = vpop.xlane.xlu0 %960  ;;  %v6233_v31 = vpop.xlane.xlu2 %958 }
 0x228   :  { %v2424_v5 = vadd.f32 %v2423_v47, %v2422_v33  ;;  %v6219_v28 = vadd.f32 %v2437_v52, %v2436_v24  ;;  %v2397_v32 = vrot.slane %v6207_v18, 1  ;;  %v1705_v30 = vadd.f32 %v1704_v55, %v6176_v11  ;;  %v6245_v16 = vpop.xlane.xlu1 %962 }
 0x229   :  { %v1266_v44 = vperm.slane %v1145_v53, 0  ;;  %v795_v48 = vmul.f32 %v6228_v6, %v539_v45  ;;  %v1268_v33 = vperm.slane %v1147_v22, 0  ;;  %v2443_v24 = vadd.f32 %v2442_v23, %v2441_v36 }
 0x22a   :  { %v2450_v51 = vadd.f32 %v2449_v42, %v2448_v12  ;;  %v2427_v60 = vsel %vm1582_vm0, %v1891_v20, 0.0  ;;  %v1708_v39 = vsel %vm1582_vm0, %v1521_v49, 0.0  ;;  %v1523_v11 = vmul.f32 %v1267_v40, %v6149_v15 }
 0x22b   :  { %v2411_v25 = vrot.slane %v2410_v61, 1  ;;  %v1148_v58 = vrot.slane %v6110_v38, 7  ;;  %1032 = vadd.xlane.f32.xlu1 %v795_v48  ;;  %v2425_v0 = vrot.slane %v2424_v5, 1  ;;  %v2439_v47 = vrot.slane %v6219_v28, 1 }
 0x22c   :  { %v1896_v52 = vmul.f32 %v6231_v13, %v6221_v19  ;;  %v1895_v36 = vmul.f32 %v6233_v31, %v6221_v19  ;;  %v1707_v12 = vadd.f32 %v6186_v26, %v1705_v30  ;;  %v1522_v22 = vmul.f32 %v1266_v44, %v951_v62 }
 0x22d   :  { %v2428_v53 = vrot.slane %v2427_v60, 4  ;;  %v425_v15 = vrot.slane %v6035_v54, 3  ;;  %v6248_v14 = vpop.eup %4622  ;;  %v1524_v55 = vmul.f32 %v1268_v33, %v6179_v4  ;;  %v2444_v23 = vrot.slane %v2443_v24, 2 }
 0x22e   :  { %8591 = vst [vmem:[#allocation34_spill] sm:$0xff] %v6248_v14  ;;  %v2451_v42 = vrot.slane %v2450_v51, 2  ;;  %v414_v20 = vrot.slane %v5910_v9, 6  ;;  %v2412_v49 = vadd.f32 %v2411_v25, %v2410_v61  ;;  %v1269_v40 = vperm.slane %v1148_v58, 0 }
 0x22f   :  { %v553_v45 = vperm.slane %v425_v15, 0  ;;  %v408_v48 = vrot.slane %v5861_v41, 7  ;;  %v2462_v26 = vsel %vm1582_vm0, %v1896_v52, 0.0  ;;  %v2455_v62 = vsel %vm1582_vm0, %v1895_v36, 0.0 }
 0x230   :  { %v1897_v30 = vmul.f32 %v6245_v16, %v6221_v19  ;;  %v540_v44 = vperm.slane %v414_v20, 0  ;;  %v1709_v38 = vadd.f32 %v1708_v39, %v1707_v12  ;;  %v1710_v4 = vsel %vm1582_vm0, %v1522_v22, 0.0 }
 0x231   :  { %v2429_v33 = vadd.f32 %v2428_v53, %v2427_v60  ;;  %v809_v61 = vmul.f32 %v553_v45, %v5883_v1  ;;  %v2445_v25 = vadd.f32 %v2444_v23, %v2443_v24  ;;  %v2452_v58 = vadd.f32 %v2451_v42, %v2450_v51  ;;  %v6268_v24 = vpop.xlane.xlu0 %968  ;;  %v6283_v45 = vpop.xlane.xlu1 %964 }
 0x232   :  { %v796_v41 = vmul.f32 %v6228_v6, %v540_v44  ;;  %v533_v15 = vperm.slane %v408_v48, 0  ;;  %v3070_v52 = vsel %vm3007_vm1, %v2412_v49, %v6183_v27  ;;  %v1525_v36 = vmul.f32 %v1269_v40, %v6181_v8  ;;  %v6279_v49 = vpop.xlane.xlu2 %966 }
 0x233   :  { %v2463_v14 = vrot.slane %v2462_v26, 4  ;;  %v2456_v20 = vrot.slane %v2455_v62, 4  ;;  %1060 = vadd.xlane.f32.xlu0 %v809_v61  ;;  %v1711_v39 = vadd.f32 %v1710_v4, %v1709_v38  ;;  %v1149_v60 = vrot.slane %v6258_v10, 1 }
 0x234   :  { %v2469_v12 = vsel %vm1582_vm0, %v1897_v30, 0.0  ;;  %1034 = vadd.xlane.f32.xlu2 %v796_v41  ;;  %v789_v1 = vmul.f32 %v6127_v7, %v533_v15  ;;  %v6271_v51 = vadd.f32 %v2397_v32, %v6207_v18  ;;  %v2426_v22 = vadd.f32 %v2425_v0, %v2424_v5 }
 0x235   :  { %v1712_v27 = vsel %vm1582_vm0, %v1523_v11, 0.0  ;;  %v2430_v8 = vrot.slane %v2429_v33, 2  ;;  %v6275_v53 = vadd.f32 %v2439_v47, %v6219_v28  ;;  %v3071_v38 = vsel %vm3009_vm2, %v6197_v63, %v3070_v52  ;;  %v4808_v52 = vld [vmem:[%s8527_s1 + $0x70] sm:$0xff] }
 0x236   :  { %v2446_v23 = vrot.slane %v2445_v25, 1  ;;  %v2453_v42 = vrot.slane %v2452_v58, 1  ;;  %1020 = vadd.xlane.f32.xlu1 %v789_v1  ;;  %v1714_v7 = vsel %vm1582_vm0, %v1524_v55, 0.0  ;;  %v2464_v40 = vadd.f32 %v2463_v14, %v2462_v26 }
 0x237   :  { %8592 = vst [vmem:[#allocation35_spill] sm:$0xff] %v6275_v53  ;;  %v2457_v18 = vadd.f32 %v2456_v20, %v2455_v62  ;;  %v2470_v32 = vrot.slane %v2469_v12, 4  ;;  %v1716_v5 = vsel %vm1582_vm0, %v1525_v36, 0.0  ;;  %v1713_v11 = vadd.f32 %v1712_v27, %v1711_v39 }
 0x238   :  { %v1271_v0 = vperm.slane %v1149_v60, 0  ;;  %v420_v28 = vrot.slane %v5983_v34, 5  ;;  %v6287_v63 = vsel %vm3011_vm3, %v2426_v22, %v3071_v38  ;;  %v2431_v47 = vadd.f32 %v2430_v8, %v2429_v33 }
 0x239   :  { %v1270_v48 = vperm.slane %v6258_v10, 0  ;;  %v1900_v55 = vmul.f32 %v6268_v24, %v6221_v19  ;;  %v6292_v14 = vadd.f32 %v2446_v23, %v2445_v25  ;;  %v6294_v26 = vadd.f32 %v2453_v42, %v2452_v58  ;;  %v6310_v22 = vpop.xlane.xlu0 %972 }
 0x23a   :  { %v1899_v62 = vmul.f32 %v6279_v49, %v6221_v19  ;;  %v547_v30 = vperm.slane %v420_v28, 0  ;;  %v2465_v44 = vrot.slane %v2464_v40, 2  ;;  %v2458_v4 = vrot.slane %v2457_v18, 2  ;;  %v6324_v28 = vpop.xlane.xlu2 %974 }
 0x23b   :  { %8593 = vst [vmem:[#allocation36_spill] sm:$0xff] %v6292_v14  ;;  %v2471_v61 = vadd.f32 %v2470_v32, %v2469_v12  ;;  %v415_v41 = vrot.slane %v5910_v9, 7  ;;  %v1715_v15 = vadd.f32 %v1714_v7, %v1713_v11  ;;  %v1527_v33 = vmul.f32 %v1271_v0, %v6231_v13  ;;  %v6319_v32 = vld [vmem:[%s8527_s1 + $0x78] sm:$0xff]  ;;  %v6322_v0 = vpop.f32.mrf.mxu2 }
 0x23c   :  { %8594 = vst [vmem:[#allocation37_spill] sm:$0xff] %v6294_v26  ;;  %v803_v25 = vmul.f32 %v4808_v52, %v547_v30  ;;  %v426_v58 = vrot.slane %v6035_v54, 4  ;;  %v2432_v36 = vrot.slane %v2431_v47, 1  ;;  %v1526_v20 = vmul.f32 %v1270_v48, %v6233_v31 }
 0x23d   :  { %v2490_v39 = vsel %vm1582_vm0, %v1900_v55, 0.0  ;;  %v541_v60 = vperm.slane %v415_v41, 0  ;;  %v1150_v12 = vrot.slane %v6258_v10, 2  ;;  %v2483_v9 = vsel %vm1582_vm0, %v1899_v62, 0.0 }
 0x23e   :  { %v1898_v13 = vmul.f32 %v6283_v45, %v6221_v19  ;;  %1048 = vadd.xlane.f32.xlu0 %v803_v25  ;;  %v554_v1 = vperm.slane %v426_v58, 0  ;;  %v2466_v27 = vadd.f32 %v2465_v44, %v2464_v40  ;;  %v2459_v8 = vadd.f32 %v2458_v4, %v2457_v18  ;;  %v6331_v44 = vpop.xlane.xlu1 %970 }
 0x23f   :  { %v2472_v38 = vrot.slane %v2471_v61, 2  ;;  %v797_v23 = vmul.f32 %v6228_v6, %v541_v60  ;;  %v6313_v31 = vadd.f32 %v1716_v5, %v1715_v15  ;;  %v2491_v42 = vrot.slane %v2490_v39, 4 }
 0x240   :  { %v1151_v7 = vrot.slane %v6258_v10, 3  ;;  %v810_v11 = vmul.f32 %v6319_v32, %v554_v1  ;;  %v1719_v40 = vsel %vm1582_vm0, %v1527_v33, 0.0  ;;  %v1718_v6 = vsel %vm1582_vm0, %v1526_v20, 0.0 }
 0x241   :  { %8595 = vst [vmem:[#allocation38_spill] sm:$0xff] %v6313_v31  ;;  %v1153_v18 = vrot.slane %v6258_v10, 5  ;;  %v2484_v5 = vrot.slane %v2483_v9, 4  ;;  %1036 = vadd.xlane.f32.xlu2 %v797_v23  ;;  %v2433_v48 = vadd.f32 %v2432_v36, %v2431_v47  ;;  %v1272_v55 = vperm.slane %v1150_v12, 0 }
 0x242   :  { %v1152_v62 = vrot.slane %v6258_v10, 4  ;;  %v2476_v30 = vsel %vm1582_vm0, %v1898_v13, 0.0  ;;  %1062 = vadd.xlane.f32.xlu1 %v810_v11  ;;  %v2467_v4 = vrot.slane %v2466_v27, 1  ;;  %v2460_v41 = vrot.slane %v2459_v8, 1 }
 0x243   :  { %v2473_v15 = vadd.f32 %v2472_v38, %v2471_v61  ;;  %v1903_v33 = vmul.f32 %v6324_v28, %v6322_v0  ;;  %v2492_v25 = vadd.f32 %v2491_v42, %v2490_v39  ;;  %v1273_v58 = vperm.slane %v1151_v7, 0 }
 0x244   :  { %v421_v20 = vrot.slane %v5983_v34, 6  ;;  %v422_v47 = vrot.slane %v5983_v34, 7  ;;  %v1275_v36 = vperm.slane %v1153_v18, 0  ;;  %v2485_v60 = vadd.f32 %v2484_v5, %v2483_v9  ;;  %v6340_v34 = vpop.xlane.xlu0 %976 }
 0x245   :  { %v2477_v12 = vrot.slane %v2476_v30, 4  ;;  %v2511_v13 = vsel %vm1582_vm0, %v1903_v33, 0.0  ;;  %v1274_v1 = vperm.slane %v1152_v62, 0  ;;  %v1720_v14 = vadd.f32 %v1719_v40, %v1718_v6 }
 0x246   :  { %v2512_v23 = vrot.slane %v2511_v13, 4  ;;  %v548_v11 = vperm.slane %v421_v20, 0  ;;  %v549_v26 = vperm.slane %v422_v47, 0  ;;  %v2461_v61 = vadd.f32 %v2460_v41, %v2459_v8 }
 0x247   :  { %v1528_v38 = vmul.f32 %v1272_v55, %v6245_v16  ;;  %v2474_v53 = vrot.slane %v2473_v15, 1  ;;  %v2493_v39 = vrot.slane %v2492_v25, 2  ;;  %v1529_v42 = vmul.f32 %v1273_v58, %v6283_v45  ;;  %v6358_v55 = vpop.xlane.xlu1 %982 }
 0x248   :  { %v804_v7 = vmul.f32 %v4808_v52, %v548_v11  ;;  %v805_v31 = vmul.f32 %v4808_v52, %v549_v26  ;;  %v6344_v9 = vsel %vm3013_vm4, %v2433_v48, %v6287_v63  ;;  %v2468_v18 = vadd.f32 %v2467_v4, %v2466_v27 }
 0x249   :  { %v2486_v5 = vrot.slane %v2485_v60, 2  ;;  %v2478_v62 = vadd.f32 %v2477_v12, %v2476_v30  ;;  %v1531_v40 = vmul.f32 %v1275_v36, %v6268_v24  ;;  %v1530_v8 = vmul.f32 %v1274_v1, %v6279_v49 }
 0x24a   :  { %v2513_v16 = vadd.f32 %v2512_v23, %v2511_v13  ;;  %1050 = vadd.xlane.f32.xlu0 %v804_v7  ;;  %1052 = vadd.xlane.f32.xlu2 %v805_v31  ;;  %v427_v45 = vrot.slane %v6035_v54, 5  ;;  %v3077_v26 = vsel %vm3007_vm1, %v2468_v18, %v2461_v61  ;;  %v1721_v52 = vsel %vm1582_vm0, %v1528_v38, 0.0  ;;  %v6383_v23 = vld [vmem:[%s8530_s4] ss:$0 sm:$0xff] }
 0x24b   :  { %v2475_v6 = vadd.f32 %v2474_v53, %v2473_v15  ;;  %v1904_v63 = vmul.f32 %v6340_v34, %v6322_v0  ;;  %v6353_v27 = vadd.f32 %v2493_v39, %v2492_v25  ;;  %v1723_v48 = vsel %vm1582_vm0, %v1529_v42, 0.0  ;;  %v6363_v53 = vpop.xlane.xlu2 %978 }
 0x24c   :  { %v1902_v24 = vmul.f32 %v6310_v22, %v6221_v19  ;;  %v555_v49 = vperm.slane %v427_v45, 0  ;;  %v1722_v31 = vadd.f32 %v1721_v52, %v1720_v14  ;;  %v6360_v30 = vadd.f32 %v2486_v5, %v2485_v60 }
 0x24d   :  { %v2479_v4 = vrot.slane %v2478_v62, 2  ;;  %v2518_v41 = vsel %vm1582_vm0, %v1904_v63, 0.0  ;;  %v6366_v15 = vsel %vm1582_vm0, %v1531_v40, 0.0  ;;  %v1725_v33 = vsel %vm1582_vm0, %v1530_v8, 0.0 }
 0x24e   :  { %v2514_v25 = vrot.slane %v2513_v16, 2  ;;  %v811_v58 = vmul.f32 %v6319_v32, %v555_v49  ;;  %v6371_v20 = vsel %vm3009_vm2, %v2475_v6, %v3077_v26  ;;  %v1724_v47 = vadd.f32 %v1723_v48, %v1722_v31  ;;  %v6395_v31 = vpop.xlane.xlu0 %980 }
 0x24f   :  { %v2519_v14 = vrot.slane %v2518_v41, 4  ;;  %v1907_v36 = vmul.f32 %v6358_v55, %v6322_v0  ;;  %v2495_v60 = vrot.slane %v6353_v27, 1  ;;  %v1155_v12 = vrot.slane %v6258_v10, 7 }
 0x250   :  { %v2504_v13 = vsel %vm1582_vm0, %v1902_v24, 0.0  ;;  %1064 = vadd.xlane.f32.xlu1 %v811_v58  ;;  %v1905_v1 = vmul.f32 %v6363_v53, %v6322_v0  ;;  %v2488_v11 = vrot.slane %v6360_v30, 1  ;;  %v2480_v61 = vadd.f32 %v2479_v4, %v2478_v62 }
 0x251   :  { %v1154_v38 = vrot.slane %v6258_v10, 6  ;;  %v2520_v39 = vadd.f32 %v2519_v14, %v2518_v41  ;;  %v2515_v42 = vadd.f32 %v2514_v25, %v2513_v16  ;;  %v2539_v7 = vsel %vm1582_vm0, %v1907_v36, 0.0 }
 0x252   :  { %v2525_v18 = vsel %vm1582_vm0, %v1905_v1, 0.0  ;;  %v428_v5 = vrot.slane %v6035_v54, 6  ;;  %v2505_v40 = vrot.slane %v2504_v13, 4  ;;  %v1901_v8 = vmul.f32 %v6331_v44, %v6221_v19 }
 0x253   :  { %v2521_v45 = vrot.slane %v2520_v39, 2  ;;  %v2526_v26 = vrot.slane %v2525_v18, 4  ;;  %v2540_v52 = vrot.slane %v2539_v7, 4  ;;  %v3178_v62 = vmul.f32 %v5443_v3, %v6383_v23 }
 0x254   :  { %v556_v6 = vperm.slane %v428_v5, 0  ;;  %v429_v63 = vrot.slane %v6035_v54, 7  ;;  %v1277_v16 = vperm.slane %v1155_v12, 0  ;;  %v1276_v48 = vperm.slane %v1154_v38, 0 }
 0x255   :  { %v2522_v24 = vadd.f32 %v2521_v45, %v2520_v39  ;;  %v2527_v49 = vadd.f32 %v2526_v26, %v2525_v18  ;;  %v2516_v4 = vrot.slane %v2515_v42, 1  ;;  %v3194_v25 = vsel %vm1582_vm0, %v3178_v62, 0.0 }
 0x256   :  { %v812_v41 = vmul.f32 %v6319_v32, %v556_v6  ;;  %v557_v58 = vperm.slane %v429_v63, 0  ;;  %v2481_v14 = vrot.slane %v2480_v61, 1  ;;  %v2497_v36 = vsel %vm1582_vm0, %v1901_v8, 0.0  ;;  %3195 = vadd.xlane.f32.xlu2 %v3194_v25 }
 0x257   :  { %v2523_v1 = vrot.slane %v2522_v24, 1  ;;  %v2528_v5 = vrot.slane %v2527_v49, 2  ;;  %v2506_v3 = vadd.f32 %v2505_v40, %v2504_v13  ;;  %v2541_v54 = vadd.f32 %v2540_v52, %v2539_v7  ;;  %v6409_v52 = vpop.xlane.xlu2 %984 }
 0x258   :  { %1066 = vadd.xlane.f32.xlu0 %v812_v41  ;;  %v813_v12 = vmul.f32 %v6319_v32, %v557_v58  ;;  %v1906_v38 = vmul.f32 %v6395_v31, %v6322_v0  ;;  %v1726_v39 = vadd.f32 %v1725_v33, %v1724_v47  ;;  %v1532_v18 = vmul.f32 %v1276_v48, %v6331_v44 }
 0x259   :  { %v2524_v45 = vadd.f32 %v2523_v1, %v2522_v24  ;;  %v2529_v26 = vadd.f32 %v2528_v5, %v2527_v49  ;;  %v1533_v6 = vmul.f32 %v1277_v16, %v6310_v22  ;;  %v2498_v62 = vrot.slane %v2497_v36, 4  ;;  %v6413_v22 = vpop.xlane.xlu1 %986 }
 0x25a   :  { %v2517_v8 = vadd.f32 %v2516_v4, %v2515_v42  ;;  %1068 = vadd.xlane.f32.xlu1 %v813_v12  ;;  %v2532_v63 = vsel %vm1582_vm0, %v1906_v38, 0.0  ;;  %v6407_v13 = vadd.f32 %v2495_v60, %v6353_v27  ;;  %v2482_v7 = vadd.f32 %v2481_v14, %v2480_v61 }
 0x25b   :  { %v2530_v32 = vrot.slane %v2529_v26, 1  ;;  %v2533_v40 = vrot.slane %v2532_v63, 4  ;;  %v2489_v33 = vadd.f32 %v2488_v11, %v6360_v30  ;;  %v2507_v44 = vrot.slane %v2506_v3, 2  ;;  %v6422_v11 = vpop.f32.mrf.mxu1 }
 0x25c   :  { %v3084_v47 = vsel %vm3007_vm1, %v2524_v45, %v2517_v8  ;;  %v2542_v48 = vrot.slane %v2541_v54, 2  ;;  %v1729_v42 = vsel %vm1582_vm0, %v1532_v18, 0.0  ;;  %v1731_v27 = vsel %vm1582_vm0, %v1533_v6, 0.0  ;;  %8596 = vst [vmem:[#allocation39_spill] sm:$0xff] %v6422_v11  ;;  %v8597_v8 = vld [vmem:[#allocation11_spill] sm:$0xff] }
 0x25d   :  { %v2531_v16 = vadd.f32 %v2530_v32, %v2529_v26  ;;  %v2534_v24 = vadd.f32 %v2533_v40, %v2532_v63  ;;  %v1728_v60 = vadd.f32 %v6366_v15, %v1726_v39  ;;  %v2499_v61 = vadd.f32 %v2498_v62, %v2497_v36  ;;  %v8598_v63 = vld [vmem:[#allocation5_spill] sm:$0xff]  ;;  %v6450_v32 = vpop.f32.mrf.mxu2 }
 0x25e   :  { %v1908_v49 = vmul.f32 %v6409_v52, %v6322_v0  ;;  %v3079_v30 = vsel %vm3011_vm3, %v2482_v7, %v6371_v20  ;;  %v3179_v25 = vmul.f32 %v5750_v50, %v6383_v23  ;;  %v6427_v58 = vadd.f32 %v2507_v44, %v2506_v3  ;;  %8599 = vst [vmem:[#allocation11_spill] sm:$0xff] %v6450_v32 }
 0x25f   :  { %v3085_v4 = vsel %vm3009_vm2, %v2531_v16, %v3084_v47  ;;  %v2535_v41 = vrot.slane %v2534_v24, 2  ;;  %v1730_v14 = vadd.f32 %v1729_v42, %v1728_v60  ;;  %v2543_v1 = vadd.f32 %v2542_v48, %v2541_v54 }
 0x260   :  { %v2546_v15 = vsel %vm1582_vm0, %v1908_v49, 0.0  ;;  %v3197_v12 = vsel %vm1582_vm0, %v3179_v25, 0.0  ;;  %v2500_v20 = vrot.slane %v2499_v61, 2  ;;  %v1156_v38 = vrot.slane %v6422_v11, 1 }
 0x261   :  { %v2536_v36 = vadd.f32 %v2535_v41, %v2534_v24  ;;  %v2547_v5 = vrot.slane %v2546_v15, 4  ;;  %3198 = vadd.xlane.f32.xlu0 %v3197_v12  ;;  %v3026_v39 = vsel %vm8557_vm6, %v5644_v2, %v5738_v21  ;;  %v3016_v50 = vsel %vm3015_vm5, %v5412_v43, %v5428_v57  ;;  %v6457_v47 = vpop.xlane.xlu1 %992 }
 0x262   :  { %v3027_v18 = vsel %vm8553_vm7, %v5849_v37, %v3026_v39  ;;  %v3018_v45 = vsel %vm8557_vm6, %v5430_v29, %v3016_v50  ;;  %v1278_v26 = vperm.slane %v6422_v11, 0  ;;  %v2544_v6 = vrot.slane %v2543_v1, 1  ;;  %v6452_v37 = vpop.xlane.xlu0 %990 }
 0x263   :  { %v2537_v3 = vrot.slane %v2536_v36, 1  ;;  %v2548_v54 = vadd.f32 %v2547_v5, %v2546_v15  ;;  %v3143_v62 = vadd.f32 %v3027_v18, %v5236_v56  ;;  %v3020_v2 = vsel %vm8553_vm7, %v8597_v8, %v3018_v45  ;;  %v6455_v56 = vpop.xlane.xlu2 %996 }
 0x264   :  { %v6447_v21 = vsel %vm3013_vm4, %v2489_v33, %v3079_v30  ;;  %v3142_v7 = vadd.f32 %v3020_v2, %v8598_v63  ;;  %v2509_v29 = vrot.slane %v6427_v58, 1  ;;  %v1732_v40 = vadd.f32 %v1731_v27, %v1730_v14  ;;  %v6475_v14 = vld [vmem:[%s8531_s5] ss:$0 sm:$0xff] }
 0x265   :  { %v2538_v43 = vadd.f32 %v2537_v3, %v2536_v36  ;;  %v2549_v57 = vrot.slane %v2548_v54, 2  ;;  %v1279_v44 = vperm.slane %v1156_v38, 0  ;;  %4624 = vtanh.f32 %v3143_v62 }
 0x266   :  { %v2501_v48 = vadd.f32 %v2500_v20, %v2499_v61  ;;  %4626 = vtanh.f32 %v3142_v7  ;;  %v1534_v16 = vmul.f32 %v1278_v26, %v6324_v28  ;;  %v2545_v24 = vadd.f32 %v2544_v6, %v2543_v1  ;;  %v8600_v1 = vld [vmem:[#allocation17_spill] sm:$0xff] }
 0x267   :  { %v3086_v33 = vsel %vm3011_vm3, %v2538_v43, %v3085_v4  ;;  %v2550_v42 = vadd.f32 %v2549_v57, %v2548_v54  ;;  %v1157_v60 = vrot.slane %v6422_v11, 2  ;;  %v1911_v49 = vmul.f32 %v6452_v37, %v6450_v32 }
 0x268   :  { %v1159_v27 = vrot.slane %v6422_v11, 4  ;;  %v1914_v41 = vmul.f32 %v6455_v56, %v6450_v32  ;;  %v1912_v61 = vmul.f32 %v6457_v47, %v6450_v32  ;;  %v1535_v4 = vmul.f32 %v1279_v44, %v6340_v34  ;;  %v8602_v44 = vld [vmem:[#allocation8_spill] sm:$0xff] }
 0x269   :  { %v2551_v30 = vrot.slane %v2550_v42, 1  ;;  %v1158_v25 = vrot.slane %v6422_v11, 3  ;;  %v3087_v28 = vsel %vm3013_vm4, %v2545_v24, %v3086_v33  ;;  %v3180_v15 = vmul.f32 %v8600_v1, %v6383_v23  ;;  %v8603_v33 = vld [vmem:[#allocation15_spill] sm:$0xff] }
 0x26a   :  { %v2502_v36 = vrot.slane %v2501_v48, 1  ;;  %v1909_v5 = vmul.f32 %v6413_v22, %v6322_v0  ;;  %v2574_v20 = vsel %vm1582_vm0, %v1912_v61, 0.0  ;;  %v1733_v38 = vsel %vm1582_vm0, %v1534_v16, 0.0  ;;  %v8604_v61 = vld [vmem:[#allocation18_spill] sm:$0xff] }
 0x26b   :  { %v2552_v12 = vadd.f32 %v2551_v30, %v2550_v42  ;;  %v4625_v34 = vpop.eup %4624  ;;  %v1280_v39 = vperm.slane %v1157_v60, 0  ;;  %v2567_v50 = vsel %vm1582_vm0, %v1911_v49, 0.0  ;;  %v2588_v3 = vsel %vm1582_vm0, %v1914_v41, 0.0 }
 0x26c   :  { %v4627_v54 = vpop.eup %4626  ;;  %v3247_v45 = vmul.f32 %v4625_v34, %v6475_v14  ;;  %v2575_v26 = vrot.slane %v2574_v20, 4  ;;  %v3200_v6 = vsel %vm1582_vm0, %v3180_v15, 0.0  ;;  %v1734_v62 = vsel %vm1582_vm0, %v1535_v4, 0.0 }
 0x26d   :  { %v6486_v18 = vsel %vm3015_vm5, %v2552_v12, %v3087_v28  ;;  %v1282_v8 = vperm.slane %v1159_v27, 0  ;;  %v1281_v2 = vperm.slane %v1158_v25, 0  ;;  %v3246_v43 = vmul.f32 %v4627_v54, %v6475_v14  ;;  %3201 = vadd.xlane.f32.xlu0 %v3200_v6  ;;  %v6514_v54 = vpop.xlane.xlu1 %994 }
 0x26e   :  { %8601 = vst [vmem:[#allocation5_spill] sm:$0xff] %v6486_v18  ;;  %v2553_v57 = vsel %vm1582_vm0, %v1909_v5, 0.0  ;;  %v3265_v63 = vsel %vm1582_vm0, %v3247_v45, 0.0  ;;  %v2568_v7 = vrot.slane %v2567_v50, 4  ;;  %v3033_v42 = vsel %vm8557_vm6, %v8603_v33, %v8602_v44  ;;  %v6506_v5 = vpop.xlane.xlu0 %998 }
 0x26f   :  { %v1536_v16 = vmul.f32 %v1280_v39, %v6363_v53  ;;  %v1161_v24 = vrot.slane %v6422_v11, 6  ;;  %3266 = vadd.xlane.f32.xlu2 %v3265_v63  ;;  %v3262_v60 = vsel %vm1582_vm0, %v3246_v43, 0.0  ;;  %v2589_v49 = vrot.slane %v2588_v3, 4  ;;  %v8605_v53 = vld [vmem:[#allocation6_spill] sm:$0xff]  ;;  %v8608_v63 = vld [vmem:[#allocation19_spill] sm:$0xff] }
 0x270   :  { %v2503_v27 = vadd.f32 %v2502_v36, %v2501_v48  ;;  %v2856_v30 = vadd.f32 %v1732_v40, %v6221_v19  ;;  %3263 = vadd.xlane.f32.xlu1 %v3262_v60  ;;  %v2576_v41 = vadd.f32 %v2575_v26, %v2574_v20  ;;  %v3034_v4 = vsel %vm8553_vm7, %v8604_v61, %v3033_v42  ;;  %v8606_v19 = vld [vmem:[#allocation23_spill] sm:$0xff]  ;;  %v6511_v36 = vpop.xlane.xlu2 %1000 }
 0x271   :  { %v1537_v25 = vmul.f32 %v1281_v2, %v6395_v31  ;;  %v2554_v28 = vrot.slane %v2553_v57, 4  ;;  %v1160_v1 = vrot.slane %v6422_v11, 5  ;;  %v3144_v15 = vadd.f32 %v3034_v4, %v8605_v53  ;;  %v8612_v53 = vld [vmem:[#allocation13_spill] sm:$0xff] }
 0x272   :  { %v1735_v12 = vadd.f32 %v1734_v62, %v1733_v38  ;;  %v1538_v34 = vmul.f32 %v1282_v8, %v6358_v55  ;;  %v2569_v48 = vadd.f32 %v2568_v7, %v2567_v50  ;;  %v3181_v40 = vmul.f32 %v8606_v19, %v6383_v23 }
 0x273   :  { %v1736_v20 = vsel %vm1582_vm0, %v1536_v16, 0.0  ;;  %v1284_v39 = vperm.slane %v1161_v24, 0  ;;  %v2590_v31 = vadd.f32 %v2589_v49, %v2588_v3  ;;  %4628 = vtanh.f32 %v3144_v15  ;;  %v8609_v16 = vld [vmem:[#allocation20_spill] sm:$0xff]  ;;  %v8613_v15 = vld [vmem:[#allocation22_spill] sm:$0xff] }
 0x274   :  { %v6519_v45 = vadd.f32 %v2509_v29, %v6427_v58  ;;  %4630 = vtanh.f32 %v2856_v30  ;;  %v3081_v55 = vsel %vm3015_vm5, %v6407_v13, %v6447_v21  ;;  %v2577_v38 = vrot.slane %v2576_v41, 2  ;;  %v8607_v21 = vld [vmem:[#allocation10_spill] sm:$0xff]  ;;  %v8610_v30 = vld [vmem:[#allocation21_spill] sm:$0xff] }
 0x275   :  { %v6525_v50 = vsel %vm8557_vm6, %v2503_v27, %v3081_v55  ;;  %v1738_v26 = vsel %vm1582_vm0, %v1537_v25, 0.0  ;;  %v2555_v3 = vadd.f32 %v2554_v28, %v2553_v57  ;;  %v1283_v6 = vperm.slane %v1160_v1, 0  ;;  %v6536_v57 = vpop.f32.mrf.mxu1  ;;  %v8611_v1 = vld [vmem:[#allocation7_spill] sm:$0xff] }
 0x276   :  { %v1737_v62 = vadd.f32 %v1736_v20, %v1735_v12  ;;  %v2570_v8 = vrot.slane %v2569_v48, 2  ;;  %v3203_v2 = vsel %vm1582_vm0, %v3181_v40, 0.0  ;;  %v1913_v58 = vmul.f32 %v6514_v54, %v6450_v32  ;;  %v6555_v20 = vpop.f32.mrf.mxu2 }
 0x277   :  { %v1740_v29 = vsel %vm1582_vm0, %v1538_v34, 0.0  ;;  %v1540_v43 = vmul.f32 %v1284_v39, %v6413_v22  ;;  %v2591_v13 = vrot.slane %v2590_v31, 2  ;;  %3204 = vadd.xlane.f32.xlu2 %v3203_v2  ;;  %v3039_v7 = vsel %vm3015_vm5, %v8608_v63, %v8607_v21  ;;  %8614 = vst [vmem:[#allocation17_spill] sm:$0xff] %v6555_v20  ;;  %v6557_v39 = vpop.xlane.xlu0 %1008 }
 0x278   :  { %v1739_v44 = vadd.f32 %v1738_v26, %v1737_v62  ;;  %v2578_v33 = vadd.f32 %v2577_v38, %v2576_v41  ;;  %v2581_v42 = vsel %vm1582_vm0, %v1913_v58, 0.0  ;;  %v3040_v24 = vsel %vm8557_vm6, %v8609_v16, %v3039_v7  ;;  %v8615_v38 = vld [vmem:[#allocation25_spill] sm:$0xff] }
 0x279   :  { %v4629_v60 = vpop.eup %4628  ;;  %v2556_v49 = vrot.slane %v2555_v3, 2  ;;  %v1539_v27 = vmul.f32 %v1283_v6, %v6409_v52  ;;  %v2582_v22 = vrot.slane %v2581_v42, 4  ;;  %v3041_v61 = vsel %vm8553_vm7, %v8610_v30, %v3040_v24  ;;  %v6562_v6 = vpop.xlane.xlu2 %1006 }
 0x27a   :  { %v6544_v4 = vpop.eup %4630  ;;  %v2571_v25 = vadd.f32 %v2570_v8, %v2569_v48  ;;  %v3248_v28 = vmul.f32 %v4629_v60, %v6475_v14  ;;  %v3145_v41 = vadd.f32 %v3041_v61, %v8611_v1  ;;  %v3047_v12 = vsel %vm8557_vm6, %v8613_v15, %v8612_v53  ;;  %v8618_v60 = vld [vmem:[#allocation27_spill] sm:$0xff] }
 0x27b   :  { %v6552_v34 = vsel %vm1582_vm0, %v1540_v43, 0.0  ;;  %v1286_v52 = vperm.slane %v6536_v57, 0  ;;  %v2592_v19 = vadd.f32 %v2591_v13, %v2590_v31  ;;  %v2583_v40 = vadd.f32 %v2582_v22, %v2581_v42  ;;  %v8616_v13 = vld [vmem:[#allocation9_spill] sm:$0xff] }
 0x27c   :  { %v2579_v48 = vrot.slane %v2578_v33, 1  ;;  %v3268_v55 = vsel %vm1582_vm0, %v3248_v28, 0.0  ;;  %4632 = vtanh.f32 %v3145_v41  ;;  %v3048_v26 = vsel %vm8553_vm7, %v8615_v38, %v3047_v12 }
 0x27d   :  { %v6564_v62 = vadd.f32 %v2556_v49, %v2555_v3  ;;  %v1741_v8 = vadd.f32 %v1740_v29, %v1739_v44  ;;  %v1742_v2 = vsel %vm1582_vm0, %v1539_v27, 0.0  ;;  %3269 = vadd.xlane.f32.xlu1 %v3268_v55  ;;  %v2584_v31 = vrot.slane %v2583_v40, 2  ;;  %v6574_v29 = vpop.xlane.xlu1 %1012  ;;  %v6576_v24 = vpop.f32.mrf.mxu1 }
 0x27e   :  { %v2572_v58 = vrot.slane %v2571_v25, 1  ;;  %v1165_v43 = vrot.slane %v6536_v57, 3  ;;  %v3146_v21 = vadd.f32 %v3048_v26, %v8616_v13  ;;  %v1920_v63 = vmul.f32 %v6557_v39, %v6555_v20  ;;  %8617 = vst [vmem:[#allocation8_spill] sm:$0xff] %v6574_v29 }
 0x27f   :  { %v1542_v7 = vmul.f32 %v1286_v52, %v6452_v37  ;;  %v2593_v42 = vrot.slane %v2592_v19, 1  ;;  %v2585_v16 = vadd.f32 %v2584_v31, %v2583_v40  ;;  %v1919_v3 = vmul.f32 %v6562_v6, %v6555_v20 }
 0x280   :  { %v2580_v44 = vadd.f32 %v2579_v48, %v2578_v33  ;;  %4634 = vtanh.f32 %v3146_v21  ;;  %v3182_v49 = vmul.f32 %v8618_v60, %v6383_v23  ;;  %v2630_v27 = vsel %vm1582_vm0, %v1920_v63, 0.0  ;;  %v8619_v60 = vld [vmem:[#allocation28_spill] sm:$0xff] }
 0x281   :  { %v1163_v22 = vrot.slane %v6536_v57, 1  ;;  %v2586_v30 = vrot.slane %v2585_v16, 1  ;;  %v2631_v37 = vrot.slane %v2630_v27, 4  ;;  %v2623_v61 = vsel %vm1582_vm0, %v1919_v3, 0.0 }
 0x282   :  { %v4633_v28 = vpop.eup %4632  ;;  %v2573_v1 = vadd.f32 %v2572_v58, %v2571_v25  ;;  %v1289_v41 = vperm.slane %v1165_v43, 0  ;;  %v2624_v53 = vrot.slane %v2623_v61, 4  ;;  %v1922_v33 = vmul.f32 %v6574_v29, %v6555_v20 }
 0x283   :  { %v2594_v15 = vadd.f32 %v2593_v42, %v2592_v19  ;;  %v2587_v12 = vadd.f32 %v2586_v30, %v2585_v16  ;;  %v3249_v52 = vmul.f32 %v4633_v28, %v6475_v14  ;;  %v2632_v40 = vadd.f32 %v2631_v37, %v2630_v27  ;;  %v8621_v30 = vld [vmem:[#allocation26_spill] sm:$0xff] }
 0x284   :  { %v3091_v48 = vsel %vm3007_vm1, %v2580_v44, %v2573_v1  ;;  %v3206_v55 = vsel %vm1582_vm0, %v3182_v49, 0.0  ;;  %v2625_v38 = vadd.f32 %v2624_v53, %v2623_v61  ;;  %v2644_v26 = vsel %vm1582_vm0, %v1922_v33, 0.0  ;;  %v6606_v61 = vpop.xlane.xlu0 %1010 }
 0x285   :  { %v1287_v31 = vperm.slane %v1163_v22, 0  ;;  %v3092_v25 = vsel %vm3009_vm2, %v2587_v12, %v3091_v48  ;;  %v3271_v58 = vsel %vm1582_vm0, %v3249_v52, 0.0  ;;  %3207 = vadd.xlane.f32.xlu1 %v3206_v55  ;;  %v2633_v43 = vrot.slane %v2632_v40, 2  ;;  %8622 = vst [vmem:[#allocation15_spill] sm:$0xff] %v6606_v61  ;;  %v8624_v55 = vld [vmem:[#allocation30_spill] sm:$0xff] }
 0x286   :  { %v4635_v13 = vpop.eup %4634  ;;  %v6591_v19 = vadd.f32 %v1742_v2, %v1741_v8  ;;  %v6594_v21 = vsel %vm3011_vm3, %v2594_v15, %v3092_v25  ;;  %3272 = vadd.xlane.f32.xlu0 %v3271_v58  ;;  %v2626_v63 = vrot.slane %v2625_v38, 2  ;;  %v2645_v42 = vrot.slane %v2644_v26, 4  ;;  %v8620_v2 = vld [vmem:[#allocation16_spill] sm:$0xff]  ;;  %v6613_v15 = vpop.f32.mrf.mxu2 }
 0x287   :  { %v3250_v3 = vmul.f32 %v4635_v13, %v6475_v14  ;;  %v2634_v44 = vadd.f32 %v2633_v43, %v2632_v40  ;;  %v3183_v49 = vmul.f32 %v8619_v60, %v6383_v23  ;;  %v6601_v27 = vsel %vm1582_vm0, %v1542_v7, 0.0  ;;  %v1023_v7 = vpop.xlane.xlu1 %1022  ;;  %v6615_v40 = vpop.f32.mrf.mxu1 }
 0x288   :  { %v2627_v22 = vadd.f32 %v2626_v63, %v2625_v38  ;;  %v2646_v8 = vadd.f32 %v2645_v42, %v2644_v26  ;;  %v3054_v37 = vsel %vm8557_vm6, %v8621_v30, %v8620_v2  ;;  %v6609_v28 = vmul.f32 %v1289_v41, %v6455_v56  ;;  %8623 = vst [vmem:[#allocation18_spill] sm:$0xff] %v6615_v40 }
 0x289   :  { %v1543_v1 = vmul.f32 %v1287_v31, %v6457_v47  ;;  %v3274_v53 = vsel %vm1582_vm0, %v3250_v3, 0.0  ;;  %v2635_v33 = vrot.slane %v2634_v44, 1  ;;  %v3184_v48 = vmul.f32 %v6195_v46, %v6383_v23  ;;  %v8625_v47 = vld [vmem:[#allocation12_spill] sm:$0xff]  ;;  %v1025_v3 = vpop.xlane.xlu2 %1024 }
 0x28a   :  { %3275 = vadd.xlane.f32.xlu2 %v3274_v53  ;;  %v2628_v12 = vrot.slane %v2627_v22, 1  ;;  %v2647_v52 = vrot.slane %v2646_v8, 2  ;;  %v3055_v56 = vsel %vm8553_vm7, %v8624_v55, %v3054_v37  ;;  %v3209_v41 = vsel %vm1582_vm0, %v3183_v49, 0.0  ;;  %v8626_v55 = vld [vmem:[#allocation33_spill] sm:$0xff] }
 0x28b   :  { %v3147_v38 = vadd.f32 %v3055_v56, %v8625_v47  ;;  %v1921_v26 = vmul.f32 %v6606_v61, %v6555_v20  ;;  %v1302_v31 = vperm.slane %v6615_v40, 0  ;;  %v2636_v25 = vadd.f32 %v2635_v33, %v2634_v44 }
 0x28c   :  { %v2629_v58 = vadd.f32 %v2628_v12, %v2627_v22  ;;  %v2648_v43 = vadd.f32 %v2647_v52, %v2646_v8  ;;  %v1927_v13 = vmul.f32 %v1023_v7, %v6613_v15  ;;  %v1177_v42 = vrot.slane %v6615_v40, 1 }
 0x28d   :  { %4636 = vtanh.f32 %v3147_v38  ;;  %v2637_v46 = vsel %vm1582_vm0, %v1921_v26, 0.0  ;;  %v1558_v63 = vmul.f32 %v1302_v31, %v1023_v7  ;;  %v6630_v60 = vsel %vm1582_vm0, %v1543_v1, 0.0  ;;  %v8627_v26 = vld [vmem:[#allocation32_spill] sm:$0xff] }
 0x28e   :  { %v1166_v49 = vrot.slane %v6536_v57, 4  ;;  %v3098_v2 = vsel %vm3007_vm1, %v2636_v25, %v2629_v58  ;;  %3210 = vadd.xlane.f32.xlu0 %v3209_v41  ;;  %v2638_v44 = vrot.slane %v2637_v46, 4  ;;  %v1915_v22 = vmul.f32 %v6506_v5, %v6450_v32 }
 0x28f   :  { %v3212_v8 = vsel %vm1582_vm0, %v3184_v48, 0.0  ;;  %v2679_v30 = vsel %vm1582_vm0, %v1927_v13, 0.0  ;;  %v1303_v37 = vperm.slane %v1177_v42, 0  ;;  %v2649_v53 = vrot.slane %v2648_v43, 1 }
 0x290   :  { %v2639_v33 = vadd.f32 %v2638_v44, %v2637_v46  ;;  %v2680_v7 = vrot.slane %v2679_v30, 4  ;;  %v1928_v1 = vmul.f32 %v1025_v3, %v6613_v15  ;;  %v1778_v12 = vsel %vm1582_vm0, %v1558_v63, 0.0  ;;  %v8628_v46 = vld [vmem:[#allocation14_spill] sm:$0xff]  ;;  %v6656_v44 = vpop.xlane.xlu0 %1014 }
 0x291   :  { %v1559_v52 = vmul.f32 %v1303_v37, %v1025_v3  ;;  %v3061_v56 = vsel %vm8557_vm6, %v6173_v17, %v8626_v55  ;;  %v3068_v41 = vsel %vm8557_vm6, %v6170_v35, %v6217_v59  ;;  %8629 = vst [vmem:[#allocation6_spill] sm:$0xff] %v6656_v44  ;;  %v8630_v37 = vld [vmem:[#allocation24_spill] sm:$0xff] }
 0x292   :  { %3213 = vadd.xlane.f32.xlu2 %v3212_v8  ;;  %v2640_v48 = vrot.slane %v2639_v33, 2  ;;  %v2681_v47 = vadd.f32 %v2680_v7, %v2679_v30  ;;  %v2686_v38 = vsel %vm1582_vm0, %v1928_v1, 0.0  ;;  %v3062_v31 = vsel %vm8553_vm7, %v8627_v26, %v3061_v56 }
 0x293   :  { %v4637_v25 = vpop.eup %4636  ;;  %v1779_v58 = vsel %vm1582_vm0, %v1559_v52, 0.0  ;;  %v2687_v13 = vrot.slane %v2686_v38, 4  ;;  %v3148_v63 = vadd.f32 %v3062_v31, %v8628_v46  ;;  %v3069_v17 = vsel %vm8553_vm7, %v6271_v51, %v3068_v41  ;;  %v1027_v46 = vpop.xlane.xlu2 %1026 }
 0x294   :  { %v3251_v42 = vmul.f32 %v4637_v25, %v6475_v14  ;;  %v2641_v35 = vadd.f32 %v2640_v48, %v2639_v33  ;;  %v2682_v59 = vrot.slane %v2681_v47, 2  ;;  %v6654_v3 = vadd.f32 %v1779_v58, %v1778_v12  ;;  %v8631_v25 = vld [vmem:[#allocation34_spill] sm:$0xff] }
 0x295   :  { %v2595_v8 = vsel %vm1582_vm0, %v1915_v22, 0.0  ;;  %v2688_v30 = vadd.f32 %v2687_v13, %v2686_v38  ;;  %4638 = vtanh.f32 %v3148_v63  ;;  %v3149_v7 = vadd.f32 %v3069_v17, %v8630_v37  ;;  %v6666_v22 = vpop.xlane.xlu1 %1028 }
 0x296   :  { %v1916_v1 = vmul.f32 %v6511_v36, %v6450_v32  ;;  %v3277_v52 = vsel %vm1582_vm0, %v3251_v42, 0.0  ;;  %v2642_v51 = vrot.slane %v2641_v35, 1  ;;  %v2683_v55 = vadd.f32 %v2682_v59, %v2681_v47 }
 0x297   :  { %3278 = vadd.xlane.f32.xlu1 %v3277_v52  ;;  %v2689_v12 = vrot.slane %v2688_v30, 2  ;;  %4640 = vtanh.f32 %v3149_v7  ;;  %v1923_v56 = vmul.f32 %v6656_v44, %v6555_v20  ;;  %v2596_v41 = vrot.slane %v2595_v8, 4 }
 0x298   :  { %v2650_v48 = vadd.f32 %v2649_v53, %v2648_v43  ;;  %v2643_v38 = vadd.f32 %v2642_v51, %v2641_v35  ;;  %v2684_v26 = vrot.slane %v2683_v55, 1  ;;  %v3185_v58 = vmul.f32 %v8631_v25, %v6383_v23 }
 0x299   :  { %v2690_v31 = vadd.f32 %v2689_v12, %v2688_v30  ;;  %v2651_v47 = vsel %vm1582_vm0, %v1923_v56, 0.0  ;;  %v1178_v13 = vrot.slane %v6615_v40, 2  ;;  %v2602_v63 = vsel %vm1582_vm0, %v1916_v1, 0.0 }
 0x29a   :  { %v3099_v17 = vsel %vm3009_vm2, %v2643_v38, %v3098_v2  ;;  %v2652_v42 = vrot.slane %v2651_v47, 4  ;;  %v1930_v59 = vmul.f32 %v6666_v22, %v6613_v15  ;;  %v1164_v53 = vrot.slane %v6536_v57, 2 }
 0x29b   :  { %v4639_v43 = vpop.eup %4638  ;;  %v2685_v35 = vadd.f32 %v2684_v26, %v2683_v55  ;;  %v2691_v30 = vrot.slane %v2690_v31, 1  ;;  %v3100_v37 = vsel %vm3011_vm3, %v2650_v48, %v3099_v17  ;;  %v6680_v7 = vperm.slane %v1166_v49, 0 }
 0x29c   :  { %v2597_v52 = vadd.f32 %v2596_v41, %v2595_v8  ;;  %v3252_v1 = vmul.f32 %v4639_v43, %v6475_v14  ;;  %v2653_v51 = vadd.f32 %v2652_v42, %v2651_v47  ;;  %v2603_v12 = vrot.slane %v2602_v63, 4  ;;  %v8633_v42 = vld [vmem:[#allocation38_spill] sm:$0xff] }
 0x29d   :  { %v4641_v2 = vpop.eup %4640  ;;  %v2692_v56 = vadd.f32 %v2691_v30, %v2690_v31  ;;  %v3215_v38 = vsel %vm1582_vm0, %v3185_v58, 0.0  ;;  %v1304_v25 = vperm.slane %v1178_v13, 0  ;;  %v2700_v48 = vsel %vm1582_vm0, %v1930_v59, 0.0  ;;  %v8632_v13 = vld [vmem:[#allocation29_spill] sm:$0xff] }
 0x29e   :  { %v3280_v33 = vsel %vm1582_vm0, %v3252_v1, 0.0  ;;  %v3253_v55 = vmul.f32 %v4641_v2, %v6475_v14  ;;  %v2654_v26 = vrot.slane %v2653_v51, 2  ;;  %v1288_v17 = vperm.slane %v1164_v53, 0 }
 0x29f   :  { %v6688_v49 = vsel %vm3007_vm1, %v2692_v56, %v2685_v35  ;;  %3281 = vadd.xlane.f32.xlu0 %v3280_v33  ;;  %3216 = vadd.xlane.f32.xlu1 %v3215_v38  ;;  %v1560_v8 = vmul.f32 %v1304_v25, %v1027_v46  ;;  %v1929_v41 = vmul.f32 %v1027_v46, %v6613_v15  ;;  %v2598_v31 = vrot.slane %v2597_v52, 2  ;;  %v6696_v35 = vpop.f32.mrf.mxu1  ;;  %v8634_v33 = vld [vmem:[#allocation35_spill] sm:$0xff]  ;;  %v6706_v38 = vpop.f32.mrf.mxu2 }
 0x2a0   :  { %v3283_v58 = vsel %vm1582_vm0, %v3253_v55, 0.0  ;;  %v2655_v47 = vadd.f32 %v2654_v26, %v2653_v51  ;;  %v2855_v43 = vadd.f32 %v8633_v42, %v8632_v13  ;;  %v2701_v30 = vrot.slane %v2700_v48, 4  ;;  %v1039_v25 = vpop.xlane.xlu0 %1038  ;;  %v8636_v42 = vld [vmem:[#allocation37_spill] sm:$0xff] }
 0x2a1   :  { %3284 = vadd.xlane.f32.xlu2 %v3283_v58  ;;  %v1781_v59 = vsel %vm1582_vm0, %v1560_v8, 0.0  ;;  %v2693_v53 = vsel %vm1582_vm0, %v1929_v41, 0.0  ;;  %v3074_v1 = vsel %vm3015_vm5, %v8634_v33, %v6344_v9  ;;  %v3187_v56 = vmul.f32 %v6544_v4, %v6383_v23  ;;  %v8635_v8 = vld [vmem:[#allocation36_spill] sm:$0xff]  ;;  %v6711_v58 = vpop.xlane.xlu2 %1042  ;;  %v8637_v33 = vld [vmem:[#allocation31_spill] sm:$0xff] }
 0x2a2   :  { %v2656_v46 = vrot.slane %v2655_v47, 1  ;;  %v6702_v2 = vadd.f32 %v1781_v59, %v6654_v3  ;;  %v2694_v51 = vrot.slane %v2693_v53, 4  ;;  %v2604_v55 = vadd.f32 %v2603_v12, %v2602_v63 }
 0x2a3   :  { %v1544_v26 = vmul.f32 %v1288_v17, %v6514_v54  ;;  %4642 = vtanh.f32 %v2855_v43  ;;  %v3075_v41 = vsel %vm8557_vm6, %v8635_v8, %v3074_v1  ;;  %v6713_v9 = vadd.f32 %v2598_v31, %v2597_v52  ;;  %v1041_v31 = vpop.xlane.xlu1 %1040 }
 0x2a4   :  { %v2657_v3 = vadd.f32 %v2656_v46, %v2655_v47  ;;  %v2695_v13 = vadd.f32 %v2694_v51, %v2693_v53  ;;  %v3076_v59 = vsel %vm8553_vm7, %v8636_v42, %v3075_v41  ;;  %v2702_v4 = vadd.f32 %v2701_v30, %v2700_v48 }
 0x2a5   :  { %v3150_v16 = vadd.f32 %v3076_v59, %v8637_v33  ;;  %v1310_v63 = vperm.slane %v6696_v35, 0  ;;  %v1935_v54 = vmul.f32 %v1039_v25, %v6706_v38  ;;  %v3221_v43 = vsel %vm1582_vm0, %v3187_v56, 0.0 }
 0x2a6   :  { %v6721_v12 = vsel %vm3013_vm4, %v2657_v3, %v3100_v37  ;;  %v2696_v17 = vrot.slane %v2695_v13, 2  ;;  %v1937_v52 = vmul.f32 %v6711_v58, %v6706_v38  ;;  %v2605_v47 = vrot.slane %v2604_v55, 2 }
 0x2a7   :  { %8638 = vst [vmem:[#allocation23_spill] sm:$0xff] %v6721_v12  ;;  %v6727_v53 = vsel %vm1582_vm0, %v1544_v26, 0.0  ;;  %4644 = vtanh.f32 %v3150_v16  ;;  %3222 = vadd.xlane.f32.xlu1 %v3221_v43  ;;  %v2735_v48 = vsel %vm1582_vm0, %v1935_v54, 0.0  ;;  %v1184_v46 = vrot.slane %v6696_v35, 1  ;;  %v6740_v12 = vpop.f32.mrf.mxu1 }
 0x2a8   :  { %v2697_v30 = vadd.f32 %v2696_v17, %v2695_v13  ;;  %v2736_v1 = vrot.slane %v2735_v48, 4  ;;  %v2749_v37 = vsel %vm1582_vm0, %v1937_v52, 0.0  ;;  %v2703_v56 = vrot.slane %v2702_v4, 2 }
 0x2a9   :  { %v4643_v51 = vpop.eup %4642  ;;  %v1566_v8 = vmul.f32 %v1310_v63, %v1039_v25  ;;  %v1936_v41 = vmul.f32 %v1041_v31, %v6706_v38  ;;  %v3083_v26 = vsel %vm8553_vm7, %v6519_v45, %v6525_v50  ;;  %v1311_v59 = vperm.slane %v1184_v46, 0 }
 0x2aa   :  { %v2698_v3 = vrot.slane %v2697_v30, 1  ;;  %v3186_v16 = vmul.f32 %v4643_v51, %v6383_v23  ;;  %v2737_v42 = vadd.f32 %v2736_v1, %v2735_v48  ;;  %v2606_v13 = vadd.f32 %v2605_v47, %v2604_v55  ;;  %v6743_v55 = vpop.f32.mrf.mxu2  ;;  %v1055_v47 = vpop.xlane.xlu0 %1054 }
 0x2ab   :  { %v2750_v33 = vrot.slane %v2749_v37, 4  ;;  %v2742_v54 = vsel %vm1582_vm0, %v1936_v41, 0.0  ;;  %v3151_v17 = vadd.f32 %v3083_v26, %v6258_v10  ;;  %v1567_v52 = vmul.f32 %v1311_v59, %v1041_v31  ;;  %v1057_v59 = vpop.xlane.xlu1 %1056 }
 0x2ac   :  { %v2699_v43 = vadd.f32 %v2698_v3, %v2697_v30  ;;  %v3218_v25 = vsel %vm1582_vm0, %v3186_v16, 0.0  ;;  %v2738_v63 = vrot.slane %v2737_v42, 2  ;;  %v1179_v45 = vrot.slane %v6615_v40, 3 }
 0x2ad   :  { %v4645_v20 = vpop.eup %4644  ;;  %v2704_v50 = vadd.f32 %v2703_v56, %v2702_v4  ;;  %3219 = vadd.xlane.f32.xlu0 %v3218_v25  ;;  %v2743_v23 = vrot.slane %v2742_v54, 4  ;;  %4646 = vtanh.f32 %v3151_v17  ;;  %v1793_v31 = vsel %vm1582_vm0, %v1566_v8, 0.0  ;;  %v989_v17 = vpop.xlane.xlu2 %988 }
 0x2ae   :  { %v6747_v10 = vsel %vm3009_vm2, %v2699_v43, %v6688_v49  ;;  %v3254_v48 = vmul.f32 %v4645_v20, %v6475_v14  ;;  %v1794_v30 = vsel %vm1582_vm0, %v1567_v52, 0.0  ;;  %v2739_v1 = vadd.f32 %v2738_v63, %v2737_v42 }
 0x2af   :  { %v2751_v46 = vadd.f32 %v2750_v33, %v2749_v37  ;;  %v6752_v51 = vadd.f32 %v1794_v30, %v1793_v31  ;;  %v2744_v4 = vadd.f32 %v2743_v23, %v2742_v54  ;;  %v1318_v41 = vperm.slane %v6740_v12, 0 }
 0x2b0   :  { %v3286_v56 = vsel %vm1582_vm0, %v3254_v48, 0.0  ;;  %v1943_v26 = vmul.f32 %v1055_v47, %v6743_v55  ;;  %v1162_v49 = vrot.slane %v6422_v11, 7  ;;  %v2600_v3 = vrot.slane %v6713_v9, 1 }
 0x2b1   :  { %v2607_v20 = vrot.slane %v2606_v13, 1  ;;  %v1305_v16 = vperm.slane %v1179_v45, 0  ;;  %3287 = vadd.xlane.f32.xlu2 %v3286_v56  ;;  %v2745_v8 = vrot.slane %v2744_v4, 2  ;;  %v2705_v42 = vrot.slane %v2704_v50, 1 }
 0x2b2   :  { %v1185_v37 = vrot.slane %v6696_v35, 2  ;;  %v2791_v33 = vsel %vm1582_vm0, %v1943_v26, 0.0  ;;  %v1285_v54 = vperm.slane %v1162_v49, 0  ;;  %v2740_v25 = vrot.slane %v2739_v1, 1 }
 0x2b3   :  { %v4647_v43 = vpop.eup %4646  ;;  %v2746_v63 = vadd.f32 %v2745_v8, %v2744_v4  ;;  %v2792_v52 = vrot.slane %v2791_v33, 4  ;;  %v1191_v23 = vrot.slane %v6740_v12, 1  ;;  %v2752_v48 = vrot.slane %v2751_v46, 2 }
 0x2b4   :  { %v3255_v31 = vmul.f32 %v4647_v43, %v6475_v14  ;;  %v1574_v45 = vmul.f32 %v1318_v41, %v1055_v47  ;;  %v1944_v30 = vmul.f32 %v1057_v59, %v6743_v55  ;;  %v1541_v11 = vmul.f32 %v1285_v54, %v989_v17 }
 0x2b5   :  { %v2747_v56 = vrot.slane %v2746_v63, 1  ;;  %v2793_v40 = vadd.f32 %v2792_v52, %v2791_v33  ;;  %v1319_v44 = vperm.slane %v1191_v23, 0  ;;  %v2601_v26 = vadd.f32 %v2600_v3, %v6713_v9  ;;  %v6771_v3 = vpop.xlane.xlu0 %1002 }
 0x2b6   :  { %v1561_v49 = vmul.f32 %v1305_v16, %v6666_v22  ;;  %v3289_v18 = vsel %vm1582_vm0, %v3255_v31, 0.0  ;;  %v2798_v4 = vsel %vm1582_vm0, %v1944_v30, 0.0  ;;  %v2741_v8 = vadd.f32 %v2740_v25, %v2739_v1 }
 0x2b7   :  { %v1312_v61 = vperm.slane %v1185_v37, 0  ;;  %v2748_v29 = vadd.f32 %v2747_v56, %v2746_v63  ;;  %3290 = vadd.xlane.f32.xlu0 %v3289_v18  ;;  %v2794_v14 = vrot.slane %v2793_v40, 2  ;;  %v2608_v47 = vadd.f32 %v2607_v20, %v2606_v13 }
 0x2b8   :  { %v2753_v41 = vadd.f32 %v2752_v48, %v2751_v46  ;;  %v1575_v43 = vmul.f32 %v1319_v44, %v1057_v59  ;;  %v2799_v32 = vrot.slane %v2798_v4, 4  ;;  %v2706_v33 = vadd.f32 %v2705_v42, %v2704_v50 }
 0x2b9   :  { %v3112_v54 = vsel %vm3007_vm1, %v2748_v29, %v2741_v8  ;;  %v1808_v9 = vsel %vm1582_vm0, %v1574_v45, 0.0  ;;  %v1746_v22 = vsel %vm1582_vm0, %v1541_v11, 0.0  ;;  %v2795_v16 = vadd.f32 %v2794_v14, %v2793_v40 }
 0x2ba   :  { %v1809_v1 = vsel %vm1582_vm0, %v1575_v43, 0.0  ;;  %v2800_v37 = vadd.f32 %v2799_v32, %v2798_v4  ;;  %v3094_v18 = vsel %vm3013_vm4, %v2601_v26, %v6594_v21  ;;  %v1783_v13 = vsel %vm1582_vm0, %v1561_v49, 0.0  ;;  %v6786_v32 = vpop.xlane.xlu2 %1030 }
 0x2bb   :  { %v1568_v44 = vmul.f32 %v1312_v61, %v6711_v58  ;;  %v1745_v29 = vadd.f32 %v6552_v34, %v6591_v19  ;;  %v6780_v50 = vadd.f32 %v1809_v1, %v1808_v9  ;;  %v2754_v46 = vrot.slane %v2753_v41, 1 }
 0x2bc   :  { %v1910_v11 = vmul.f32 %v989_v17, %v6322_v0  ;;  %v2801_v20 = vrot.slane %v2800_v37, 2  ;;  %v6784_v40 = vsel %vm3015_vm5, %v2608_v47, %v3094_v18  ;;  %v8639_v21 = vrot.slane %v6564_v62, 1 }
 0x2bd   :  { %v1750_v61 = vadd.f32 %v6630_v60, %v6601_v27  ;;  %v1747_v34 = vadd.f32 %v1746_v22, %v1745_v29  ;;  %v6796_v19 = vadd.f32 %v1783_v13, %v6702_v2  ;;  %v1753_v58 = vsel %vm1582_vm0, %v6609_v28, 0.0  ;;  %v6810_v2 = vpop.xlane.xlu1 %1016  ;;  %v1045_v47 = vpop.xlane.xlu0 %1044 }
 0x2be   :  { %v6791_v59 = vadd.f32 %v8639_v21, %v6564_v62  ;;  %v2796_v42 = vrot.slane %v2795_v16, 1  ;;  %v2802_v17 = vadd.f32 %v2801_v20, %v2800_v37  ;;  %v6802_v25 = vsel %vm3011_vm3, %v2706_v33, %v6747_v10 }
 0x2bf   :  { %v1546_v62 = vmul.f32 %v6680_v7, %v6506_v5  ;;  %v8640_v63 = vrot.slane %v6536_v57, 5  ;;  %v1752_v27 = vadd.f32 %v6727_v53, %v1750_v61  ;;  %v1796_v60 = vsel %vm1582_vm0, %v1568_v44, 0.0 }
 0x2c0   :  { %v2755_v23 = vadd.f32 %v2754_v46, %v2753_v41  ;;  %v2560_v28 = vsel %vm1582_vm0, %v1910_v11, 0.0  ;;  %v2803_v48 = vrot.slane %v2802_v17, 1  ;;  %v1931_v10 = vmul.f32 %v6786_v32, %v6613_v15 }
 0x2c1   :  { %v1291_v52 = vperm.slane %v8640_v63, 0  ;;  %v2857_v31 = vadd.f32 %v1747_v34, %v6322_v0  ;;  %v1168_v5 = vrot.slane %v6536_v57, 6  ;;  %v1186_v7 = vrot.slane %v6696_v35, 3 }
 0x2c2   :  { %v1797_v45 = vadd.f32 %v1796_v60, %v6752_v51  ;;  %v1170_v53 = vrot.slane %v6576_v24, 1  ;;  %v2797_v30 = vadd.f32 %v2796_v42, %v2795_v16  ;;  %v2804_v56 = vadd.f32 %v2803_v48, %v2802_v17  ;;  %v1005_v18 = vpop.xlane.xlu2 %1004 }
 0x2c3   :  { %v2707_v26 = vsel %vm1582_vm0, %v1931_v10, 0.0  ;;  %v1547_v49 = vmul.f32 %v1291_v52, %v6511_v36  ;;  %v1294_v4 = vperm.slane %v6576_v24, 0  ;;  %v2561_v8 = vrot.slane %v2560_v28, 4 }
 0x2c4   :  { %v2708_v14 = vrot.slane %v2707_v26, 4  ;;  %v1755_v0 = vsel %vm1582_vm0, %v1546_v62, 0.0  ;;  %v1754_v41 = vadd.f32 %v1753_v58, %v1752_v27  ;;  %v6825_v43 = vsel %vm3007_vm1, %v2804_v56, %v2797_v30 }
 0x2c5   :  { %v1313_v51 = vperm.slane %v1186_v7, 0  ;;  %4648 = vtanh.f32 %v2857_v31  ;;  %v1292_v33 = vperm.slane %v1168_v5, 0  ;;  %v6828_v22 = vsel %vm3009_vm2, %v2755_v23, %v3112_v54  ;;  %v1059_v17 = vpop.xlane.xlu1 %1058 }
 0x2c6   :  { %v2709_v9 = vadd.f32 %v2708_v14, %v2707_v26  ;;  %v1295_v16 = vperm.slane %v1170_v53, 0  ;;  %v1938_v1 = vmul.f32 %v1045_v47, %v6706_v38  ;;  %v1169_v37 = vrot.slane %v6536_v57, 7 }
 0x2c7   :  { %v1569_v36 = vmul.f32 %v1313_v51, %v1045_v47  ;;  %v1550_v13 = vmul.f32 %v1294_v4, %v6562_v6  ;;  %v1172_v44 = vrot.slane %v6576_v24, 3  ;;  %v2562_v29 = vadd.f32 %v2561_v8, %v2560_v28  ;;  %v6852_v4 = vld [vmem:[%s8530_s4] ss:$0 sm:$0xff] }
 0x2c8   :  { %v2710_v46 = vrot.slane %v2709_v9, 2  ;;  %v1171_v11 = vrot.slane %v6576_v24, 2  ;;  %v2756_v54 = vsel %vm1582_vm0, %v1938_v1, 0.0  ;;  %v1293_v21 = vperm.slane %v1169_v37, 0  ;;  %v8641_v47 = vld [vmem:[#allocation11_spill] sm:$0xff] }
 0x2c9   :  { %v1798_v20 = vsel %vm1582_vm0, %v1569_v36, 0.0  ;;  %v1756_v61 = vadd.f32 %v1755_v0, %v1754_v41  ;;  %v1548_v34 = vmul.f32 %v1292_v33, %v6771_v3  ;;  %v1757_v6 = vsel %vm1582_vm0, %v1547_v49, 0.0 }
 0x2ca   :  { %v2711_v58 = vadd.f32 %v2710_v46, %v2709_v9  ;;  %v6838_v42 = vadd.f32 %v1798_v20, %v1797_v45  ;;  %v1551_v62 = vmul.f32 %v1295_v16, %v6557_v39  ;;  %v2757_v63 = vrot.slane %v2756_v54, 4  ;;  %v1047_v1 = vpop.xlane.xlu2 %1046  ;;  %v8642_v20 = vld [vmem:[#allocation8_spill] sm:$0xff] }
 0x2cb   :  { %v1192_v52 = vrot.slane %v6740_v12, 2  ;;  %v4649_v27 = vpop.eup %4648  ;;  %v1297_v60 = vperm.slane %v1172_v44, 0  ;;  %v2563_v23 = vrot.slane %v2562_v29, 2  ;;  %v1549_v48 = vmul.f32 %v1293_v21, %v1005_v18 }
 0x2cc   :  { %v2712_v28 = vrot.slane %v2711_v58, 1  ;;  %v6844_v10 = vsel %vm1582_vm0, %v1550_v13, 0.0  ;;  %v2758_v31 = vadd.f32 %v2757_v63, %v2756_v54  ;;  %v1945_v7 = vmul.f32 %v1059_v17, %v6743_v55  ;;  %v8643_v63 = vld [vmem:[#allocation15_spill] sm:$0xff] }
 0x2cd   :  { %v1320_v5 = vperm.slane %v1192_v52, 0  ;;  %v1296_v45 = vperm.slane %v1171_v11, 0  ;;  %v1758_v53 = vadd.f32 %v1757_v6, %v1756_v61  ;;  %v1759_v30 = vsel %vm1582_vm0, %v1548_v34, 0.0 }
 0x2ce   :  { %v2713_v39 = vadd.f32 %v2712_v28, %v2711_v58  ;;  %v2759_v56 = vrot.slane %v2758_v31, 2  ;;  %v2805_v49 = vsel %vm1582_vm0, %v1945_v7, 0.0  ;;  %v3188_v8 = vmul.f32 %v6852_v4, %v4649_v27 }
 0x2cf   :  { %v1576_v26 = vmul.f32 %v1320_v5, %v1059_v17  ;;  %v2564_v14 = vadd.f32 %v2563_v23, %v2562_v29  ;;  %v1917_v0 = vmul.f32 %v6771_v3, %v8641_v47  ;;  %v1761_v51 = vsel %vm1582_vm0, %v1549_v48, 0.0 }
 0x2d0   :  { %v6859_v41 = vsel %vm3013_vm4, %v2713_v39, %v6802_v25  ;;  %v2760_v33 = vadd.f32 %v2759_v56, %v2758_v31  ;;  %v2806_v16 = vrot.slane %v2805_v49, 4  ;;  %v3224_v36 = vsel %vm1582_vm0, %v3188_v8, 0.0 }
 0x2d1   :  { %v1811_v9 = vsel %vm1582_vm0, %v1576_v26, 0.0  ;;  %v1173_v37 = vrot.slane %v6576_v24, 4  ;;  %v1760_v13 = vadd.f32 %v1759_v30, %v1758_v53  ;;  %v1918_v44 = vmul.f32 %v1005_v18, %v8641_v47  ;;  %3225 = vadd.xlane.f32.xlu1 %v3224_v36 }
 0x2d2   :  { %v6867_v3 = vadd.f32 %v1811_v9, %v6780_v50  ;;  %v1764_v25 = vsel %vm1582_vm0, %v1551_v62, 0.0  ;;  %v2761_v29 = vrot.slane %v2760_v33, 1  ;;  %v2807_v46 = vadd.f32 %v2806_v16, %v2805_v49  ;;  %v6874_v50 = vpop.xlane.xlu1 %1032 }
 0x2d3   :  { %v1187_v11 = vrot.slane %v6696_v35, 4  ;;  %v1553_v54 = vmul.f32 %v1297_v60, %v8642_v20  ;;  %v2565_v21 = vrot.slane %v2564_v14, 1  ;;  %v1762_v61 = vadd.f32 %v1761_v51, %v1760_v13 }
 0x2d4   :  { %v1939_v34 = vmul.f32 %v1047_v1, %v6706_v38  ;;  %v2609_v58 = vsel %vm1582_vm0, %v1917_v0, 0.0  ;;  %v2762_v17 = vadd.f32 %v2761_v29, %v2760_v33  ;;  %v2808_v18 = vrot.slane %v2807_v46, 2  ;;  %v8644_v33 = vld [vmem:[#allocation5_spill] sm:$0xff] }
 0x2d5   :  { %v1314_v6 = vperm.slane %v1187_v11, 0  ;;  %v1552_v52 = vmul.f32 %v1296_v45, %v8643_v63  ;;  %v1298_v62 = vperm.slane %v1173_v37, 0  ;;  %v2616_v27 = vsel %vm1582_vm0, %v1918_v44, 0.0  ;;  %v6896_v37 = vpop.xlane.xlu2 %1034  ;;  %v8645_v11 = vld [vmem:[#allocation6_spill] sm:$0xff]  ;;  %v1019_v63 = vpop.xlane.xlu0 %1018 }
 0x2d6   :  { %v2763_v23 = vsel %vm1582_vm0, %v1939_v34, 0.0  ;;  %v3114_v60 = vsel %vm3011_vm3, %v2762_v17, %v6828_v22  ;;  %v2809_v28 = vadd.f32 %v2808_v18, %v2807_v46  ;;  %v2566_v5 = vadd.f32 %v2565_v21, %v2564_v14  ;;  %v8646_v21 = vld [vmem:[#allocation39_spill] sm:$0xff] }
 0x2d7   :  { %v1570_v48 = vmul.f32 %v1314_v6, %v1047_v1  ;;  %v2764_v31 = vrot.slane %v2763_v23, 4  ;;  %v2610_v7 = vrot.slane %v2609_v58, 4  ;;  %v2858_v53 = vadd.f32 %v1762_v61, %v8641_v47 }
 0x2d8   :  { %v1932_v30 = vmul.f32 %v6874_v50, %v6613_v15  ;;  %v1174_v45 = vrot.slane %v6576_v24, 5  ;;  %v2810_v39 = vrot.slane %v2809_v28, 1  ;;  %v2617_v49 = vrot.slane %v2616_v27, 4 }
 0x2d9   :  { %v1800_v56 = vsel %vm1582_vm0, %v1570_v48, 0.0  ;;  %v2765_v26 = vadd.f32 %v2764_v31, %v2763_v23  ;;  %v1175_v8 = vrot.slane %v6576_v24, 6  ;;  %v3089_v9 = vsel %vm8557_vm6, %v6791_v59, %v8644_v33 }
 0x2da   :  { %v6888_v22 = vadd.f32 %v1800_v56, %v6838_v42  ;;  %v2714_v14 = vsel %vm1582_vm0, %v1932_v30, 0.0  ;;  %v2811_v0 = vadd.f32 %v2810_v39, %v2809_v28  ;;  %v1766_v16 = vsel %vm1582_vm0, %v1552_v52, 0.0  ;;  %v1021_v30 = vpop.xlane.xlu1 %1020 }
 0x2db   :  { %v2766_v51 = vrot.slane %v2765_v26, 2  ;;  %v2715_v47 = vrot.slane %v2714_v14, 4  ;;  %v2611_v36 = vadd.f32 %v2610_v7, %v2609_v58  ;;  %4650 = vtanh.f32 %v2858_v53 }
 0x2dc   :  { %v3090_v1 = vsel %vm8553_vm7, %v2566_v5, %v3089_v9  ;;  %v1299_v13 = vperm.slane %v1174_v45, 0  ;;  %v6900_v42 = vsel %vm3009_vm2, %v2811_v0, %v6825_v43  ;;  %v1765_v46 = vadd.f32 %v1764_v25, %v6844_v10 }
 0x2dd   :  { %v2767_v44 = vadd.f32 %v2766_v51, %v2765_v26  ;;  %v2716_v29 = vadd.f32 %v2715_v47, %v2714_v14  ;;  %v1554_v20 = vmul.f32 %v1298_v62, %v8645_v11  ;;  %v2618_v59 = vadd.f32 %v2617_v49, %v2616_v27 }
 0x2de   :  { %v3152_v61 = vadd.f32 %v3090_v1, %v8646_v21  ;;  %v1300_v34 = vperm.slane %v1175_v8, 0  ;;  %v1933_v18 = vmul.f32 %v6896_v37, %v6613_v15  ;;  %v1767_v6 = vadd.f32 %v1766_v16, %v1765_v46  ;;  %v6923_v16 = vld [vmem:[%s8531_s5] ss:$0 sm:$0xff] }
 0x2df   :  { %v2768_v58 = vrot.slane %v2767_v44, 1  ;;  %v2717_v17 = vrot.slane %v2716_v29, 2  ;;  %v2612_v43 = vrot.slane %v2611_v36, 2  ;;  %v1555_v52 = vmul.f32 %v1299_v13, %v6810_v2 }
 0x2e0   :  { %4652 = vtanh.f32 %v3152_v61  ;;  %v1768_v25 = vsel %vm1582_vm0, %v1553_v54, 0.0  ;;  %v2619_v62 = vrot.slane %v2618_v59, 2  ;;  %v2721_v27 = vsel %vm1582_vm0, %v1933_v18, 0.0 }
 0x2e1   :  { %v2769_v23 = vadd.f32 %v2768_v58, %v2767_v44  ;;  %v2718_v28 = vadd.f32 %v2717_v17, %v2716_v29  ;;  %v4651_v10 = vpop.eup %4650  ;;  %v1176_v48 = vrot.slane %v6576_v24, 7  ;;  %v1770_v31 = vsel %vm1582_vm0, %v1554_v20, 0.0 }
 0x2e2   :  { %v1556_v5 = vmul.f32 %v1300_v34, %v1019_v63  ;;  %v1769_v45 = vadd.f32 %v1768_v25, %v1767_v6  ;;  %v2722_v39 = vrot.slane %v2721_v27, 4  ;;  %v2613_v26 = vadd.f32 %v2612_v43, %v2611_v36  ;;  %v8647_v6 = vld [vmem:[#allocation17_spill] sm:$0xff] }
 0x2e3   :  { %v6913_v7 = vsel %vm3013_vm4, %v2769_v23, %v3114_v60  ;;  %v2719_v53 = vrot.slane %v2718_v28, 1  ;;  %v1301_v56 = vperm.slane %v1176_v48, 0  ;;  %v1772_v49 = vsel %vm1582_vm0, %v1555_v52, 0.0 }
 0x2e4   :  { %v3189_v8 = vmul.f32 %v6852_v4, %v4651_v10  ;;  %v1771_v0 = vadd.f32 %v1770_v31, %v1769_v45  ;;  %v2620_v51 = vadd.f32 %v2619_v62, %v2618_v59  ;;  %v2723_v47 = vadd.f32 %v2722_v39, %v2721_v27  ;;  %v8648_v10 = vld [vmem:[#allocation18_spill] sm:$0xff] }
 0x2e5   :  { %v2720_v54 = vadd.f32 %v2719_v53, %v2718_v28  ;;  %v1557_v33 = vmul.f32 %v1301_v56, %v1021_v30  ;;  %v1774_v9 = vsel %vm1582_vm0, %v1556_v5, 0.0  ;;  %v2614_v29 = vrot.slane %v2613_v26, 1 }
 0x2e6   :  { %v4653_v14 = vpop.eup %4652  ;;  %v1773_v1 = vadd.f32 %v1772_v49, %v1771_v0  ;;  %v2724_v13 = vrot.slane %v2723_v47, 2  ;;  %v3227_v44 = vsel %vm1582_vm0, %v3189_v8, 0.0  ;;  %v2621_v20 = vrot.slane %v2620_v51, 1 }
 0x2e7   :  { %v3109_v60 = vsel %vm3015_vm5, %v2720_v54, %v6859_v41  ;;  %v3256_v36 = vmul.f32 %v6923_v16, %v4653_v14  ;;  %v1776_v11 = vsel %vm1582_vm0, %v1557_v33, 0.0  ;;  %3228 = vadd.xlane.f32.xlu0 %v3227_v44  ;;  %v2615_v34 = vadd.f32 %v2614_v29, %v2613_v26 }
 0x2e8   :  { %v1775_v59 = vadd.f32 %v1774_v9, %v1773_v1  ;;  %v2725_v41 = vadd.f32 %v2724_v13, %v2723_v47  ;;  %v2622_v58 = vadd.f32 %v2621_v20, %v2620_v51  ;;  %v1180_v25 = vrot.slane %v8648_v10, 4  ;;  %v6954_v47 = vpop.xlane.xlu2 %1036 }
 0x2e9   :  { %v3292_v46 = vsel %vm1582_vm0, %v3256_v36, 0.0  ;;  %v3096_v52 = vsel %vm8557_vm6, %v2615_v34, %v6784_v40  ;;  %v1181_v62 = vrot.slane %v8648_v10, 5  ;;  %v1182_v31 = vrot.slane %v8648_v10, 6 }
 0x2ea   :  { %3293 = vadd.xlane.f32.xlu2 %v3292_v46  ;;  %v2726_v21 = vrot.slane %v2725_v41, 1  ;;  %v1777_v61 = vadd.f32 %v1776_v11, %v1775_v59  ;;  %v3097_v23 = vsel %vm8553_vm7, %v2622_v58, %v3096_v52  ;;  %v1306_v48 = vperm.slane %v1180_v25, 0 }
 0x2eb   :  { %v3153_v28 = vadd.f32 %v3097_v23, %v6536_v57  ;;  %v1924_v5 = vmul.f32 %v6810_v2, %v8647_v6  ;;  %v1925_v40 = vmul.f32 %v1019_v63, %v8647_v6  ;;  %v1307_v45 = vperm.slane %v1181_v62, 0 }
 0x2ec   :  { %v2727_v17 = vadd.f32 %v2726_v21, %v2725_v41  ;;  %v2859_v43 = vadd.f32 %v1777_v61, %v8647_v6  ;;  %v1183_v39 = vrot.slane %v8648_v10, 7  ;;  %v1926_v57 = vmul.f32 %v1021_v30, %v8647_v6 }
 0x2ed   :  { %v1562_v49 = vmul.f32 %v1306_v48, %v6786_v32  ;;  %v1308_v54 = vperm.slane %v1182_v31, 0  ;;  %v2658_v8 = vsel %vm1582_vm0, %v1924_v5, 0.0  ;;  %v2665_v2 = vsel %vm1582_vm0, %v1925_v40, 0.0  ;;  %v8649_v48 = vld [vmem:[#allocation23_spill] sm:$0xff] }
 0x2ee   :  { %v6930_v18 = vsel %vm8557_vm6, %v2727_v17, %v3109_v60  ;;  %4654 = vtanh.f32 %v2859_v43  ;;  %v1563_v63 = vmul.f32 %v1307_v45, %v6874_v50  ;;  %v1309_v0 = vperm.slane %v1183_v39, 0 }
 0x2ef   :  { %4656 = vtanh.f32 %v3153_v28  ;;  %v2672_v30 = vsel %vm1582_vm0, %v1926_v57, 0.0  ;;  %v1785_v32 = vsel %vm1582_vm0, %v1562_v49, 0.0  ;;  %v2659_v33 = vrot.slane %v2658_v8, 4 }
 0x2f0   :  { %v1564_v9 = vmul.f32 %v1308_v54, %v6896_v37  ;;  %v2666_v60 = vrot.slane %v2665_v2, 4  ;;  %v1787_v36 = vsel %vm1582_vm0, %v1563_v63, 0.0  ;;  %v2673_v1 = vrot.slane %v2672_v30, 4 }
 0x2f1   :  { %v1565_v50 = vmul.f32 %v1309_v0, %v6954_v47  ;;  %v1786_v13 = vadd.f32 %v1785_v32, %v6796_v19  ;;  %v2660_v44 = vadd.f32 %v2659_v33, %v2658_v8  ;;  %v6973_v8 = vpop.xlane.xlu1 %1062 }
 0x2f2   :  { %v1789_v29 = vsel %vm1582_vm0, %v1564_v9, 0.0  ;;  %v2667_v46 = vadd.f32 %v2666_v60, %v2665_v2  ;;  %v2674_v20 = vadd.f32 %v2673_v1, %v2672_v30  ;;  %v1188_v30 = vrot.slane %v6696_v35, 5 }
 0x2f3   :  { %v1788_v11 = vadd.f32 %v1787_v36, %v1786_v13  ;;  %v1791_v59 = vsel %vm1582_vm0, %v1565_v50, 0.0  ;;  %v2661_v21 = vrot.slane %v2660_v44, 2  ;;  %v1189_v9 = vrot.slane %v6696_v35, 6 }
 0x2f4   :  { %v4655_v27 = vpop.eup %4654  ;;  %v2668_v61 = vrot.slane %v2667_v46, 2  ;;  %v2675_v34 = vrot.slane %v2674_v20, 2  ;;  %v1315_v60 = vperm.slane %v1188_v30, 0  ;;  %v1193_v50 = vrot.slane %v6740_v12, 3 }
 0x2f5   :  { %v4657_v53 = vpop.eup %4656  ;;  %v3190_v26 = vmul.f32 %v6852_v4, %v4655_v27  ;;  %v1790_v41 = vadd.f32 %v1789_v29, %v1788_v11  ;;  %v2662_v58 = vadd.f32 %v2661_v21, %v2660_v44  ;;  %v1316_v44 = vperm.slane %v1189_v9, 0 }
 0x2f6   :  { %v3257_v56 = vmul.f32 %v6923_v16, %v4657_v53  ;;  %v2669_v17 = vadd.f32 %v2668_v61, %v2667_v46  ;;  %v2676_v43 = vadd.f32 %v2675_v34, %v2674_v20  ;;  %v1190_v29 = vrot.slane %v6696_v35, 7 }
 0x2f7   :  { %v3230_v51 = vsel %vm1582_vm0, %v3190_v26, 0.0  ;;  %v1792_v37 = vadd.f32 %v1791_v59, %v1790_v41  ;;  %v2663_v52 = vrot.slane %v2662_v58, 1  ;;  %v1934_v46 = vmul.f32 %v6954_v47, %v6613_v15 }
 0x2f8   :  { %v3295_v14 = vsel %vm1582_vm0, %v3257_v56, 0.0  ;;  %3231 = vadd.xlane.f32.xlu2 %v3230_v51  ;;  %v2670_v19 = vrot.slane %v2669_v17, 1  ;;  %v2677_v23 = vrot.slane %v2676_v43, 1  ;;  %v1061_v56 = vpop.xlane.xlu0 %1060  ;;  %v1321_v61 = vperm.slane %v1193_v50, 0 }
 0x2f9   :  { %3296 = vadd.xlane.f32.xlu1 %v3295_v14  ;;  %v2860_v6 = vadd.f32 %v1792_v37, %v6613_v15  ;;  %v2664_v28 = vadd.f32 %v2663_v52, %v2662_v58  ;;  %v1053_v14 = vpop.xlane.xlu2 %1052  ;;  %v6975_v63 = vpop.xlane.xlu1 %1064  ;;  %v1946_v20 = vmul.f32 %v1061_v56, %v6743_v55  ;;  %v1317_v34 = vperm.slane %v1190_v29, 0 }
 0x2fa   :  { %v2671_v25 = vadd.f32 %v2670_v19, %v2669_v17  ;;  %v2678_v62 = vadd.f32 %v2677_v23, %v2676_v43  ;;  %v1194_v9 = vrot.slane %v6740_v12, 4  ;;  %v1942_v29 = vmul.f32 %v1053_v14, %v6706_v38 }
 0x2fb   :  { %4658 = vtanh.f32 %v2860_v6  ;;  %v3102_v31 = vsel %vm3015_vm5, %v2664_v28, %v8649_v48  ;;  %v2728_v6 = vsel %vm1582_vm0, %v1934_v46, 0.0  ;;  %v2812_v47 = vsel %vm1582_vm0, %v1946_v20, 0.0 }
 0x2fc   :  { %v3103_v5 = vsel %vm8557_vm6, %v2671_v25, %v3102_v31  ;;  %v1577_v28 = vmul.f32 %v1321_v61, %v1061_v56  ;;  %v2729_v25 = vrot.slane %v2728_v6, 4  ;;  %v2813_v31 = vrot.slane %v2812_v47, 4 }
 0x2fd   :  { %v3104_v40 = vsel %vm8553_vm7, %v2678_v62, %v3103_v5  ;;  %v1195_v46 = vrot.slane %v6740_v12, 5 }
 0x2fe   :  { %v3154_v45 = vadd.f32 %v3104_v40, %v6576_v24  ;;  %v1813_v30 = vsel %vm1582_vm0, %v1577_v28, 0.0 }
 0x300   :  { %4660 = vtanh.f32 %v3154_v45  ;;  %v1049_v54 = vpop.xlane.xlu0 %1048 }
 0x301   :  { %v4659_v27 = vpop.eup %4658  ;;  %v6977_v0 = vpop.xlane.xlu2 %3195  ;;  %v1571_v59 = vmul.f32 %v1315_v60, %v1049_v54  ;;  %v1940_v17 = vmul.f32 %v1049_v54, %v6706_v38  ;;  %v2730_v54 = vadd.f32 %v2729_v25, %v2728_v6  ;;  %v1947_v60 = vmul.f32 %v6973_v8, %v6743_v55 }
 0x302   :  { %v3191_v53 = vmul.f32 %v6852_v4, %v4659_v27  ;;  %v3310_v51 = vrot.slane %v6977_v0, 4  ;;  %v6984_v33 = vpop.xlane.xlu1 %1068  ;;  %v1573_v27 = vmul.f32 %v1317_v34, %v1053_v14 }
 0x303   :  { %v1802_v52 = vsel %vm1582_vm0, %v1571_v59, 0.0  ;;  %v2731_v20 = vrot.slane %v2730_v54, 2 }
 0x304   :  { %v3233_v39 = vsel %vm1582_vm0, %v3191_v53, 0.0  ;;  %v3311_v32 = vmax.f32 %v6977_v0, %v3310_v51  ;;  %v1803_v5 = vadd.f32 %v1802_v52, %v6888_v22  ;;  %v2770_v53 = vsel %vm1582_vm0, %v1940_v17, 0.0 }
 0x305   :  { %3234 = vadd.xlane.f32.xlu1 %v3233_v39  ;;  %v1806_v56 = vsel %vm1582_vm0, %v1573_v27, 0.0  ;;  %v2819_v17 = vsel %vm1582_vm0, %v1947_v60, 0.0 }
 0x306   :  { %v4661_v57 = vpop.eup %4660  ;;  %v3312_v36 = vrot.slane %v3311_v32, 2  ;;  %v2820_v25 = vrot.slane %v2819_v17, 4 }
 0x307   :  { %v3258_v26 = vmul.f32 %v6923_v16, %v4661_v57 }
 0x308   :  { %v1051_v2 = vpop.xlane.xlu0 %1050  ;;  %v3313_v41 = vmax.f32 %v3311_v32, %v3312_v36  ;;  %v7014_v32 = vadd.f32 %v2813_v31, %v2812_v47  ;;  %v1196_v47 = vrot.slane %v6740_v12, 6 }
 0x309   :  { %v3298_v49 = vsel %vm1582_vm0, %v3258_v26, 0.0  ;;  %v6990_v13 = vpop.xlane.xlu2 %3266  ;;  %v1572_v37 = vmul.f32 %v1316_v44, %v1051_v2  ;;  %v1941_v45 = vmul.f32 %v1051_v2, %v6706_v38 }
 0x30a   :  { %3299 = vadd.xlane.f32.xlu0 %v3298_v49  ;;  %v3796_v21 = vrot.slane %v6990_v13, 4  ;;  %v6998_v58 = vpop.xlane.xlu1 %3263  ;;  %v3314_v19 = vrot.slane %v3313_v41, 1  ;;  %v2771_v49 = vrot.slane %v2770_v53, 4  ;;  %v2815_v34 = vrot.slane %v7014_v32, 2 }
 0x30b   :  { %v3790_v15 = vrot.slane %v6998_v58, 4  ;;  %v1804_v62 = vsel %vm1582_vm0, %v1572_v37, 0.0  ;;  %v2777_v2 = vsel %vm1582_vm0, %v1941_v45, 0.0 }
 0x30c   :  { %v3797_v23 = vmax.f32 %v6990_v13, %v3796_v21  ;;  %v3315_v39 = vmax.f32 %v3313_v41, %v3314_v19  ;;  %v1805_v26 = vadd.f32 %v1804_v62, %v1803_v5  ;;  %v1814_v41 = vadd.f32 %v1813_v30, %v6867_v3 }
 0x30d   :  { %v3791_v48 = vmax.f32 %v6998_v58, %v3790_v15  ;;  %v1322_v21 = vperm.slane %v1194_v9, 0  ;;  %v2778_v61 = vrot.slane %v2777_v2, 4  ;;  %v1323_v15 = vperm.slane %v1195_v46, 0 }
 0x30e   :  { %v3798_v57 = vrot.slane %v3797_v23, 2  ;;  %v3406_v36 = vsub.f32 %v6977_v0, %v3315_v39  ;;  %v1807_v44 = vadd.f32 %v1806_v56, %v1805_v26  ;;  %v2732_v19 = vadd.f32 %v2731_v20, %v2730_v54 }
 0x30f   :  { %v3792_v51 = vrot.slane %v3791_v48, 2  ;;  %v1948_v3 = vmul.f32 %v6975_v63, %v6743_v55  ;;  %v1578_v28 = vmul.f32 %v1322_v21, %v6973_v8  ;;  %v2779_v62 = vadd.f32 %v2778_v61, %v2777_v2 }
 0x310   :  { %v6979_v24 = vpop.xlane.xlu0 %1066  ;;  %v3799_v50 = vmax.f32 %v3797_v23, %v3798_v57  ;;  %v3422_v6 = vmul.f32 1.442695, %v3406_v36  ;;  %v2861_v14 = vadd.f32 %v1807_v44, %v6706_v38  ;;  %v1579_v5 = vmul.f32 %v1323_v15, %v6975_v63 }
 0x311   :  { %v3793_v59 = vmax.f32 %v3791_v48, %v3792_v51  ;;  %v1949_v31 = vmul.f32 %v6979_v24, %v6743_v55  ;;  %v2733_v39 = vrot.slane %v2732_v19, 1  ;;  %v2826_v57 = vsel %vm1582_vm0, %v1948_v3, 0.0 }
 0x312   :  { %v3800_v0 = vrot.slane %v3799_v50, 1  ;;  %4662 = vpow2.f32 %v3422_v6  ;;  %v1815_v26 = vsel %vm1582_vm0, %v1578_v28, 0.0  ;;  %v1950_v54 = vmul.f32 %v6984_v33, %v6743_v55 }
 0x313   :  { %v3794_v23 = vrot.slane %v3793_v59, 1  ;;  %4664 = vtanh.f32 %v2861_v14  ;;  %v2780_v51 = vrot.slane %v2779_v62, 2  ;;  %v2833_v63 = vsel %vm1582_vm0, %v1949_v31, 0.0 }
 0x314   :  { %v3801_v38 = vmax.f32 %v3799_v50, %v3800_v0  ;;  %v2827_v60 = vrot.slane %v2826_v57, 4  ;;  %v1816_v46 = vadd.f32 %v1815_v26, %v1814_v41  ;;  %v2840_v21 = vsel %vm1582_vm0, %v1950_v54, 0.0 }
 0x315   :  { %v3795_v8 = vmax.f32 %v3793_v59, %v3794_v23  ;;  %v2834_v59 = vrot.slane %v2833_v63, 4  ;;  %v2841_v41 = vrot.slane %v2840_v21, 4 }
 0x316   :  { %v3887_v9 = vsub.f32 %v6990_v13, %v3801_v38  ;;  %v2781_v13 = vadd.f32 %v2780_v51, %v2779_v62  ;;  %v2828_v0 = vadd.f32 %v2827_v60, %v2826_v57 }
 0x317   :  { %v2842_v38 = vadd.f32 %v2841_v41, %v2840_v21 }
 0x318   :  { %v6987_v1 = vpop.xlane.xlu0 %3198  ;;  %v7045_v50 = vpop.eup %4662  ;;  %v3904_v6 = vmul.f32 1.442695, %v3887_v9  ;;  %v2829_v31 = vrot.slane %v2828_v0, 2 }
 0x319   :  { %v3316_v11 = vrot.slane %v6987_v1, 4 }
 0x31b   :  { %v3317_v43 = vmax.f32 %v6987_v1, %v3316_v11  ;;  %v2772_v11 = vadd.f32 %v2771_v49, %v2770_v53  ;;  %v1324_v53 = vperm.slane %v1196_v47, 0  ;;  %v2821_v49 = vadd.f32 %v2820_v25, %v2819_v17 }
 0x31d   :  { %v3318_v40 = vrot.slane %v3317_v43, 2  ;;  %v2773_v52 = vrot.slane %v2772_v11, 2  ;;  %v1580_v2 = vmul.f32 %v1324_v53, %v6979_v24  ;;  %v2822_v20 = vrot.slane %v2821_v49, 2 }
 0x31f   :  { %v3319_v22 = vmax.f32 %v3317_v43, %v3318_v40  ;;  %v2784_v43 = vsel %vm1582_vm0, %v1942_v29, 0.0  ;;  %v1197_v40 = vrot.slane %v6740_v12, 7  ;;  %v2774_v45 = vadd.f32 %v2773_v52, %v2772_v11 }
 0x320   :  { %v2785_v48 = vrot.slane %v2784_v43, 4  ;;  %v2734_v29 = vadd.f32 %v2733_v39, %v2732_v19  ;;  %v3886_v11 = vsub.f32 %v6998_v58, %v3795_v8  ;;  %v1819_v24 = vsel %vm1582_vm0, %v1580_v2, 0.0  ;;  %v3202_v52 = vpop.xlane.xlu0 %3201 }
 0x321   :  { %v3320_v37 = vrot.slane %v3319_v22, 1  ;;  %v1325_v36 = vperm.slane %v1197_v40, 0  ;;  %v2775_v44 = vrot.slane %v2774_v45, 1  ;;  %v2835_v19 = vadd.f32 %v2834_v59, %v2833_v63 }
 0x322   :  { %v2786_v30 = vadd.f32 %v2785_v48, %v2784_v43  ;;  %v3454_v43 = vrot.slane %v7045_v50, 4  ;;  %v3902_v15 = vmul.f32 1.442695, %v3886_v11  ;;  %v3111_v58 = vsel %vm8553_vm7, %v2734_v29, %v6930_v18 }
 0x323   :  { %v3321_v27 = vmax.f32 %v3319_v22, %v3320_v37  ;;  %v1817_v22 = vsel %vm1582_vm0, %v1579_v5, 0.0  ;;  %v1581_v14 = vmul.f32 %v1325_v36, %v6984_v33  ;;  %v3155_v3 = vadd.f32 %v3111_v58, %v8648_v10 }
 0x324   :  { %v2787_v37 = vrot.slane %v2786_v30, 2  ;;  %v1818_v17 = vadd.f32 %v1817_v22, %v1816_v46  ;;  %v3322_v23 = vrot.slane %v3202_v52, 4  ;;  %v3455_v33 = vadd.f32 %v7045_v50, %v3454_v43 }
 0x325   :  { %v3407_v56 = vsub.f32 %v6987_v1, %v3321_v27  ;;  %v4665_v1 = vpop.eup %4664  ;;  %v1821_v27 = vsel %vm1582_vm0, %v1581_v14, 0.0  ;;  %v2816_v48 = vadd.f32 %v2815_v34, %v7014_v32  ;;  %v2776_v10 = vadd.f32 %v2775_v44, %v2774_v45 }
 0x326   :  { %v3192_v47 = vmul.f32 %v6852_v4, %v4665_v1  ;;  %v2788_v28 = vadd.f32 %v2787_v37, %v2786_v30  ;;  %v1820_v25 = vadd.f32 %v1819_v24, %v1818_v17  ;;  %v3323_v18 = vmax.f32 %v3202_v52, %v3322_v23 }
 0x327   :  { %v3424_v61 = vmul.f32 1.442695, %v3407_v56  ;;  %v2782_v5 = vrot.slane %v2781_v13, 1  ;;  %v2836_v53 = vrot.slane %v2835_v19, 2  ;;  %v2823_v8 = vadd.f32 %v2822_v20, %v2821_v49 }
 0x328   :  { %v3236_v62 = vsel %vm1582_vm0, %v3192_v47, 0.0  ;;  %v3324_v40 = vrot.slane %v3323_v18, 2  ;;  %v1822_v39 = vadd.f32 %v1821_v27, %v1820_v25  ;;  %v2789_v26 = vrot.slane %v2788_v28, 1 }
 0x329   :  { %4666 = vpow2.f32 %v3424_v61  ;;  %3237 = vadd.xlane.f32.xlu0 %v3236_v62  ;;  %v3456_v54 = vrot.slane %v3455_v33, 2  ;;  %v2830_v30 = vadd.f32 %v2829_v31, %v2828_v0  ;;  %v2843_v63 = vrot.slane %v2842_v38, 2 }
 0x32a   :  { %4668 = vpow2.f32 %v3904_v6  ;;  %v3325_v56 = vmax.f32 %v3323_v18, %v3324_v40  ;;  %v2817_v32 = vrot.slane %v2816_v48, 1  ;;  %v3116_v34 = vsel %vm3015_vm5, %v2776_v10, %v6913_v7 }
 0x32b   :  { %4670 = vtanh.f32 %v3155_v3  ;;  %v2783_v45 = vadd.f32 %v2782_v5, %v2781_v13  ;;  %v2837_v22 = vadd.f32 %v2836_v53, %v2835_v19  ;;  %v2862_v2 = vadd.f32 %v1822_v39, %v6743_v55  ;;  %v3205_v5 = vpop.xlane.xlu2 %3204  ;;  %v7093_v53 = vpop.xlane.xlu1 %3269 }
 0x32c   :  { %4672 = vpow2.f32 %v3902_v15  ;;  %v3326_v44 = vrot.slane %v3325_v56, 1  ;;  %v2824_v29 = vrot.slane %v2823_v8, 1  ;;  %v2790_v46 = vadd.f32 %v2789_v26, %v2788_v28 }
 0x32d   :  { %v3457_v11 = vadd.f32 %v3456_v54, %v3455_v33  ;;  %v2831_v20 = vrot.slane %v2830_v30, 1  ;;  %v2844_v59 = vadd.f32 %v2843_v63, %v2842_v38  ;;  %v3117_v61 = vsel %vm8557_vm6, %v2783_v45, %v3116_v34 }
 0x32e   :  { %v3327_v21 = vmax.f32 %v3325_v56, %v3326_v44  ;;  %v2838_v13 = vrot.slane %v2837_v22, 1  ;;  %v2818_v37 = vadd.f32 %v2817_v32, %v2816_v48  ;;  %4674 = vtanh.f32 %v2862_v2 }
 0x32f   :  { %v7062_v57 = vpop.eup %4666  ;;  %v2825_v0 = vadd.f32 %v2824_v29, %v2823_v8  ;;  %v3458_v24 = vrot.slane %v3457_v11, 1  ;;  %v2832_v14 = vadd.f32 %v2831_v20, %v2830_v30  ;;  %v2845_v41 = vrot.slane %v2844_v59, 1 }
 0x330   :  { %v7064_v51 = vpop.eup %4668  ;;  %v3460_v49 = vrot.slane %v7062_v57, 4  ;;  %v3408_v6 = vsub.f32 %v3202_v52, %v3327_v21  ;;  %v3118_v58 = vsel %vm8553_vm7, %v2790_v46, %v3117_v61  ;;  %v2839_v47 = vadd.f32 %v2838_v13, %v2837_v22 }
 0x331   :  { %v4671_v9 = vpop.eup %4670  ;;  %v3940_v1 = vrot.slane %v7064_v51, 4  ;;  %v3156_v3 = vadd.f32 %v3118_v58, %v6696_v35  ;;  %v3121_v23 = vsel %vm3011_vm3, %v2818_v37, %v6900_v42  ;;  %v7085_v25 = vadd.f32 %v3458_v24, %v3457_v11  ;;  %v7108_v11 = vpop.xlane.xlu0 %3272 }
 0x332   :  { %v7068_v60 = vpop.eup %4672  ;;  %v3259_v36 = vmul.f32 %v6923_v16, %v4671_v9  ;;  %v3461_v17 = vadd.f32 %v7062_v57, %v3460_v49  ;;  %v3426_v15 = vmul.f32 1.442695, %v3408_v6  ;;  %v3122_v52 = vsel %vm3013_vm4, %v2825_v0, %v3121_v23 }
 0x333   :  { %v3934_v55 = vrot.slane %v7068_v60, 4  ;;  %v3941_v43 = vadd.f32 %v7064_v51, %v3940_v1  ;;  %v3123_v27 = vsel %vm3015_vm5, %v2832_v14, %v3122_v52  ;;  %v2846_v18 = vadd.f32 %v2845_v41, %v2844_v59  ;;  %v7115_v61 = vpop.xlane.xlu2 %3275  ;;  %v7117_v13 = vpop.xlane.xlu1 %3207 }
 0x334   :  { %v3301_v7 = vsel %vm1582_vm0, %v3259_v36, 0.0  ;;  %v3462_v28 = vrot.slane %v3461_v17, 2  ;;  %4676 = vpow2.f32 %v3426_v15  ;;  %v4675_v33 = vpop.eup %4674  ;;  %v3124_v48 = vsel %vm8557_vm6, %v2839_v47, %v3123_v27 }
 0x335   :  { %3302 = vadd.xlane.f32.xlu2 %v3301_v7  ;;  %v3935_v19 = vadd.f32 %v7068_v60, %v3934_v55  ;;  %v3942_v62 = vrot.slane %v3941_v43, 2  ;;  %4678 = vtanh.f32 %v3156_v3  ;;  %v3193_v42 = vmul.f32 %v6852_v4, %v4675_v33 }
 0x336   :  { %v3463_v38 = vadd.f32 %v3462_v28, %v3461_v17  ;;  %4680 = vrcp.f32 %v7085_v25  ;;  %v3125_v40 = vsel %vm8553_vm7, %v2846_v18, %v3124_v48  ;;  %v3328_v54 = vrot.slane %v3205_v5, 4 }
 0x337   :  { %v3936_v31 = vrot.slane %v3935_v19, 2  ;;  %v3943_v35 = vadd.f32 %v3942_v62, %v3941_v43  ;;  %v3802_v56 = vrot.slane %v7093_v53, 4  ;;  %v3239_v9 = vsel %vm1582_vm0, %v3193_v42, 0.0 }
 0x338   :  { %v3464_v30 = vrot.slane %v3463_v38, 1  ;;  %v3157_v4 = vadd.f32 %v3125_v40, %v6740_v12  ;;  %v3329_v34 = vmax.f32 %v3205_v5, %v3328_v54  ;;  %v3808_v59 = vrot.slane %v7108_v11, 4 }
 0x339   :  { %v3937_v8 = vadd.f32 %v3936_v31, %v3935_v19  ;;  %v3944_v32 = vrot.slane %v3943_v35, 1  ;;  %v3803_v45 = vmax.f32 %v7093_v53, %v3802_v56  ;;  %v3814_v24 = vrot.slane %v7115_v61, 4  ;;  %v7131_v27 = vpop.xlane.xlu0 %3210 }
 0x33a   :  { %v7091_v10 = vpop.eup %4676  ;;  %4682 = vtanh.f32 %v3157_v4  ;;  %v3330_v44 = vrot.slane %v3329_v34, 2  ;;  %v7106_v46 = vadd.f32 %v3464_v30, %v3463_v38  ;;  %v3809_v6 = vmax.f32 %v7108_v11, %v3808_v59 }
 0x33b   :  { %v4679_v39 = vpop.eup %4678  ;;  %v3466_v26 = vrot.slane %v7091_v10, 4  ;;  %v3938_v36 = vrot.slane %v3937_v8, 1  ;;  %v3804_v29 = vrot.slane %v3803_v45, 2  ;;  %v7110_v12 = vadd.f32 %v3944_v32, %v3943_v35 }
 0x33c   :  { %v3260_v63 = vmul.f32 %v6923_v16, %v4679_v39  ;;  %v7104_v49 = vpop.eup %4680  ;;  %v3331_v1 = vmax.f32 %v3329_v34, %v3330_v44  ;;  %4684 = vrcp.f32 %v7106_v46  ;;  %v3334_v43 = vrot.slane %v7117_v13, 4  ;;  %v7152_v34 = vpop.xlane.xlu1 %3278 }
 0x33d   :  { %3240 = vadd.xlane.f32.xlu2 %v3239_v9  ;;  %v3467_v22 = vadd.f32 %v7091_v10, %v3466_v26  ;;  %v3805_v20 = vmax.f32 %v3803_v45, %v3804_v29  ;;  %v3551_v7 = vmul.f32 %v7104_v49, %v7085_v25  ;;  %v7119_v55 = vadd.f32 %v3938_v36, %v3937_v8 }
 0x33e   :  { %v3304_v2 = vsel %vm1582_vm0, %v3260_v63, 0.0  ;;  %v3332_v37 = vrot.slane %v3331_v1, 1  ;;  %4686 = vrcp.f32 %v7110_v12  ;;  %v3810_v15 = vrot.slane %v3809_v6, 2 }
 0x33f   :  { %3305 = vadd.xlane.f32.xlu1 %v3304_v2  ;;  %v3468_v21 = vrot.slane %v3467_v22, 2  ;;  %v3806_v17 = vrot.slane %v3805_v20, 1  ;;  %v3815_v47 = vmax.f32 %v7115_v61, %v3814_v24  ;;  %v3335_v19 = vmax.f32 %v7117_v13, %v3334_v43 }
 0x340   :  { %v4683_v0 = vpop.eup %4682  ;;  %v3333_v14 = vmax.f32 %v3331_v1, %v3332_v37  ;;  %v3552_v23 = vsub.f32 1.0, %v3551_v7  ;;  %4688 = vrcp.f32 %v7119_v55  ;;  %v3811_v62 = vmax.f32 %v3809_v6, %v3810_v15 }
 0x341   :  { %v3807_v41 = vmax.f32 %v3805_v20, %v3806_v17  ;;  %v3469_v58 = vadd.f32 %v3468_v21, %v3467_v22  ;;  %v3261_v3 = vmul.f32 %v6923_v16, %v4683_v0  ;;  %v3816_v33 = vrot.slane %v3815_v47, 2  ;;  %v7136_v16 = vpop.xlane.xlu2 %3213 }
 0x342   :  { %v3409_v28 = vsub.f32 %v3205_v5, %v3333_v14  ;;  %v3336_v18 = vrot.slane %v3335_v19, 2  ;;  %v7134_v31 = vpop.eup %4684  ;;  %v3812_v42 = vrot.slane %v3811_v62, 1  ;;  %v3553_v5 = vmul.f32 %v7104_v49, %v3552_v23 }
 0x343   :  { %v3888_v52 = vsub.f32 %v7093_v53, %v3807_v41  ;;  %v3307_v48 = vsel %vm1582_vm0, %v3261_v3, 0.0  ;;  %v3470_v38 = vrot.slane %v3469_v58, 1  ;;  %v3817_v39 = vmax.f32 %v3815_v47, %v3816_v33 }
 0x344   :  { %v3428_v35 = vmul.f32 1.442695, %v3409_v28  ;;  %3308 = vadd.xlane.f32.xlu0 %v3307_v48  ;;  %v7138_v40 = vpop.eup %4686  ;;  %v3340_v8 = vrot.slane %v7131_v27, 4  ;;  %v3346_v26 = vrot.slane %v7136_v16, 4  ;;  %v3566_v56 = vmul.f32 %v7134_v31, %v7106_v46 }
 0x345   :  { %v3906_v53 = vmul.f32 1.442695, %v3888_v52  ;;  %v3337_v30 = vmax.f32 %v3335_v19, %v3336_v18  ;;  %vm3556_vm8 = vweird.f32 %v7104_v49  ;;  %v3559_v9 = vand.u32 2147483647, %v7085_v25 }
 0x346   :  { %v7143_v54 = vpop.eup %4688  ;;  %4690 = vpow2.f32 %v3428_v35  ;;  %v3341_v63 = vmax.f32 %v7131_v27, %v3340_v8  ;;  %v7150_v4 = vadd.f32 %v3470_v38, %v3469_v58  ;;  %v3813_v32 = vmax.f32 %v3811_v62, %v3812_v42 }
 0x347   :  { %v3554_v45 = vadd.f32 %v7104_v49, %v3553_v5  ;;  %v4046_v22 = vmul.f32 %v7138_v40, %v7110_v12  ;;  %4692 = vpow2.f32 %v3906_v53  ;;  %v3818_v2 = vrot.slane %v3817_v39, 1 }
 0x348   :  { %vm3555_vm9 = vweird.f32 %v7085_v25  ;;  %v3561_v36 = vand.u32 2147483648, %v7085_v25  ;;  %v4031_v44 = vmul.f32 %v7143_v54, %v7119_v55  ;;  %v3347_v29 = vmax.f32 %v7136_v16, %v3346_v26 }
 0x349   :  { %v3567_v1 = vsub.f32 1.0, %v3566_v56  ;;  %v3338_v20 = vrot.slane %v3337_v30, 1  ;;  %v3342_v59 = vrot.slane %v3341_v63, 2  ;;  %v3820_v7 = vrot.slane %v7152_v34, 4  ;;  %vm7165_vm10 = vmor %vm3555_vm9, %vm3556_vm8 }
 0x34a   :  { %vm7169_vm11 = vcmp.eq.f32.partialorder %v3559_v9, 8.507059e+37  ;;  %4694 = vrcp.f32 %v7150_v4  ;;  %v3889_v25 = vsub.f32 %v7108_v11, %v3813_v32  ;;  %v3558_v6 = vsel %vm7165_vm10, %v7104_v49, %v3554_v45 }
 0x34b   :  { %v3576_v0 = vand.u32 2147483648, %v7106_v46  ;;  %v4047_v24 = vsub.f32 1.0, %v4046_v22  ;;  %v3819_v43 = vmax.f32 %v3817_v39, %v3818_v2  ;;  %v3562_v14 = vor.u32 1.1754944e-38, %v3561_v36 }
 0x34c   :  { %v7175_v17 = vpop.eup %4690  ;;  %v3574_v41 = vand.u32 2147483647, %v7106_v46  ;;  %v4032_v15 = vsub.f32 1.0, %v4031_v44  ;;  %v3348_v58 = vrot.slane %v3347_v29, 2  ;;  %v3568_v19 = vmul.f32 %v7134_v31, %v3567_v1 }
 0x34d   :  { %v7182_v47 = vpop.eup %4692  ;;  %v3339_v11 = vmax.f32 %v3337_v30, %v3338_v20  ;;  %v3343_v3 = vmax.f32 %v3341_v63, %v3342_v59  ;;  %v3821_v23 = vmax.f32 %v7152_v34, %v3820_v7  ;;  %v7188_v49 = vsel %vm7169_vm11, %v3562_v14, %v3558_v6 }
 0x34e   :  { %v3472_v28 = vrot.slane %v7175_v17, 4  ;;  %v3908_v52 = vmul.f32 1.442695, %v3889_v25  ;;  %vm3570_vm12 = vweird.f32 %v7106_v46  ;;  %v3577_v62 = vor.u32 1.1754944e-38, %v3576_v0 }
 0x34f   :  { %v4048_v33 = vmul.f32 %v7138_v40, %v4047_v24  ;;  %v3890_v18 = vsub.f32 %v7115_v61, %v3819_v43  ;;  %vm3571_vm13 = vweird.f32 %v7134_v31  ;;  %v4033_v38 = vmul.f32 %v7143_v54, %v4032_v15 }
 0x350   :  { %v7194_v48 = vpop.eup %4694  ;;  %v3946_v35 = vrot.slane %v7182_v47, 4  ;;  %v3349_v42 = vmax.f32 %v3347_v29, %v3348_v58  ;;  %v3569_v5 = vadd.f32 %v7134_v31, %v3568_v19  ;;  %vm7200_vm14 = vcmp.eq.f32.partialorder %v3574_v41, 8.507059e+37  ;;  %vm7219_vm9 = vmor %vm3570_vm12, %vm3571_vm13  ;;  %v7251_v41 = vpop.xlane.xlu0 %3281 }
 0x351   :  { %v3410_v39 = vsub.f32 %v7117_v13, %v3339_v11  ;;  %v3344_v8 = vrot.slane %v3343_v3, 1  ;;  %v3822_v26 = vrot.slane %v3821_v23, 2  ;;  %vm4050_vm15 = vweird.f32 %v7110_v12 }
 0x352   :  { %v4056_v61 = vand.u32 2147483648, %v7110_v12  ;;  %v3473_v56 = vadd.f32 %v7175_v17, %v3472_v28  ;;  %4696 = vpow2.f32 %v3908_v52  ;;  %v4049_v30 = vadd.f32 %v7138_v40, %v4048_v33 }
 0x353   :  { %vm4051_vm0 = vweird.f32 %v7138_v40  ;;  %v3581_v63 = vmul.f32 %v7194_v48, %v7150_v4  ;;  %v3910_v9 = vmul.f32 1.442695, %v3890_v18  ;;  %v4034_v32 = vadd.f32 %v7143_v54, %v4033_v38 }
 0x354   :  { %vm4036_vm8 = vweird.f32 %v7143_v54  ;;  %v3947_v13 = vadd.f32 %v7182_v47, %v3946_v35  ;;  %v3350_v45 = vrot.slane %v3349_v42, 1  ;;  %v4041_v2 = vand.u32 2147483648, %v7119_v55  ;;  %vm7226_vm10 = vmor %vm4050_vm15, %vm4051_vm0 }
 0x355   :  { %v3430_v36 = vmul.f32 1.442695, %v3410_v39  ;;  %v3345_v44 = vmax.f32 %v3343_v3, %v3344_v8  ;;  %v3823_v29 = vmax.f32 %v3821_v23, %v3822_v26  ;;  %v4054_v20 = vand.u32 2147483647, %v7110_v12  ;;  %v4812_v26 = vld [vmem:[%s8527_s1] sm:$0xff] }
 0x356   :  { %vm4035_vm11 = vweird.f32 %v7119_v55  ;;  %v4039_v46 = vand.u32 2147483647, %v7119_v55  ;;  %v3474_v59 = vrot.slane %v3473_v56, 2  ;;  %v3573_v7 = vsel %vm7219_vm9, %v7134_v31, %v3569_v5 }
 0x357   :  { %v4057_v21 = vor.u32 1.1754944e-38, %v4056_v61  ;;  %vm7238_vm12 = vmor %vm4035_vm11, %vm4036_vm8  ;;  %v3582_v25 = vsub.f32 1.0, %v3581_v63  ;;  %4698 = vpow2.f32 %v3910_v9  ;;  %v4053_v12 = vsel %vm7226_vm10, %v7138_v40, %v4049_v30  ;;  %v7292_v9 = vpop.xlane.xlu1 %3216 }
 0x358   :  { %v7242_v6 = vpop.eup %4696  ;;  %v4038_v55 = vsel %vm7238_vm12, %v7143_v54, %v4034_v32  ;;  %v3948_v31 = vrot.slane %v3947_v13, 2  ;;  %v3351_v0 = vmax.f32 %v3349_v42, %v3350_v45  ;;  %v4042_v24 = vor.u32 1.1754944e-38, %v4041_v2  ;;  %v4814_v32 = vld [vmem:[%s8526_s0 + $0x8] sm:$0xff] }
 0x359   :  { %4700 = vpow2.f32 %v3430_v36  ;;  %v3411_v43 = vsub.f32 %v7131_v27, %v3345_v44  ;;  %v3824_v14 = vrot.slane %v3823_v29, 1  ;;  %v3578_v15 = vsel %vm7200_vm14, %v3577_v62, %v3573_v7  ;;  %v7300_v36 = vpop.xlane.xlu2 %3284 }
 0x35a   :  { %vm4055_vm13 = vcmp.eq.f32.partialorder %v4054_v20, 8.507059e+37  ;;  %vm4040_vm15 = vcmp.eq.f32.partialorder %v4039_v46, 8.507059e+37  ;;  %v3475_v58 = vadd.f32 %v3474_v59, %v3473_v56  ;;  %v3583_v11 = vmul.f32 %v7194_v48, %v3582_v25  ;;  %v4813_v56 = vld [vmem:[%s8527_s1 + $0x8] sm:$0xff]  ;;  %v4815_v20 = vld [vmem:[%s8526_s0] sm:$0xff] }
 0x35b   :  { %v4058_v40 = vsel %vm4055_vm13, %v4057_v21, %v4053_v12  ;;  %v4043_v19 = vsel %vm4040_vm15, %v4042_v24, %v4038_v55  ;;  %v3952_v54 = vrot.slane %v7242_v6, 4  ;;  %v3949_v3 = vadd.f32 %v3948_v31, %v3947_v13 }
 0x35c   :  { %v3412_v23 = vsub.f32 %v7136_v16, %v3351_v0  ;;  %v3826_v27 = vrot.slane %v7251_v41, 4  ;;  %v3564_v52 = vmul.f32 %v7045_v50, %v7188_v49  ;;  %v3432_v62 = vmul.f32 1.442695, %v3411_v43 }
 0x35d   :  { %v7259_v28 = vpop.eup %4698  ;;  %v3825_v33 = vmax.f32 %v3823_v29, %v3824_v14  ;;  %v3579_v18 = vmul.f32 %v7062_v57, %v3578_v15  ;;  %v4059_v38 = vmul.f32 %v7064_v51, %v4058_v40  ;;  %v4044_v35 = vmul.f32 %v7068_v60, %v4043_v19  ;;  %v7315_v15 = vpop.xlane.xlu0 %3219 }
 0x35e   :  { %v3476_v42 = vrot.slane %v3475_v58, 1  ;;  %v3584_v16 = vadd.f32 %v7194_v48, %v3583_v11  ;;  %vm3586_vm14 = vweird.f32 %v7194_v48  ;;  %v3591_v53 = vand.u32 2147483648, %v7150_v4 }
 0x35f   :  { %v7266_v5 = vpop.eup %4700  ;;  %v3953_v39 = vadd.f32 %v7242_v6, %v3952_v54  ;;  %v3950_v50 = vrot.slane %v3949_v3, 1  ;;  %v3958_v49 = vrot.slane %v7259_v28, 4  ;;  %v3434_v8 = vmul.f32 1.442695, %v3412_v23 }
 0x360   :  { %v3827_v57 = vmax.f32 %v7251_v41, %v3826_v27  ;;  %vm3585_vm0 = vweird.f32 %v7150_v4  ;;  %v3589_v51 = vand.u32 2147483647, %v7150_v4  ;;  %4702 = vpow2.f32 %v3432_v62 }
 0x361   :  { %v3891_v60 = vsub.f32 %v7152_v34, %v3825_v33  ;;  %v4270_v61 = vmul.f32 %v4812_v26, %v3564_v52  ;;  %v4271_v30 = vmul.f32 %v4813_v56, %v3579_v18  ;;  %vm7285_vm8 = vmor %vm3585_vm0, %vm3586_vm14  ;;  %v7289_v4 = vadd.f32 %v3476_v42, %v3475_v58  ;;  %v7347_v26 = vpop.xlane.xlu2 %3287 }
 0x362   :  { %v3478_v34 = vrot.slane %v7266_v5, 4  ;;  %v4383_v13 = vmul.f32 %v4814_v32, %v4059_v38  ;;  %v3588_v45 = vsel %vm7285_vm8, %v7194_v48, %v3584_v16  ;;  %v3592_v22 = vor.u32 1.1754944e-38, %v3591_v53  ;;  %v4816_v16 = vld [vmem:[%s8527_s1 + $0x10] sm:$0xff] }
 0x363   :  { %v3954_v2 = vrot.slane %v3953_v39, 2  ;;  %v7302_v44 = vadd.f32 %v3950_v50, %v3949_v3  ;;  %v3959_v29 = vadd.f32 %v7259_v28, %v3958_v49  ;;  %4704 = vpow2.f32 %v3434_v8 }
 0x364   :  { %v3828_v1 = vrot.slane %v3827_v57, 2  ;;  %v4382_v46 = vmul.f32 %v4815_v20, %v4044_v35  ;;  %vm3590_vm9 = vcmp.eq.f32.partialorder %v3589_v51, 8.507059e+37  ;;  %v3912_v59 = vmul.f32 1.442695, %v3891_v60  ;;  %v7332_v35 = vpop.xlane.xlu1 %3222 }
 0x365   :  { %v3593_v7 = vsel %vm3590_vm9, %v3592_v22, %v3588_v45  ;;  %4706 = vrcp.f32 %v7289_v4  ;;  %v3479_v48 = vadd.f32 %v7266_v5, %v3478_v34  ;;  %v3832_v21 = vrot.slane %v7300_v36, 4 }
 0x366   :  { %v7311_v37 = vpop.eup %4702  ;;  %v4286_v25 = vrot.slane %v4270_v61, 4  ;;  %v4292_v12 = vrot.slane %v4271_v30, 4  ;;  %v3955_v55 = vadd.f32 %v3954_v2, %v3953_v39  ;;  %v4404_v31 = vrot.slane %v4383_v13, 4 }
 0x367   :  { %4708 = vrcp.f32 %v7302_v44  ;;  %v3960_v0 = vrot.slane %v3959_v29, 2  ;;  %v3829_v24 = vmax.f32 %v3827_v57, %v3828_v1  ;;  %v4398_v43 = vrot.slane %v4382_v46, 4 }
 0x368   :  { %v3594_v14 = vmul.f32 %v7091_v10, %v3593_v7  ;;  %4710 = vpow2.f32 %v3912_v59  ;;  %v3480_v40 = vrot.slane %v3479_v48, 2  ;;  %v3484_v19 = vrot.slane %v7311_v37, 4 }
 0x369   :  { %v7317_v58 = vpop.eup %4704  ;;  %v3833_v11 = vmax.f32 %v7300_v36, %v3832_v21  ;;  %v3352_v54 = vrot.slane %v7292_v9, 4  ;;  %v7322_v3 = vadd.f32 %v4286_v25, %v4270_v61  ;;  %v7324_v23 = vadd.f32 %v4292_v12, %v4271_v30 }
 0x36a   :  { %v3606_v27 = vand.u32 2147483648, %v7289_v4  ;;  %v3956_v52 = vrot.slane %v3955_v55, 1  ;;  %v7329_v62 = vadd.f32 %v4404_v31, %v4383_v13  ;;  %v4071_v33 = vand.u32 2147483648, %v7302_v44 }
 0x36b   :  { %v7327_v10 = vpop.eup %4706  ;;  %v3961_v18 = vadd.f32 %v3960_v0, %v3959_v29  ;;  %v3830_v38 = vrot.slane %v3829_v24, 1  ;;  %v7334_v42 = vadd.f32 %v4398_v43, %v4382_v46  ;;  %v7339_v53 = vmul.f32 %v4816_v16, %v3594_v14 }
 0x36c   :  { %v3604_v39 = vand.u32 2147483647, %v7289_v4  ;;  %v3490_v50 = vrot.slane %v7317_v58, 4  ;;  %v3481_v8 = vadd.f32 %v3480_v40, %v3479_v48  ;;  %v3485_v57 = vadd.f32 %v7311_v37, %v3484_v19  ;;  %v7379_v14 = vpop.xlane.xlu1 %3225 }
 0x36d   :  { %v7343_v49 = vpop.eup %4708  ;;  %v3834_v51 = vrot.slane %v3833_v11, 2  ;;  %v3353_v60 = vmax.f32 %v7292_v9, %v3352_v54  ;;  %v3596_v56 = vmul.f32 %v7327_v10, %v7289_v4  ;;  %v7353_v30 = vor.u32 1.1754944e-38, %v3606_v27 }
 0x36e   :  { %v7349_v61 = vpop.eup %4710  ;;  %v4069_v63 = vand.u32 2147483647, %v7302_v44  ;;  %v7356_v34 = vadd.f32 %v3956_v52, %v3955_v55  ;;  %v7358_v32 = vor.u32 1.1754944e-38, %v4071_v33  ;;  %v3962_v13 = vrot.slane %v3961_v18, 1  ;;  %v7373_v55 = vpop.xlane.xlu0 %3290 }
 0x36f   :  { %v7360_v45 = vmax.f32 %v3829_v24, %v3830_v38  ;;  %v3354_v22 = vrot.slane %v3353_v60, 2  ;;  %v4061_v2 = vmul.f32 %v7343_v49, %v7302_v44  ;;  %v7365_v29 = vadd.f32 %v7317_v58, %v3490_v50 }
 0x370   :  { %v3358_v1 = vrot.slane %v7315_v15, 4  ;;  %v3838_v20 = vrot.slane %v7347_v26, 4  ;;  %v3482_v46 = vrot.slane %v3481_v8, 1  ;;  %v3486_v59 = vrot.slane %v3485_v57, 2 }
 0x371   :  { %v3964_v7 = vrot.slane %v7349_v61, 4  ;;  %v3835_v48 = vmax.f32 %v3833_v11, %v3834_v51  ;;  %v3597_v21 = vsub.f32 1.0, %v3596_v56  ;;  %4712 = vrcp.f32 %v7356_v34 }
 0x372   :  { %v3359_v25 = vmax.f32 %v7315_v15, %v3358_v1  ;;  %v3839_v12 = vmax.f32 %v7347_v26, %v3838_v20  ;;  %v4086_v0 = vand.u32 2147483648, %v7356_v34  ;;  %v7377_v24 = vadd.f32 %v3962_v13, %v3961_v18  ;;  %v4525_v18 = vld [vmem:[%s8532_s6 + $0x78] sm:$0xff] }
 0x373   :  { %v3355_v43 = vmax.f32 %v3353_v60, %v3354_v22  ;;  %v4062_v40 = vsub.f32 1.0, %v4061_v2  ;;  %v3364_v54 = vrot.slane %v7332_v35, 4  ;;  %v7382_v27 = vadd.f32 %v3482_v46, %v3481_v8  ;;  %4558 = vmatpush.msra.mxu3 %v4525_v18  ;;  %v4524_v22 = vld [vmem:[%s8532_s6 + $0x70] sm:$0xff] }
 0x374   :  { %v3360_v19 = vrot.slane %v3359_v25, 2  ;;  %v3840_v11 = vrot.slane %v3839_v12, 2  ;;  %v7384_v52 = vadd.f32 %v3486_v59, %v3485_v57  ;;  %v3836_v33 = vrot.slane %v3835_v48, 1 }
 0x375   :  { %v3844_v38 = vrot.slane %v7373_v55, 4  ;;  %vm3601_vm10 = vweird.f32 %v7327_v10  ;;  %v3365_v51 = vmax.f32 %v7332_v35, %v3364_v54  ;;  %v3370_v60 = vrot.slane %v7379_v14, 4  ;;  %4559 = vmatpush.msra.mxu3 %v4524_v22 }
 0x376   :  { %v3361_v16 = vmax.f32 %v3359_v25, %v3360_v19  ;;  %v3841_v50 = vmax.f32 %v3839_v12, %v3840_v11  ;;  %v3598_v8 = vmul.f32 %v7327_v10, %v3597_v21  ;;  %v3356_v56 = vrot.slane %v3355_v43, 1  ;;  %v4523_v11 = vld [vmem:[%s8532_s6 + $0x68] sm:$0xff] }
 0x377   :  { %v3845_v13 = vmax.f32 %v7373_v55, %v3844_v38  ;;  %v7399_v2 = vpop.eup %4712  ;;  %vm3600_vm11 = vweird.f32 %v7289_v4  ;;  %v3366_v46 = vrot.slane %v3365_v51, 2  ;;  %v3371_v59 = vmax.f32 %v7379_v14, %v3370_v60  ;;  %4560 = vmatpush.msra.mxu3 %v4523_v11  ;;  %v4519_v4 = vld [vmem:[%s8532_s6 + $0x48] sm:$0xff] }
 0x378   :  { %v3362_v1 = vrot.slane %v3361_v16, 1  ;;  %v3842_v20 = vrot.slane %v3841_v50, 1  ;;  %v7403_v21 = vor.u32 1.1754944e-38, %v4086_v0  ;;  %v3892_v25 = vsub.f32 %v7251_v41, %v7360_v45  ;;  %v4522_v41 = vld [vmem:[%s8532_s6 + $0x60] sm:$0xff]  ;;  %vm7446_vm14 = vmor %vm3600_vm11, %vm3601_vm10 }
 0x379   :  { %v3837_v12 = vmax.f32 %v3835_v48, %v3836_v33  ;;  %v3846_v19 = vrot.slane %v3845_v13, 2  ;;  %v3367_v18 = vmax.f32 %v3365_v51, %v3366_v46  ;;  %v3372_v31 = vrot.slane %v3371_v59, 2  ;;  %4561 = vmatpush.msra.mxu3 %v4522_v41 }
 0x37a   :  { %v3363_v54 = vmax.f32 %v3361_v16, %v3362_v1  ;;  %v3843_v38 = vmax.f32 %v3841_v50, %v3842_v20  ;;  %v4063_v57 = vmul.f32 %v7343_v49, %v4062_v40  ;;  %vm4066_vm12 = vweird.f32 %v7343_v49 }
 0x37b   :  { %4714 = vrcp.f32 %v7377_v24  ;;  %v3357_v0 = vmax.f32 %v3355_v43, %v3356_v56  ;;  %v3847_v60 = vmax.f32 %v3845_v13, %v3846_v19  ;;  %v3368_v33 = vrot.slane %v3367_v18, 1 }
 0x37c   :  { %v3414_v45 = vsub.f32 %v7315_v15, %v3363_v54  ;;  %v3894_v48 = vsub.f32 %v7347_v26, %v3843_v38  ;;  %v3373_v16 = vmax.f32 %v3371_v59, %v3372_v31  ;;  %v3599_v50 = vadd.f32 %v7327_v10, %v3598_v8  ;;  %v7427_v15 = vpop.xlane.xlu2 %3293  ;;  %v4521_v26 = vld [vmem:[%s8532_s6 + $0x58] sm:$0xff] }
 0x37d   :  { %vm7421_vm13 = vcmp.eq.f32.partialorder %v3604_v39, 8.507059e+37  ;;  %vm4065_vm15 = vweird.f32 %v7302_v44  ;;  %v3914_v43 = vmul.f32 1.442695, %v3892_v25  ;;  %v3893_v51 = vsub.f32 %v7300_v36, %v3837_v12  ;;  %4562 = vmatpush.msra.mxu3 %v4521_v26  ;;  %v4520_v36 = vld [vmem:[%s8532_s6 + $0x50] sm:$0xff] }
 0x37e   :  { %v3848_v56 = vrot.slane %v3847_v60, 1  ;;  %v3438_v31 = vmul.f32 1.442695, %v3414_v45  ;;  %v3918_v8 = vmul.f32 1.442695, %v3894_v48  ;;  %v3369_v13 = vmax.f32 %v3367_v18, %v3368_v33  ;;  %v4518_v45 = vld [vmem:[%s8532_s6 + $0x40] sm:$0xff]  ;;  %vm7489_vm8 = vmor %vm4065_vm15, %vm4066_vm12 }
 0x37f   :  { %v3374_v22 = vrot.slane %v3373_v16, 1  ;;  %v4099_v39 = vand.u32 2147483647, %v7377_v24  ;;  %4716 = vrcp.f32 %v7382_v27  ;;  %v3850_v20 = vrot.slane %v7427_v15, 4  ;;  %4563 = vmatpush.msra.mxu3 %v4520_v36 }
 0x380   :  { %v3849_v1 = vmax.f32 %v3847_v60, %v3848_v56  ;;  %v3413_v46 = vsub.f32 %v7292_v9, %v3357_v0  ;;  %4718 = vpow2.f32 %v3438_v31  ;;  %v3415_v59 = vsub.f32 %v7332_v35, %v3369_v13 }
 0x381   :  { %v3375_v25 = vmax.f32 %v3373_v16, %v3374_v22  ;;  %v7440_v12 = vpop.eup %4714  ;;  %v4064_v11 = vadd.f32 %v7343_v49, %v4063_v57  ;;  %vm7453_vm0 = vcmp.eq.f32.partialorder %v4069_v63, 8.507059e+37  ;;  %4720 = vpow2.f32 %v3914_v43  ;;  %4564 = vmatpush.msra.mxu3 %v4519_v4  ;;  %v7465_v63 = vpop.xlane.xlu0 %3228 }
 0x382   :  { %v3895_v35 = vsub.f32 %v7373_v55, %v3849_v1  ;;  %v3851_v54 = vmax.f32 %v7427_v15, %v3850_v20  ;;  %v3603_v38 = vsel %vm7446_vm14, %v7327_v10, %v3599_v50  ;;  %v3916_v57 = vmul.f32 1.442695, %v3893_v51  ;;  %v4517_v51 = vld [vmem:[%s8532_s6 + $0x38] sm:$0xff]  ;;  %v4516_v20 = vld [vmem:[%s8532_s6 + $0x30] sm:$0xff] }
 0x383   :  { %4722 = vpow2.f32 %v3918_v8  ;;  %v3440_v18 = vmul.f32 1.442695, %v3415_v59  ;;  %v3416_v60 = vsub.f32 %v7379_v14, %v3375_v25  ;;  %v3376_v41 = vrot.slane %v7465_v63, 4  ;;  %4565 = vmatpush.msra.mxu3 %v4518_v45  ;;  %v4514_v45 = vld [vmem:[%s8532_s6 + $0x20] sm:$0xff] }
 0x384   :  { %v3920_v0 = vmul.f32 1.442695, %v3895_v35  ;;  %v3852_v55 = vrot.slane %v3851_v54, 2  ;;  %v4101_v48 = vand.u32 2147483648, %v7377_v24  ;;  %v3621_v10 = vand.u32 2147483648, %v7382_v27  ;;  %v4515_v35 = vld [vmem:[%s8532_s6 + $0x28] sm:$0xff] }
 0x385   :  { %v3436_v33 = vmul.f32 1.442695, %v3413_v46  ;;  %4724 = vpow2.f32 %v3440_v18  ;;  %v7474_v16 = vpop.eup %4716  ;;  %v3442_v14 = vmul.f32 1.442695, %v3416_v60  ;;  %v3608_v26 = vsel %vm7421_vm13, %v7353_v30, %v3603_v38  ;;  %4566 = vmatpush.msra.mxu3 %v4517_v51 }
 0x386   :  { %4726 = vpow2.f32 %v3920_v0  ;;  %v3853_v43 = vmax.f32 %v3851_v54, %v3852_v55  ;;  %v7480_v56 = vpop.eup %4718  ;;  %v4076_v8 = vmul.f32 %v7399_v2, %v7356_v34  ;;  %v3488_v13 = vrot.slane %v7384_v52, 1 }
 0x387   :  { %v3377_v22 = vmax.f32 %v7465_v63, %v3376_v41  ;;  %v7497_v1 = vpop.eup %4720  ;;  %v4068_v30 = vsel %vm7489_vm8, %v7343_v49, %v4064_v11  ;;  %4728 = vpow2.f32 %v3916_v57  ;;  %v3502_v44 = vrot.slane %v7480_v56, 4  ;;  %4567 = vmatpush.msra.mxu3 %v4516_v20 }
 0x388   :  { %v3854_v40 = vrot.slane %v3853_v43, 1  ;;  %v4091_v46 = vmul.f32 %v7440_v12, %v7377_v24  ;;  %v7510_v59 = vor.u32 1.1754944e-38, %v4101_v48  ;;  %v7512_v25 = vor.u32 1.1754944e-38, %v3621_v10 }
 0x389   :  { %v7506_v36 = vpop.eup %4722  ;;  %4730 = vpow2.f32 %v3436_v33  ;;  %v7515_v49 = vmul.f32 %v7175_v17, %v3608_v26  ;;  %v3503_v19 = vadd.f32 %v7480_v56, %v3502_v44  ;;  %v4073_v4 = vsel %vm7453_vm0, %v7358_v32, %v4068_v30  ;;  %4568 = vmatpush.msra.mxu3 %v4515_v35  ;;  %v4513_v26 = vld [vmem:[%s8532_s6 + $0x18] sm:$0xff] }
 0x38a   :  { %v3982_v11 = vrot.slane %v7506_v36, 4  ;;  %4732 = vpow2.f32 %v3442_v14  ;;  %v7528_v38 = vadd.f32 %v3488_v13, %v7384_v52  ;;  %v3855_v17 = vmax.f32 %v3853_v43, %v3854_v40 }
 0x38b   :  { %v7522_v54 = vpop.eup %4724  ;;  %v3378_v57 = vrot.slane %v3377_v22, 2  ;;  %v4077_v0 = vsub.f32 1.0, %v4076_v8  ;;  %v3504_v60 = vrot.slane %v3503_v19, 2  ;;  %vm4081_vm9 = vweird.f32 %v7399_v2  ;;  %4569 = vmatpush.msra.mxu3 %v4514_v45 }
 0x38c   :  { %v7530_v18 = vpop.eup %4726  ;;  %v3983_v55 = vadd.f32 %v7506_v36, %v3982_v11  ;;  %v3508_v41 = vrot.slane %v7522_v54, 4  ;;  %v4092_v32 = vsub.f32 1.0, %v4091_v46  ;;  %v3611_v52 = vmul.f32 %v7474_v16, %v7382_v27  ;;  %v4512_v11 = vld [vmem:[%s8532_s6 + $0x10] sm:$0xff] }
 0x38d   :  { %v3965_v9 = vadd.f32 %v7349_v61, %v3964_v7  ;;  %v3988_v48 = vrot.slane %v7530_v18, 4  ;;  %v7544_v10 = vpop.eup %4728  ;;  %v3970_v33 = vrot.slane %v7497_v1, 4  ;;  %v3505_v14 = vadd.f32 %v3504_v60, %v3503_v19  ;;  %4570 = vmatpush.msra.mxu3 %v4513_v26 }
 0x38e   :  { %v3984_v43 = vrot.slane %v3983_v55, 2  ;;  %v3509_v51 = vadd.f32 %v7522_v54, %v3508_v41  ;;  %vm4080_vm10 = vweird.f32 %v7356_v34  ;;  %4734 = vrcp.f32 %v7528_v38  ;;  %v4511_v41 = vld [vmem:[%s8532_s6 + $0x8] sm:$0xff] }
 0x38f   :  { %v7551_v31 = vpop.eup %4730  ;;  %v8672_v7 = vrot.slane %v7365_v29, 2  ;;  %v3896_v13 = vsub.f32 %v7427_v15, %v3855_v17  ;;  %v3379_v30 = vmax.f32 %v3377_v22, %v3378_v57  ;;  %vm4095_vm11 = vweird.f32 %v7377_v24  ;;  %4571 = vmatpush.msra.mxu3 %v4512_v11  ;;  %vm7614_vm0 = vmor %vm4080_vm10, %vm4081_vm9 }
 0x390   :  { %v7561_v44 = vpop.eup %4732  ;;  %v3506_v40 = vrot.slane %v3505_v14, 1  ;;  %v3985_v20 = vadd.f32 %v3984_v43, %v3983_v55  ;;  %v3510_v46 = vrot.slane %v3509_v51, 2  ;;  %v3989_v19 = vadd.f32 %v7530_v18, %v3988_v48 }
 0x391   :  { %v7558_v8 = vadd.f32 %v8672_v7, %v7365_v29  ;;  %8673 = vst [vmem:[#allocation10_spill] sm:$0xff] %v7561_v44  ;;  %v4078_v29 = vmul.f32 %v7399_v2, %v4077_v0  ;;  %v4093_v35 = vmul.f32 %v7440_v12, %v4092_v32  ;;  %v3612_v15 = vsub.f32 1.0, %v3611_v52  ;;  %4572 = vmatpush.msra.mxu3 %v4511_v41  ;;  %v4510_v7 = vld [vmem:[%s8532_s6] sm:$0xff]  ;;  %s4591_s6 = sshll.u32 %s8533_s7, 4  ;;  %s4592_s6 = int_to_ptr.hbm [resolvable:$true] %s4591_s6 }
 0x392   :  { %v3966_v22 = vrot.slane %v3965_v9, 2  ;;  %v3971_v17 = vadd.f32 %v7497_v1, %v3970_v33  ;;  %v3976_v57 = vrot.slane %v7544_v10, 4  ;;  %v7572_v60 = vadd.f32 %v3506_v40, %v3505_v14 }
 0x393   :  { %v3986_v55 = vrot.slane %v3985_v20, 1  ;;  %v3496_v45 = vrot.slane %v7551_v31, 4  ;;  %v3514_v0 = vrot.slane %v7561_v44, 4  ;;  %v3922_v48 = vmul.f32 1.442695, %v3896_v13  ;;  %4573 = vmatpush.msra.mxu3 %v4510_v7 }
 0x394   :  { %v3380_v32 = vrot.slane %v3379_v30, 1  ;;  %v4074_v52 = vmul.f32 %v7182_v47, %v4073_v4  ;;  %v8674_v33 = vand.u32 2147483647, %v7356_v34  ;;  %vm3615_vm13 = vweird.f32 %v7382_v27  ;;  %v7591_v13 = vpop.eup %4734 }
 0x395   :  { %4736 = vrcp.f32 %v7572_v60  ;;  %v3511_v14 = vadd.f32 %v3510_v46, %v3509_v51  ;;  %v3990_v26 = vrot.slane %v3989_v19, 2  ;;  %v4079_v47 = vadd.f32 %v7399_v2, %v4078_v29  ;;  %v7606_v29 = vpop.xlane.xlu1 %3296 }
 0x396   :  { %vm7582_vm12 = vcmp.eq.f32.partialorder %v8674_v33, 8.507059e+37  ;;  %v4094_v4 = vadd.f32 %v7440_v12, %v4093_v35  ;;  %vm4096_vm15 = vweird.f32 %v7440_v12  ;;  %vm7598_vm14 = vcmp.eq.f32.partialorder %v4099_v39, 8.507059e+37 }
 0x397   :  { %v3967_v51 = vadd.f32 %v3966_v22, %v3965_v9  ;;  %v3613_v46 = vmul.f32 %v7474_v16, %v3612_v15  ;;  %v3972_v11 = vrot.slane %v3971_v17, 2  ;;  %v3977_v41 = vadd.f32 %v7544_v10, %v3976_v57  ;;  %vm7627_vm7 = vmor %vm4095_vm11, %vm4096_vm15 }
 0x398   :  { %v7604_v33 = vadd.f32 %v3986_v55, %v3985_v20  ;;  %v3497_v35 = vadd.f32 %v7551_v31, %v3496_v45  ;;  %v3515_v50 = vadd.f32 %v7561_v44, %v3514_v0  ;;  %4738 = vpow2.f32 %v3922_v48 }
 0x399   :  { %v3381_v39 = vmax.f32 %v3379_v30, %v3380_v32  ;;  %vm3616_vm8 = vweird.f32 %v7474_v16  ;;  %v3494_v20 = vrot.slane %v7558_v8, 1  ;;  %v3512_v15 = vrot.slane %v3511_v14, 1 }
 0x39a   :  { %v3991_v22 = vadd.f32 %v3990_v26, %v3989_v19  ;;  %v4083_v57 = vsel %vm7614_vm0, %v7399_v2, %v4079_v47  ;;  %v8683_v30 = vand.u32 2147483647, %v7382_v27  ;;  %v3968_v45 = vrot.slane %v3967_v51, 1 }
 0x39b   :  { %v3856_v19 = vrot.slane %v7606_v29, 4  ;;  %v3626_v2 = vmul.f32 %v7591_v13, %v7528_v38  ;;  %v7640_v0 = vpop.eup %4736  ;;  %v4098_v24 = vsel %vm7627_vm7, %v7440_v12, %v4094_v4  ;;  %v3614_v48 = vadd.f32 %v7474_v16, %v3613_v46  ;;  %vm7666_vm7 = vmor %vm3615_vm13, %vm3616_vm8 }
 0x39c   :  { %vm7633_vm9 = vcmp.eq.f32.partialorder %v8683_v30, 8.507059e+37  ;;  %v3978_v32 = vrot.slane %v3977_v41, 2  ;;  %4740 = vrcp.f32 %v7604_v33  ;;  %v3973_v26 = vadd.f32 %v3972_v11, %v3971_v17  ;;  %v4817_v30 = vld [vmem:[%s8526_s0 + $0x10] sm:$0xff] }
 0x39d   :  { %v3498_v7 = vrot.slane %v3497_v35, 2  ;;  %v3516_v47 = vrot.slane %v3515_v50, 2  ;;  %v3417_v9 = vsub.f32 %v7465_v63, %v3381_v39  ;;  %v7651_v44 = vmul.f32 %v4817_v30, %v4074_v52 }
 0x39e   :  { %v3671_v34 = vmul.f32 %v7640_v0, %v7572_v60  ;;  %v7655_v12 = vadd.f32 %v3512_v15, %v3511_v14  ;;  %v3992_v4 = vrot.slane %v3991_v22, 1  ;;  %v7657_v46 = vpop.eup %4738  ;;  %v4088_v17 = vsel %vm7582_vm12, %v7403_v21, %v4083_v57 }
 0x39f   :  { %8686 = vst [vmem:[#allocation19_spill] sm:$0xff] %v7651_v44  ;;  %v7671_v52 = vadd.f32 %v3494_v20, %v7558_v8  ;;  %v3857_v14 = vmax.f32 %v7606_v29, %v3856_v19  ;;  %v3627_v11 = vsub.f32 1.0, %v3626_v2  ;;  %v4103_v39 = vsel %vm7598_vm14, %v7510_v59, %v4098_v24 }
 0x3a0   :  { %v3618_v21 = vsel %vm7666_vm7, %v7474_v16, %v3614_v48  ;;  %v7680_v43 = vadd.f32 %v3968_v45, %v3967_v51  ;;  %v3979_v27 = vadd.f32 %v3978_v32, %v3977_v41  ;;  %v3974_v15 = vrot.slane %v3973_v26, 1 }
 0x3a1   :  { %v3499_v57 = vadd.f32 %v3498_v7, %v3497_v35  ;;  %v3517_v30 = vadd.f32 %v3516_v47, %v3515_v50  ;;  %v3444_v44 = vmul.f32 1.442695, %v3417_v9  ;;  %v3672_v20 = vsub.f32 1.0, %v3671_v34 }
 0x3a2   :  { %v7682_v8 = vpop.eup %4740  ;;  %4742 = vrcp.f32 %v7655_v12  ;;  %v7685_v19 = vadd.f32 %v3992_v4, %v3991_v22  ;;  %v3994_v59 = vrot.slane %v7657_v46, 4  ;;  %v7689_v40 = vmul.f32 %v7242_v6, %v4088_v17 }
 0x3a3   :  { %4744 = vrcp.f32 %v7671_v52  ;;  %v3858_v16 = vrot.slane %v3857_v14, 2  ;;  %v3628_v51 = vmul.f32 %v7591_v13, %v3627_v11  ;;  %v7694_v50 = vmul.f32 %v7259_v28, %v4103_v39 }
 0x3a4   :  { %v3623_v41 = vsel %vm7633_vm9, %v7512_v25, %v3618_v21  ;;  %4746 = vrcp.f32 %v7680_v43  ;;  %v3980_v35 = vrot.slane %v3979_v27, 1  ;;  %v7700_v22 = vadd.f32 %v3974_v15, %v3973_v26 }
 0x3a5   :  { %v3500_v45 = vrot.slane %v3499_v57, 1  ;;  %v4151_v6 = vmul.f32 %v7682_v8, %v7604_v33  ;;  %4748 = vpow2.f32 %v3444_v44  ;;  %v3673_v2 = vmul.f32 %v7640_v0, %v3672_v20 }
 0x3a6   :  { %4750 = vrcp.f32 %v7685_v19  ;;  %v3518_v28 = vrot.slane %v3517_v30, 1  ;;  %v3995_v24 = vadd.f32 %v7657_v46, %v3994_v59  ;;  %v3859_v48 = vmax.f32 %v3857_v14, %v3858_v16 }
 0x3a7   :  { %v3629_v25 = vadd.f32 %v7591_v13, %v3628_v51  ;;  %vm3631_vm10 = vweird.f32 %v7591_v13  ;;  %v3634_v55 = vand.u32 2147483647, %v7528_v38  ;;  %v7713_v26 = vmul.f32 %v7266_v5, %v3623_v41  ;;  %v7761_v51 = vpop.xlane.xlu2 %3231 }
 0x3a8   :  { %v7710_v32 = vpop.eup %4742  ;;  %v7715_v44 = vadd.f32 %v3980_v35, %v3979_v27  ;;  %vm3630_vm11 = vweird.f32 %v7528_v38  ;;  %v3636_v7 = vand.u32 2147483648, %v7528_v38  ;;  %4752 = vrcp.f32 %v7700_v22 }
 0x3a9   :  { %v7719_v47 = vpop.eup %4744  ;;  %v7722_v9 = vadd.f32 %v3500_v45, %v3499_v57  ;;  %v3681_v34 = vand.u32 2147483648, %v7572_v60  ;;  %v4152_v4 = vsub.f32 1.0, %v4151_v6  ;;  %v3674_v5 = vadd.f32 %v7640_v0, %v3673_v2  ;;  %vm7733_vm13 = vmor %vm3630_vm11, %vm3631_vm10 }
 0x3aa   :  { %v7725_v17 = vpop.eup %4746  ;;  %vm3676_vm12 = vweird.f32 %v7640_v0  ;;  %v7729_v63 = vadd.f32 %v3518_v28, %v3517_v30  ;;  %v3996_v14 = vrot.slane %v3995_v24, 2  ;;  %v3686_v39 = vmul.f32 %v7710_v32, %v7655_v12 }
 0x3ab   :  { %v7737_v11 = vpop.eup %4748  ;;  %v3860_v21 = vrot.slane %v3859_v48, 1  ;;  %v3633_v27 = vsel %vm7733_vm13, %v7591_v13, %v3629_v25  ;;  %vm7744_vm15 = vcmp.eq.f32.partialorder %v3634_v55, 8.507059e+37  ;;  %4754 = vrcp.f32 %v7715_v44 }
 0x3ac   :  { %8691 = vst [vmem:[#allocation20_spill] sm:$0xff] %v7737_v11  ;;  %v7748_v57 = vpop.eup %4750  ;;  %vm3675_vm14 = vweird.f32 %v7572_v60  ;;  %v3679_v30 = vand.u32 2147483647, %v7572_v60  ;;  %v3637_v20 = vor.u32 1.1754944e-38, %v3636_v7  ;;  %4756 = vrcp.f32 %v7722_v9 }
 0x3ad   :  { %vm7756_vm0 = vmor %vm3675_vm14, %vm3676_vm12  ;;  %v3682_v13 = vor.u32 1.1754944e-38, %v3681_v34  ;;  %v4153_v16 = vmul.f32 %v7682_v8, %v4152_v4  ;;  %v7765_v41 = vmul.f32 %v7719_v47, %v7671_v52  ;;  %4758 = vrcp.f32 %v7729_v63 }
 0x3ae   :  { %v3678_v60 = vsel %vm7756_vm0, %v7640_v0, %v3674_v5  ;;  %v3997_v35 = vadd.f32 %v3996_v14, %v3995_v24  ;;  %v3520_v45 = vrot.slane %v7737_v11, 4  ;;  %v7772_v6 = vpop.eup %4752  ;;  %v4159_v2 = vand.u32 2147483647, %v7604_v33 }
 0x3af   :  { %v3687_v28 = vsub.f32 1.0, %v3686_v39  ;;  %v4166_v25 = vmul.f32 %v7748_v57, %v7685_v19  ;;  %v3861_v55 = vmax.f32 %v3859_v48, %v3860_v21  ;;  %vm3680_vm8 = vcmp.eq.f32.partialorder %v3679_v30, 8.507059e+37 }
 0x3b0   :  { %v4161_v7 = vand.u32 2147483648, %v7604_v33  ;;  %v3694_v34 = vand.u32 2147483647, %v7655_v12  ;;  %v3382_v0 = vrot.slane %v7761_v51, 4  ;;  %v3683_v4 = vsel %vm3680_vm8, %v3682_v13, %v3678_v60 }
 0x3b1   :  { %v4154_v24 = vadd.f32 %v7682_v8, %v4153_v16  ;;  %vm4156_vm9 = vweird.f32 %v7682_v8  ;;  %v3696_v5 = vand.u32 2147483648, %v7655_v12  ;;  %v7783_v14 = vpop.eup %4754  ;;  %vm4155_vm7 = vweird.f32 %v7604_v33 }
 0x3b2   :  { %v3998_v38 = vrot.slane %v3997_v35, 1  ;;  %v3521_v48 = vadd.f32 %v7737_v11, %v3520_v45  ;;  %v7789_v39 = vsel %vm7744_vm15, %v3637_v20, %v3633_v27  ;;  %v7791_v21 = vpop.eup %4756  ;;  %vm7793_vm10 = vcmp.eq.f32.partialorder %v4159_v2, 8.507059e+37  ;;  %vm7802_vm11 = vmor %vm4155_vm7, %vm4156_vm9 }
 0x3b3   :  { %v3688_v59 = vmul.f32 %v7710_v32, %v3687_v28  ;;  %v4167_v13 = vsub.f32 1.0, %v4166_v25  ;;  %v3897_v16 = vsub.f32 %v7606_v29, %v3861_v55  ;;  %v7799_v60 = vpop.eup %4758  ;;  %v3684_v33 = vmul.f32 %v7480_v56, %v3683_v4  ;;  %v4818_v4 = vld [vmem:[%s8527_s1 + $0x40] sm:$0xff] }
 0x3b4   :  { %v4162_v27 = vor.u32 1.1754944e-38, %v4161_v7  ;;  %vm3690_vm12 = vweird.f32 %v7655_v12  ;;  %v3383_v15 = vmax.f32 %v7761_v51, %v3382_v0  ;;  %v4158_v20 = vsel %vm7802_vm11, %v7682_v8, %v4154_v24 }
 0x3b5   :  { %vm7811_vm13 = vcmp.eq.f32.partialorder %v3694_v34, 8.507059e+37  ;;  %v3697_v29 = vor.u32 1.1754944e-38, %v3696_v5  ;;  %vm4170_vm15 = vweird.f32 %v7685_v19  ;;  %v4174_v56 = vand.u32 2147483647, %v7685_v19 }
 0x3b6   :  { %v3924_v28 = vmul.f32 1.442695, %v3897_v16  ;;  %vm3691_vm14 = vweird.f32 %v7710_v32  ;;  %v7818_v25 = vadd.f32 %v3998_v38, %v3997_v35  ;;  %v3522_v55 = vrot.slane %v3521_v48, 2 }
 0x3b7   :  { %v3384_v7 = vrot.slane %v3383_v15, 2  ;;  %v3689_v0 = vadd.f32 %v7710_v32, %v3688_v59  ;;  %v4168_v8 = vmul.f32 %v7748_v57, %v4167_v13  ;;  %v3701_v34 = vmul.f32 %v7799_v60, %v7729_v63  ;;  %vm7842_vm8 = vmor %vm3690_vm12, %vm3691_vm14 }
 0x3b8   :  { %4760 = vpow2.f32 %v3924_v28  ;;  %v4278_v24 = vmul.f32 %v4818_v4, %v3684_v33  ;;  %v4163_v5 = vsel %vm7793_vm10, %v4162_v27, %v4158_v20  ;;  %v4176_v35 = vand.u32 2147483648, %v7685_v19 }
 0x3b9   :  { %v3385_v38 = vmax.f32 %v3383_v15, %v3384_v7  ;;  %vm7830_vm0 = vcmp.eq.f32.partialorder %v4174_v56, 8.507059e+37  ;;  %v3711_v59 = vand.u32 2147483648, %v7729_v63  ;;  %v3642_v13 = vsub.f32 1.0, %v7765_v41 }
 0x3ba   :  { %v3656_v45 = vmul.f32 %v7791_v21, %v7722_v9  ;;  %vm4171_vm9 = vweird.f32 %v7748_v57  ;;  %4762 = vrcp.f32 %v7818_v25  ;;  %v3523_v33 = vadd.f32 %v3522_v55, %v3521_v48 }
 0x3bb   :  { %v3386_v27 = vrot.slane %v3385_v38, 1  ;;  %v4164_v15 = vmul.f32 %v7506_v36, %v4163_v5  ;;  %v3693_v41 = vsel %vm7842_vm8, %v7710_v32, %v3689_v0  ;;  %v4169_v20 = vadd.f32 %v7748_v57, %v4168_v8  ;;  %vm7866_vm10 = vmor %vm4170_vm15, %vm4171_vm9  ;;  %v4819_v5 = vld [vmem:[%s8526_s0 + $0x40] sm:$0xff] }
 0x3bc   :  { %v3702_v56 = vsub.f32 1.0, %v3701_v34  ;;  %v4334_v12 = vrot.slane %v4278_v24, 4  ;;  %v4177_v28 = vor.u32 1.1754944e-38, %v4176_v35  ;;  %v3657_v4 = vsub.f32 1.0, %v3656_v45 }
 0x3bd   :  { %v3387_v7 = vmax.f32 %v3385_v38, %v3386_v27  ;;  %vm3705_vm7 = vweird.f32 %v7729_v63  ;;  %v3709_v48 = vand.u32 2147483647, %v7729_v63  ;;  %v7857_v55 = vor.u32 1.1754944e-38, %v3711_v59 }
 0x3be   :  { %v7853_v11 = vpop.eup %4760  ;;  %v3643_v36 = vmul.f32 %v7719_v47, %v3642_v13  ;;  %v3698_v32 = vsel %vm7811_vm13, %v3697_v29, %v3693_v41  ;;  %vm3706_vm11 = vweird.f32 %v7799_v60  ;;  %v7876_v2 = vmul.f32 %v4819_v5, %v4164_v15 }
 0x3bf   :  { %v4000_v8 = vrot.slane %v7853_v11, 4  ;;  %v3418_v34 = vsub.f32 %v7761_v51, %v3387_v7  ;;  %v4173_v19 = vsel %vm7866_vm10, %v7748_v57, %v4169_v20  ;;  %v3703_v29 = vmul.f32 %v7799_v60, %v3702_v56 }
 0x3c0   :  { %v3524_v35 = vrot.slane %v3523_v33, 1  ;;  %v7882_v38 = vpop.eup %4762  ;;  %v7884_v59 = vadd.f32 %v4334_v12, %v4278_v24  ;;  %v3658_v51 = vmul.f32 %v7791_v21, %v3657_v4  ;;  %v4106_v45 = vmul.f32 %v7725_v17, %v7680_v43 }
 0x3c1   :  { %v3446_v13 = vmul.f32 1.442695, %v3418_v34  ;;  %v7890_v30 = vmul.f32 %v7522_v54, %v3698_v32  ;;  %v4001_v27 = vadd.f32 %v7853_v11, %v4000_v8  ;;  %v3644_v57 = vadd.f32 %v7719_v47, %v3643_v36 }
 0x3c2   :  { %vm3646_vm12 = vweird.f32 %v7719_v47  ;;  %v4178_v15 = vsel %vm7830_vm0, %v4177_v28, %v4173_v19  ;;  %v3651_v41 = vand.u32 2147483648, %v7671_v52  ;;  %v4181_v54 = vmul.f32 %v7882_v38, %v7818_v25  ;;  %vm7923_vm0 = vmor %vm3705_vm7, %vm3706_vm11 }
 0x3c3   :  { %4764 = vpow2.f32 %v3446_v13  ;;  %vm3645_vm13 = vweird.f32 %v7671_v52  ;;  %v3649_v56 = vand.u32 2147483647, %v7671_v52  ;;  %v7905_v12 = vadd.f32 %v7799_v60, %v3703_v29 }
 0x3c4   :  { %vm7907_vm15 = vmor %vm3645_vm13, %vm3646_vm12  ;;  %v3659_v28 = vadd.f32 %v7791_v21, %v3658_v51  ;;  %vm3661_vm14 = vweird.f32 %v7791_v21  ;;  %v4107_v7 = vsub.f32 1.0, %v4106_v45  ;;  %v4002_v4 = vrot.slane %v4001_v27, 2 }
 0x3c5   :  { %v3648_v36 = vsel %vm7907_vm15, %v7719_v47, %v3644_v57  ;;  %v3666_v32 = vand.u32 2147483648, %v7722_v9  ;;  %v4121_v52 = vmul.f32 %v7772_v6, %v7700_v22  ;;  %v7927_v8 = vadd.f32 %v3524_v35, %v3523_v33 }
 0x3c6   :  { %v3652_v34 = vor.u32 1.1754944e-38, %v3651_v41  ;;  %vm3660_vm8 = vweird.f32 %v7722_v9  ;;  %v3664_v47 = vand.u32 2147483647, %v7722_v9  ;;  %v7932_v5 = vmul.f32 %v7530_v18, %v4178_v15 }
 0x3c7   :  { %v4182_v19 = vsub.f32 1.0, %v4181_v54  ;;  %vm3650_vm9 = vcmp.eq.f32.partialorder %v3649_v56, 8.507059e+37  ;;  %vm7934_vm10 = vmor %vm3660_vm8, %vm3661_vm14  ;;  %v4136_v13 = vmul.f32 %v7783_v14, %v7715_v44  ;;  %v3708_v33 = vsel %vm7923_vm0, %v7799_v60, %v7905_v12 }
 0x3c8   :  { %v3653_v9 = vsel %vm3650_vm9, %v3652_v34, %v3648_v36  ;;  %v3663_v18 = vsel %vm7934_vm10, %v7791_v21, %v3659_v28  ;;  %v4108_v35 = vmul.f32 %v7725_v17, %v4107_v7  ;;  %v4003_v45 = vadd.f32 %v4002_v4, %v4001_v27 }
 0x3c9   :  { %v7940_v51 = vpop.eup %4764  ;;  %v3667_v15 = vor.u32 1.1754944e-38, %v3666_v32  ;;  %v4122_v41 = vsub.f32 1.0, %v4121_v52  ;;  %4766 = vrcp.f32 %v7927_v8  ;;  %v3639_v54 = vmul.f32 %v7311_v37, %v7789_v39 }
 0x3ca   :  { %v3526_v57 = vrot.slane %v7940_v51, 4  ;;  %vm3665_vm7 = vcmp.eq.f32.partialorder %v3664_v47, 8.507059e+37  ;;  %v4137_v56 = vsub.f32 1.0, %v4136_v13  ;;  %v7955_v16 = vmul.f32 %v7882_v38, %v4182_v19 }
 0x3cb   :  { %v3668_v21 = vsel %vm3665_vm7, %v3667_v15, %v3663_v18  ;;  %v4114_v28 = vand.u32 2147483647, %v7680_v43  ;;  %v3654_v27 = vmul.f32 %v7317_v58, %v3653_v9  ;;  %v4109_v7 = vadd.f32 %v7725_v17, %v4108_v35  ;;  %v4820_v58 = vld [vmem:[%s8527_s1 + $0x18] sm:$0xff] }
 0x3cc   :  { %v3527_v36 = vadd.f32 %v7940_v51, %v3526_v57  ;;  %vm4111_vm11 = vweird.f32 %v7725_v17  ;;  %v4116_v4 = vand.u32 2147483648, %v7680_v43  ;;  %v4004_v32 = vrot.slane %v4003_v45, 1  ;;  %v4822_v57 = vld [vmem:[%s8527_s1 + $0x28] sm:$0xff] }
 0x3cd   :  { %vm4110_vm12 = vweird.f32 %v7680_v43  ;;  %v4123_v37 = vmul.f32 %v7772_v6, %v4122_v41  ;;  %v4129_v39 = vand.u32 2147483647, %v7700_v22  ;;  %v3669_v52 = vmul.f32 %v7551_v31, %v3668_v21  ;;  %v4821_v31 = vld [vmem:[%s8527_s1 + $0x20] sm:$0xff] }
 0x3ce   :  { %vm4125_vm13 = vweird.f32 %v7700_v22  ;;  %v4138_v34 = vmul.f32 %v7783_v14, %v4137_v56  ;;  %v4273_v47 = vmul.f32 %v4820_v58, %v7515_v49  ;;  %v3528_v19 = vrot.slane %v3527_v36, 2  ;;  %vm7973_vm15 = vmor %vm4110_vm12, %vm4111_vm11 }
 0x3cf   :  { %vm7977_vm14 = vcmp.eq.f32.partialorder %v4114_v28, 8.507059e+37  ;;  %vm4126_vm8 = vweird.f32 %v7772_v6  ;;  %v4274_v13 = vmul.f32 %v4821_v31, %v7713_v26  ;;  %v7986_v9 = vpop.eup %4766  ;;  %v4113_v49 = vsel %vm7973_vm15, %v7725_v17, %v4109_v7 }
 0x3d0   :  { %v4117_v18 = vor.u32 1.1754944e-38, %v4116_v4  ;;  %v4131_v35 = vand.u32 2147483648, %v7700_v22  ;;  %v4275_v15 = vmul.f32 %v4822_v57, %v3639_v54  ;;  %v7995_v41 = vadd.f32 %v4004_v32, %v4003_v45  ;;  %v4823_v45 = vld [vmem:[%s8527_s1 + $0x30] sm:$0xff]  ;;  %vm8015_vm11 = vmor %vm4125_vm13, %vm4126_vm8 }
 0x3d1   :  { %v4124_v56 = vadd.f32 %v7772_v6, %v4123_v37  ;;  %vm7998_vm9 = vcmp.eq.f32.partialorder %v4129_v39, 8.507059e+37  ;;  %vm4140_vm10 = vweird.f32 %v7715_v44  ;;  %vm4141_vm7 = vweird.f32 %v7783_v14 }
 0x3d2   :  { %v4139_v17 = vadd.f32 %v7783_v14, %v4138_v34  ;;  %v4146_v21 = vand.u32 2147483648, %v7715_v44  ;;  %v4298_v28 = vrot.slane %v7339_v53, 4  ;;  %v4304_v7 = vrot.slane %v4273_v47, 4  ;;  %vm8027_vm12 = vmor %vm4140_vm10, %vm4141_vm7 }
 0x3d3   :  { %v3529_v54 = vadd.f32 %v3528_v19, %v3527_v36  ;;  %v4276_v4 = vmul.f32 %v4823_v45, %v3654_v27  ;;  %v4288_v32 = vrot.slane %v7322_v3, 2  ;;  %v4310_v37 = vrot.slane %v4274_v13, 4 }
 0x3d4   :  { %v4294_v34 = vrot.slane %v7324_v23, 2  ;;  %v4299_v36 = vadd.f32 %v4298_v28, %v7339_v53  ;;  %v4305_v58 = vadd.f32 %v4304_v7, %v4273_v47  ;;  %v4316_v19 = vrot.slane %v4275_v15, 4  ;;  %v4824_v53 = vld [vmem:[%s8527_s1 + $0x38] sm:$0xff] }
 0x3d5   :  { %v4118_v27 = vsel %vm7977_vm14, %v4117_v18, %v4113_v49  ;;  %v4132_v29 = vor.u32 1.1754944e-38, %v4131_v35  ;;  %v4144_v31 = vand.u32 2147483647, %v7715_v44  ;;  %v4277_v47 = vmul.f32 %v4824_v53, %v3669_v52 }
 0x3d6   :  { %v4128_v43 = vsel %vm8015_vm11, %v7772_v6, %v4124_v56  ;;  %v4143_v49 = vsel %vm8027_vm12, %v7783_v14, %v4139_v17  ;;  %v4147_v18 = vor.u32 1.1754944e-38, %v4146_v21  ;;  %v4300_v35 = vrot.slane %v4299_v36, 2 }
 0x3d7   :  { %v3530_v57 = vrot.slane %v3529_v54, 1  ;;  %v4289_v28 = vadd.f32 %v4288_v32, %v7322_v3  ;;  %v4306_v7 = vrot.slane %v4305_v58, 2  ;;  %v4311_v44 = vadd.f32 %v4310_v37, %v4274_v13 }
 0x3d8   :  { %v4295_v45 = vadd.f32 %v4294_v34, %v7324_v23  ;;  %v4301_v20 = vadd.f32 %v4300_v35, %v4299_v36  ;;  %v4317_v24 = vadd.f32 %v4316_v19, %v4275_v15  ;;  %v4322_v52 = vrot.slane %v4276_v4, 4  ;;  %v4825_v19 = vld [vmem:[%s8526_s0 + $0x18] sm:$0xff] }
 0x3d9   :  { %vm4145_vm13 = vcmp.eq.f32.partialorder %v4144_v31, 8.507059e+37  ;;  %v4307_v53 = vadd.f32 %v4306_v7, %v4305_v58  ;;  %v4312_v39 = vrot.slane %v4311_v44, 2  ;;  %v4328_v6 = vrot.slane %v4277_v47, 4 }
 0x3da   :  { %v4133_v56 = vsel %vm7998_vm9, %v4132_v29, %v4128_v43  ;;  %v4148_v14 = vsel %vm4145_vm13, %v4147_v18, %v4143_v49  ;;  %v4318_v17 = vrot.slane %v4317_v24, 2  ;;  %v4323_v21 = vadd.f32 %v4322_v52, %v4276_v4 }
 0x3db   :  { %v8045_v22 = vadd.f32 %v3530_v57, %v3529_v54  ;;  %v4290_v3 = vrot.slane %v4289_v28, 1  ;;  %v4313_v32 = vadd.f32 %v4312_v39, %v4311_v44  ;;  %v4329_v13 = vadd.f32 %v4328_v6, %v4277_v47  ;;  %v4828_v39 = vld [vmem:[%s8526_s0 + $0x30] sm:$0xff] }
 0x3dc   :  { %v4296_v37 = vrot.slane %v4295_v45, 1  ;;  %v4302_v23 = vrot.slane %v4301_v20, 1  ;;  %v4308_v34 = vrot.slane %v4307_v53, 1  ;;  %v4319_v15 = vadd.f32 %v4318_v17, %v4317_v24  ;;  %v4826_v24 = vld [vmem:[%s8526_s0 + $0x20] sm:$0xff]  ;;  %v4829_v17 = vld [vmem:[%s8526_s0 + $0x38] sm:$0xff] }
 0x3dd   :  { %v8049_v36 = vmul.f32 %v7986_v9, %v7927_v8  ;;  %4768 = vrcp.f32 %v7995_v41  ;;  %v4119_v26 = vmul.f32 %v7349_v61, %v4118_v27  ;;  %v4314_v58 = vrot.slane %v4313_v32, 1 }
 0x3de   :  { %v4134_v4 = vmul.f32 %v7497_v1, %v4133_v56  ;;  %v4324_v54 = vrot.slane %v4323_v21, 2  ;;  %v4385_v29 = vmul.f32 %v4825_v19, %v7689_v40  ;;  %v4386_v31 = vmul.f32 %v4826_v24, %v7694_v50  ;;  %v4827_v40 = vld [vmem:[%s8526_s0 + $0x28] sm:$0xff] }
 0x3df   :  { %4770 = vrcp.f32 %v8045_v22  ;;  %v4149_v61 = vmul.f32 %v7544_v10, %v4148_v14  ;;  %v4291_v27 = vadd.f32 %v4290_v3, %v4289_v28  ;;  %v4330_v47 = vrot.slane %v4329_v13, 2  ;;  %v8724_v10 = vld [vmem:[#allocation19_spill] sm:$0xff] }
 0x3e0   :  { %v4297_v1 = vadd.f32 %v4296_v37, %v4295_v45  ;;  %v8064_v43 = vadd.f32 %v4302_v23, %v4301_v20  ;;  %v8066_v49 = vadd.f32 %v4308_v34, %v4307_v53  ;;  %v4320_v18 = vrot.slane %v4319_v15, 1 }
 0x3e1   :  { %v4315_v35 = vadd.f32 %v4314_v58, %v4313_v32  ;;  %v4387_v57 = vmul.f32 %v4827_v40, %v4119_v26  ;;  %v4400_v50 = vrot.slane %v7334_v42, 2  ;;  %v4406_v7 = vrot.slane %v7329_v62, 2 }
 0x3e2   :  { %v8073_v44 = vadd.f32 %v4324_v54, %v4323_v21  ;;  %v4410_v28 = vrot.slane %v8724_v10, 4  ;;  %v4416_v45 = vrot.slane %v4385_v29, 4  ;;  %v4422_v20 = vrot.slane %v4386_v31, 4 }
 0x3e3   :  { %v8076_v52 = vpop.eup %4768  ;;  %v4331_v53 = vadd.f32 %v4330_v47, %v4329_v13  ;;  %v4388_v6 = vmul.f32 %v4828_v39, %v4134_v4  ;;  %v4401_v56 = vadd.f32 %v4400_v50, %v7334_v42  ;;  %v4407_v14 = vadd.f32 %v4406_v7, %v7329_v62 }
 0x3e4   :  { %v4389_v21 = vmul.f32 %v4829_v17, %v4149_v61  ;;  %v4411_v3 = vadd.f32 %v4410_v28, %v8724_v10  ;;  %v4417_v32 = vadd.f32 %v4416_v45, %v4385_v29  ;;  %v4423_v37 = vadd.f32 %v4422_v20, %v4386_v31  ;;  %v8090_v31 = vpop.xlane.xlu1 %3234 }
 0x3e5   :  { %v8087_v23 = vpop.eup %4770  ;;  %v4321_v13 = vadd.f32 %v4320_v18, %v4319_v15  ;;  %v4402_v34 = vrot.slane %v4401_v56, 1  ;;  %v4408_v26 = vrot.slane %v4407_v14, 1  ;;  %v4428_v58 = vrot.slane %v4387_v57, 4 }
 0x3e6   :  { %v4326_v4 = vrot.slane %v8073_v44, 1  ;;  %v4412_v42 = vrot.slane %v4411_v3, 2  ;;  %v4418_v54 = vrot.slane %v4417_v32, 2  ;;  %v4424_v62 = vrot.slane %v4423_v37, 2 }
 0x3e7   :  { %v4403_v19 = vadd.f32 %v4402_v34, %v4401_v56  ;;  %v4409_v24 = vadd.f32 %v4408_v26, %v4407_v14  ;;  %v4429_v47 = vadd.f32 %v4428_v58, %v4387_v57  ;;  %v4434_v40 = vrot.slane %v4388_v6, 4 }
 0x3e8   :  { %v4413_v61 = vadd.f32 %v4412_v42, %v4411_v3  ;;  %v4419_v50 = vadd.f32 %v4418_v54, %v4417_v32  ;;  %v4425_v7 = vadd.f32 %v4424_v62, %v4423_v37  ;;  %v4440_v29 = vrot.slane %v4389_v21, 4  ;;  %v8103_v62 = vpop.xlane.xlu0 %3299 }
 0x3e9   :  { %v4430_v10 = vrot.slane %v4429_v47, 2  ;;  %v4435_v15 = vadd.f32 %v4434_v40, %v4388_v6  ;;  %v4494_v18 = vadd.f32 %v4403_v19, %v4291_v27  ;;  %v4495_v28 = vadd.f32 %v4409_v24, %v4297_v1 }
 0x3ea   :  { %v4414_v45 = vrot.slane %v4413_v61, 1  ;;  %v4420_v20 = vrot.slane %v4419_v50, 1  ;;  %v4426_v39 = vrot.slane %v4425_v7, 1  ;;  %v4441_v17 = vadd.f32 %v4440_v29, %v4389_v21 }
 0x3eb   :  { %vm8094_vm15 = vcmp.eq.f32.partialorder %v3709_v48, 8.507059e+37  ;;  %v4332_v57 = vrot.slane %v4331_v53, 1  ;;  %v4431_v14 = vadd.f32 %v4430_v10, %v4429_v47  ;;  %v4436_v3 = vrot.slane %v4435_v15, 2 }
 0x3ec   :  { %v3388_v32 = vrot.slane %v8090_v31, 4  ;;  %v4415_v37 = vadd.f32 %v4414_v45, %v4413_v61  ;;  %v4421_v34 = vadd.f32 %v4420_v20, %v4419_v50  ;;  %v4427_v6 = vadd.f32 %v4426_v39, %v4425_v7 }
 0x3ed   :  { %v4442_v27 = vrot.slane %v4441_v17, 2  ;;  %v4432_v1 = vrot.slane %v4431_v14, 1  ;;  %v4437_v26 = vadd.f32 %v4436_v3, %v4435_v15  ;;  %v4542_v58 = vsel %vm3007_vm1, %v4495_v28, %v4494_v18  ;;  %v4830_v15 = vld [vmem:[%s8527_s1 + $0x48] sm:$0xff] }
 0x3ee   :  { %v3389_v21 = vmax.f32 %v8090_v31, %v3388_v32  ;;  %v4496_v48 = vadd.f32 %v4415_v37, %v8064_v43  ;;  %v4497_v42 = vadd.f32 %v4421_v34, %v8066_v49  ;;  %v4498_v54 = vadd.f32 %v4427_v6, %v4315_v35 }
 0x3ef   :  { %v4443_v63 = vadd.f32 %v4442_v27, %v4441_v17  ;;  %v4433_v19 = vadd.f32 %v4432_v1, %v4431_v14  ;;  %v4438_v24 = vrot.slane %v4437_v26, 1  ;;  %v3862_v40 = vrot.slane %v8103_v62, 4 }
 0x3f0   :  { %v3390_v47 = vrot.slane %v3389_v21, 2  ;;  %vm4185_vm14 = vweird.f32 %v7818_v25  ;;  %v4327_v61 = vadd.f32 %v4326_v4, %v8073_v44  ;;  %v4333_v50 = vadd.f32 %v4332_v57, %v4331_v53  ;;  %v4831_v53 = vld [vmem:[%s8526_s0 + $0x48] sm:$0xff] }
 0x3f1   :  { %v4444_v7 = vrot.slane %v4443_v63, 1  ;;  %v4543_v29 = vsel %vm3009_vm2, %v4496_v48, %v4542_v58  ;;  %v4439_v10 = vadd.f32 %v4438_v24, %v4437_v26  ;;  %v4499_v43 = vadd.f32 %v4433_v19, %v4321_v13  ;;  %v8732_v58 = vld [vmem:[#allocation10_spill] sm:$0xff] }
 0x3f2   :  { %v4544_v49 = vsel %vm3011_vm3, %v4497_v42, %v4543_v29  ;;  %v3391_v35 = vmax.f32 %v3389_v21, %v3390_v47  ;;  %v4279_v18 = vmul.f32 %v4830_v15, %v7890_v30  ;;  %v3717_v28 = vsub.f32 1.0, %v8049_v36  ;;  %v4832_v29 = vld [vmem:[%s8527_s1 + $0x50] sm:$0xff] }
 0x3f3   :  { %v4445_v45 = vadd.f32 %v4444_v7, %v4443_v63  ;;  %v3863_v44 = vmax.f32 %v8103_v62, %v3862_v40  ;;  %v4391_v13 = vmul.f32 %v4831_v53, %v7932_v5  ;;  %v4500_v4 = vadd.f32 %v4439_v10, %v4327_v61  ;;  %v8175_v7 = vpop.xlane.xlu2 %3302 }
 0x3f4   :  { %v4545_v20 = vsel %vm3013_vm4, %v4498_v54, %v4544_v49  ;;  %v3392_v39 = vrot.slane %v3391_v35, 1  ;;  %v3713_v30 = vsel %vm8094_vm15, %v7857_v55, %v3708_v33  ;;  %v4184_v5 = vadd.f32 %v7882_v38, %v7955_v16 }
 0x3f5   :  { %v4501_v36 = vadd.f32 %v4445_v45, %v4333_v50  ;;  %v4546_v17 = vsel %vm3015_vm5, %v4499_v43, %v4545_v20  ;;  %v3864_v57 = vrot.slane %v3863_v44, 2  ;;  %vm4186_vm8 = vweird.f32 %v7882_v38 }
 0x3f6   :  { %v4547_v14 = vsel %vm8557_vm6, %v4500_v4, %v4546_v17  ;;  %v3393_v3 = vmax.f32 %v3391_v35, %v3392_v39  ;;  %v3718_v0 = vmul.f32 %v7986_v9, %v3717_v28  ;;  %v4196_v60 = vmul.f32 %v8076_v52, %v7995_v41  ;;  %vm8158_vm10 = vmor %vm4185_vm14, %vm4186_vm8 }
 0x3f7   :  { %vm8727_vm0 = vcmask 1047559   ;;  %v3865_v55 = vmax.f32 %v3863_v44, %v3864_v57  ;;  %v4340_v33 = vrot.slane %v4279_v18, 4  ;;  %v8728_v56 = vand.u32 2147483647, %v7818_v25 }
 0x3f8   :  { %v4548_v12 = vsel %vm8727_vm0, %v4501_v36, %v4547_v14  ;;  %v4191_v16 = vand.u32 2147483648, %v7818_v25  ;;  %v3419_v37 = vsub.f32 %v8090_v31, %v3393_v3  ;;  %v8731_v34 = vrot.slane %v7876_v2, 4 }
 0x3f9   :  { %vm8140_vm9 = vcmp.eq.f32.partialorder %v8728_v56, 8.507059e+37  ;;  %4574 = vmatmul.f32.vlgmr.msra.gmra.mxu3 %v4548_v12  ;;  %v4452_v27 = vrot.slane %v4391_v13, 4  ;;  %v3731_v1 = vmul.f32 %v8087_v23, %v8045_v22  ;;  %v3866_v26 = vrot.slane %v3865_v55, 1  ;;  %v8225_v56 = vpop.xlane.xlu1 %3305 }
 0x3fa   :  { %v8149_v6 = vadd.f32 %v8731_v34, %v7876_v2  ;;  %v3714_v21 = vmul.f32 %v8732_v58, %v3713_v30  ;;  %vm3721_vm7 = vweird.f32 %v7986_v9  ;;  %v3726_v2 = vand.u32 2147483648, %v7927_v8 }
 0x3fb   :  { %v3448_v31 = vmul.f32 1.442695, %v3419_v37  ;;  %v4188_v48 = vsel %vm8158_vm10, %v7882_v38, %v4184_v5  ;;  %v3719_v42 = vadd.f32 %v7986_v9, %v3718_v0  ;;  %v4197_v54 = vsub.f32 1.0, %v4196_v60  ;;  %v8177_v38 = vpop.xlane.xlu0 %3237 }
 0x3fc   :  { %v3867_v19 = vmax.f32 %v3865_v55, %v3866_v26  ;;  %v8168_v24 = vadd.f32 %v4340_v33, %v4279_v18  ;;  %v4192_v25 = vor.u32 1.1754944e-38, %v4191_v16  ;;  %vm3720_vm11 = vweird.f32 %v7927_v8  ;;  %v8223_v33 = vpop.xlane.xlu2 %3240 }
 0x3fd   :  { %4772 = vpow2.f32 %v3448_v31  ;;  %v8171_v47 = vadd.f32 %v4452_v27, %v4391_v13  ;;  %v3724_v40 = vand.u32 2147483647, %v7927_v8  ;;  %v3732_v61 = vsub.f32 1.0, %v3731_v1  ;;  %vm8188_vm12 = vmor %vm3720_vm11, %vm3721_vm7 }
 0x3fe   :  { %v3898_v50 = vsub.f32 %v8103_v62, %v3867_v19  ;;  %v8182_v10 = vmul.f32 %v4832_v29, %v3714_v21  ;;  %v4193_v43 = vsel %vm8140_vm9, %v4192_v25, %v4188_v48  ;;  %v3868_v62 = vrot.slane %v8175_v7, 4 }
 0x3ff   :  { %v3394_v49 = vrot.slane %v8177_v38, 4  ;;  %v3723_v35 = vsel %vm8188_vm12, %v7986_v9, %v3719_v42  ;;  %v3727_v15 = vor.u32 1.1754944e-38, %v3726_v2  ;;  %v4198_v18 = vmul.f32 %v8076_v52, %v4197_v54 }
 0x400   :  { %v3926_v28 = vmul.f32 1.442695, %v3898_v50  ;;  %v4204_v45 = vand.u32 2147483647, %v7995_v41  ;;  %v4206_v44 = vand.u32 2147483648, %v7995_v41  ;;  %v3869_v53 = vmax.f32 %v8175_v7, %v3868_v62 }
 0x401   :  { %v3395_v13 = vmax.f32 %v8177_v38, %v3394_v49  ;;  %v8203_v4 = vmul.f32 %v7657_v46, %v4193_v43  ;;  %vm3725_vm13 = vcmp.eq.f32.partialorder %v3724_v40, 8.507059e+37  ;;  %v3733_v20 = vmul.f32 %v8087_v23, %v3732_v61 }
 0x402   :  { %4774 = vpow2.f32 %v3926_v28  ;;  %v8208_v39 = vsel %vm3725_vm13, %v3727_v15, %v3723_v35  ;;  %vm4200_vm15 = vweird.f32 %v7995_v41  ;;  %v3870_v30 = vrot.slane %v3869_v53, 2 }
 0x403   :  { %v8206_v9 = vpop.eup %4772  ;;  %v3396_v36 = vrot.slane %v3395_v13, 2  ;;  %v4199_v17 = vadd.f32 %v8076_v52, %v4198_v18  ;;  %vm4201_vm14 = vweird.f32 %v8076_v52  ;;  %v3739_v57 = vand.u32 2147483647, %v8045_v22  ;;  %v8262_v8 = vpop.xlane.xlu0 %3308 }
 0x404   :  { %v3532_v46 = vrot.slane %v8206_v9, 4  ;;  %vm8215_vm8 = vcmp.eq.f32.partialorder %v4204_v45, 8.507059e+37  ;;  %v4207_v14 = vor.u32 1.1754944e-38, %v4206_v44  ;;  %v3871_v3 = vmax.f32 %v3869_v53, %v3870_v30  ;;  %vm8229_vm9 = vmor %vm4200_vm15, %vm4201_vm14 }
 0x405   :  { %v3397_v0 = vmax.f32 %v3395_v13, %v3396_v36  ;;  %v3734_v60 = vadd.f32 %v8087_v23, %v3733_v20  ;;  %vm3736_vm0 = vweird.f32 %v8087_v23  ;;  %v3741_v12 = vand.u32 2147483648, %v8045_v22 }
 0x406   :  { %v3533_v55 = vadd.f32 %v8206_v9, %v3532_v46  ;;  %v3872_v16 = vrot.slane %v3871_v3, 1  ;;  %v3400_v34 = vrot.slane %v8223_v33, 4  ;;  %v3874_v27 = vrot.slane %v8225_v56, 4  ;;  %v4833_v46 = vld [vmem:[%s8526_s0 + $0x50] sm:$0xff] }
 0x407   :  { %v3398_v37 = vrot.slane %v3397_v0, 1  ;;  %v4203_v26 = vsel %vm8229_vm9, %v8076_v52, %v4199_v17  ;;  %vm3735_vm10 = vweird.f32 %v8045_v22  ;;  %vm8241_vm7 = vcmp.eq.f32.partialorder %v3739_v57, 8.507059e+37 }
 0x408   :  { %v8235_v1 = vpop.eup %4774  ;;  %v3534_v58 = vrot.slane %v3533_v55, 2  ;;  %vm8247_vm11 = vmor %vm3735_vm10, %vm3736_vm0  ;;  %v3873_v2 = vmax.f32 %v3871_v3, %v3872_v16  ;;  %v3401_v48 = vmax.f32 %v8223_v33, %v3400_v34  ;;  %v3742_v52 = vor.u32 1.1754944e-38, %v3741_v12 }
 0x409   :  { %v4006_v63 = vrot.slane %v8235_v1, 4  ;;  %v3399_v31 = vmax.f32 %v3397_v0, %v3398_v37  ;;  %v3738_v22 = vsel %vm8247_vm11, %v8087_v23, %v3734_v60  ;;  %v3875_v54 = vmax.f32 %v8225_v56, %v3874_v27 }
 0x40a   :  { %v3535_v42 = vadd.f32 %v3534_v58, %v3533_v55  ;;  %v3899_v25 = vsub.f32 %v8175_v7, %v3873_v2  ;;  %v3402_v61 = vrot.slane %v3401_v48, 2  ;;  %v4208_v50 = vsel %vm8215_vm8, %v4207_v14, %v4203_v26  ;;  %v8745_v14 = vld [vmem:[#allocation20_spill] sm:$0xff] }
 0x40b   :  { %v4007_v19 = vadd.f32 %v8235_v1, %v4006_v63  ;;  %v3420_v40 = vsub.f32 %v8177_v38, %v3399_v31  ;;  %v3876_v43 = vrot.slane %v3875_v54, 2  ;;  %v4342_v23 = vrot.slane %v8168_v24, 2 }
 0x40c   :  { %v3536_v29 = vrot.slane %v3535_v42, 1  ;;  %v3928_v49 = vmul.f32 1.442695, %v3899_v25  ;;  %v3403_v15 = vmax.f32 %v3401_v48, %v3402_v61  ;;  %v3743_v18 = vsel %vm8241_vm7, %v3742_v52, %v3738_v22 }
 0x40d   :  { %v4008_v62 = vrot.slane %v4007_v19, 2  ;;  %v3450_v35 = vmul.f32 1.442695, %v3420_v40  ;;  %v3877_v38 = vmax.f32 %v3875_v54, %v3876_v43  ;;  %v3880_v28 = vrot.slane %v8262_v8, 4 }
 0x40e   :  { %v8267_v7 = vadd.f32 %v3536_v29, %v3535_v42  ;;  %4776 = vpow2.f32 %v3928_v49  ;;  %v3404_v44 = vrot.slane %v3403_v15, 1  ;;  %v4336_v53 = vrot.slane %v7884_v59, 2  ;;  %v4834_v29 = vld [vmem:[%s8527_s1 + $0x58] sm:$0xff] }
 0x40f   :  { %v4009_v45 = vadd.f32 %v4008_v62, %v4007_v19  ;;  %v3878_v13 = vrot.slane %v3877_v38, 1  ;;  %v3881_v20 = vmax.f32 %v8262_v8, %v3880_v28  ;;  %v4343_v30 = vadd.f32 %v4342_v23, %v8168_v24 }
 0x410   :  { %4778 = vrcp.f32 %v8267_v7  ;;  %v3405_v17 = vmax.f32 %v3403_v15, %v3404_v44  ;;  %v4448_v57 = vrot.slane %v8149_v6, 2  ;;  %v4392_v5 = vmul.f32 %v4833_v46, %v8203_v4 }
 0x411   :  { %v4010_v36 = vrot.slane %v4009_v45, 1  ;;  %4780 = vpow2.f32 %v3450_v35  ;;  %v3729_v3 = vmul.f32 %v8745_v14, %v8208_v39  ;;  %v3879_v0 = vmax.f32 %v3877_v38, %v3878_v13 }
 0x412   :  { %v3882_v60 = vrot.slane %v3881_v20, 2  ;;  %v3421_v24 = vsub.f32 %v8223_v33, %v3405_v17  ;;  %v8285_v55 = vadd.f32 %v4336_v53, %v7884_v59  ;;  %v4346_v32 = vrot.slane %v8182_v10, 4 }
 0x413   :  { %v8281_v12 = vadd.f32 %v4010_v36, %v4009_v45  ;;  %v8289_v16 = vmul.f32 %v7853_v11, %v4208_v50  ;;  %v8292_v37 = vmul.f32 %v7940_v51, %v3743_v18  ;;  %v3900_v4 = vsub.f32 %v8225_v56, %v3879_v0 }
 0x414   :  { %v3883_v39 = vmax.f32 %v3881_v20, %v3882_v60  ;;  %v8295_v34 = vpop.eup %4776  ;;  %v4344_v27 = vrot.slane %v4343_v30, 1  ;;  %v8299_v33 = vadd.f32 %v4448_v57, %v8149_v6  ;;  %v4454_v59 = vrot.slane %v8171_v47, 2 }
 0x415   :  { %4782 = vrcp.f32 %v8281_v12  ;;  %v4012_v11 = vrot.slane %v8295_v34, 4  ;;  %v3452_v41 = vmul.f32 1.442695, %v3421_v24  ;;  %v3930_v51 = vmul.f32 1.442695, %v3900_v4 }
 0x416   :  { %v8302_v26 = vpop.eup %4778  ;;  %v3884_v58 = vrot.slane %v3883_v39, 1  ;;  %v4338_v63 = vrot.slane %v8285_v55, 1  ;;  %v8311_v2 = vadd.f32 %v4346_v32, %v8182_v10  ;;  %v4458_v6 = vrot.slane %v4392_v5, 4 }
 0x417   :  { %v8305_v21 = vpop.eup %4780  ;;  %v3746_v56 = vmul.f32 %v8302_v26, %v8267_v7  ;;  %v4013_v31 = vadd.f32 %v8295_v34, %v4012_v11  ;;  %4784 = vpow2.f32 %v3452_v41  ;;  %v8315_v42 = vadd.f32 %v4344_v27, %v4343_v30 }
 0x418   :  { %v3538_v48 = vrot.slane %v8305_v21, 4  ;;  %v3885_v22 = vmax.f32 %v3883_v39, %v3884_v58  ;;  %4786 = vpow2.f32 %v3930_v51  ;;  %v8318_v54 = vadd.f32 %v4454_v59, %v8171_v47 }
 0x419   :  { %v3747_v52 = vsub.f32 1.0, %v3746_v56  ;;  %v4014_v19 = vrot.slane %v4013_v31, 2  ;;  %v4450_v40 = vrot.slane %v8299_v33, 1  ;;  %v4281_v43 = vmul.f32 %v4834_v29, %v3729_v3 }
 0x41a   :  { %v3539_v25 = vadd.f32 %v8305_v21, %v3538_v48  ;;  %v3901_v10 = vsub.f32 %v8262_v8, %v3885_v22  ;;  %v4348_v23 = vrot.slane %v8311_v2, 2  ;;  %v4459_v47 = vadd.f32 %v4458_v6, %v4392_v5 }
 0x41b   :  { %v8323_v61 = vpop.eup %4782  ;;  %v3748_v50 = vmul.f32 %v8302_v26, %v3747_v52  ;;  %v4015_v49 = vadd.f32 %v4014_v19, %v4013_v31  ;;  %vm3750_vm12 = vweird.f32 %v8267_v7  ;;  %vm3751_vm13 = vweird.f32 %v8302_v26 }
 0x41c   :  { %v4211_v62 = vmul.f32 %v8323_v61, %v8281_v12  ;;  %v3540_v35 = vrot.slane %v3539_v25, 2  ;;  %v3932_v8 = vmul.f32 1.442695, %v3901_v10  ;;  %v3754_v18 = vand.u32 2147483647, %v8267_v7  ;;  %vm8350_vm15 = vmor %vm3750_vm12, %vm3751_vm13 }
 0x41d   :  { %v3749_v15 = vadd.f32 %v8302_v26, %v3748_v50  ;;  %v8336_v38 = vpop.eup %4784  ;;  %v4016_v45 = vrot.slane %v4015_v49, 1  ;;  %v3756_v53 = vand.u32 2147483648, %v8267_v7  ;;  %v4352_v30 = vrot.slane %v4281_v43, 4 }
 0x41e   :  { %v4212_v28 = vsub.f32 1.0, %v4211_v62  ;;  %v3541_v44 = vadd.f32 %v3540_v35, %v3539_v25  ;;  %v8339_v13 = vpop.eup %4786  ;;  %v3544_v20 = vrot.slane %v8336_v38, 4  ;;  %4788 = vpow2.f32 %v3932_v8 }
 0x41f   :  { %v4460_v36 = vrot.slane %v4459_v47, 2  ;;  %v8343_v57 = vadd.f32 %v4016_v45, %v4015_v49  ;;  %v4018_v5 = vrot.slane %v8339_v13, 4  ;;  %vm4216_vm14 = vweird.f32 %v8323_v61 }
 0x420   :  { %v4213_v17 = vmul.f32 %v8323_v61, %v4212_v28  ;;  %v3542_v46 = vrot.slane %v3541_v44, 1  ;;  %v4219_v3 = vand.u32 2147483647, %v8281_v12  ;;  %v3545_v0 = vadd.f32 %v8336_v38, %v3544_v20 }
 0x421   :  { %v3753_v60 = vsel %vm8350_vm15, %v8302_v26, %v3749_v15  ;;  %4790 = vrcp.f32 %v8343_v57  ;;  %v4019_v7 = vadd.f32 %v8339_v13, %v4018_v5  ;;  %v4221_v4 = vand.u32 2147483648, %v8281_v12 }
 0x422   :  { %v4214_v24 = vadd.f32 %v8323_v61, %v4213_v17  ;;  %v8362_v32 = vadd.f32 %v3542_v46, %v3541_v44  ;;  %v3546_v39 = vrot.slane %v3545_v0, 2  ;;  %v3757_v27 = vor.u32 1.1754944e-38, %v3756_v53  ;;  %v4836_v44 = vld [vmem:[%s8527_s1 + $0x60] sm:$0xff] }
 0x423   :  { %v8366_v59 = vadd.f32 %v4352_v30, %v4281_v43  ;;  %vm4215_vm8 = vweird.f32 %v8281_v12  ;;  %v4020_v11 = vrot.slane %v4019_v7, 2  ;;  %vm3755_vm0 = vcmp.eq.f32.partialorder %v3754_v18, 8.507059e+37 }
 0x424   :  { %4792 = vrcp.f32 %v8362_v32  ;;  %v8370_v26 = vpop.eup %4788  ;;  %vm8374_vm9 = vmor %vm4215_vm8, %vm4216_vm14  ;;  %v3547_v51 = vadd.f32 %v3546_v39, %v3545_v0  ;;  %v3758_v58 = vsel %vm3755_vm0, %v3757_v27, %v3753_v60  ;;  %v8379_v56 = vadd.f32 %v4348_v23, %v8311_v2 }
 0x425   :  { %v4456_v6 = vrot.slane %v8318_v54, 1  ;;  %v4218_v12 = vsel %vm8374_vm9, %v8323_v61, %v4214_v24  ;;  %vm4220_vm10 = vcmp.eq.f32.partialorder %v4219_v3, 8.507059e+37  ;;  %v4021_v31 = vadd.f32 %v4020_v11, %v4019_v7  ;;  %v4835_v61 = vld [vmem:[%s8526_s0 + $0x58] sm:$0xff]  ;;  %v4837_v24 = vld [vmem:[%s8527_s1 + $0x68] sm:$0xff] }
 0x426   :  { %v4024_v48 = vrot.slane %v8370_v26, 4  ;;  %v4222_v22 = vor.u32 1.1754944e-38, %v4221_v4  ;;  %v3548_v52 = vrot.slane %v3547_v51, 1  ;;  %v4354_v19 = vrot.slane %v8366_v59, 2 }
 0x427   :  { %v8387_v25 = vadd.f32 %v4460_v36, %v4459_v47  ;;  %v4791_v10 = vpop.eup %4790  ;;  %v4022_v50 = vrot.slane %v4021_v31, 1  ;;  %v3759_v29 = vmul.f32 %v8206_v9, %v3758_v58  ;;  %v8395_v43 = vmul.f32 %v4835_v61, %v8289_v16 }
 0x428   :  { %v4025_v2 = vadd.f32 %v8370_v26, %v4024_v48  ;;  %v4223_v23 = vsel %vm4220_vm10, %v4222_v22, %v4218_v12  ;;  %v8397_v62 = vadd.f32 %v3548_v52, %v3547_v51  ;;  %v4226_v49 = vmul.f32 %v4791_v10, %v8343_v57 }
 0x429   :  { %v4234_v47 = vand.u32 2147483647, %v8343_v57  ;;  %v8401_v8 = vadd.f32 %v4022_v50, %v4021_v31  ;;  %v3769_v9 = vand.u32 2147483647, %v8362_v32  ;;  %v3771_v18 = vand.u32 2147483648, %v8362_v32 }
 0x42a   :  { %v4793_v35 = vpop.eup %4792  ;;  %v4026_v15 = vrot.slane %v4025_v2, 2  ;;  %4794 = vrcp.f32 %v8397_v62  ;;  %vm3765_vm7 = vweird.f32 %v8362_v32  ;;  %vm4230_vm11 = vweird.f32 %v8343_v57 }
 0x42b   :  { %v3761_v16 = vmul.f32 %v4793_v35, %v8362_v32  ;;  %4796 = vrcp.f32 %v8401_v8  ;;  %v4236_v45 = vand.u32 2147483648, %v8343_v57  ;;  %v4282_v53 = vmul.f32 %v4836_v44, %v8292_v37 }
 0x42c   :  { %v4027_v28 = vadd.f32 %v4026_v15, %v4025_v2  ;;  %v4224_v20 = vmul.f32 %v8235_v1, %v4223_v23  ;;  %v4227_v36 = vsub.f32 1.0, %v4226_v49  ;;  %vm8416_vm12 = vcmp.eq.f32.partialorder %v4234_v47, 8.507059e+37 }
 0x42d   :  { %v3762_v30 = vsub.f32 1.0, %v3761_v16  ;;  %vm8420_vm13 = vcmp.eq.f32.partialorder %v3769_v9, 8.507059e+37  ;;  %v3772_v14 = vor.u32 1.1754944e-38, %v3771_v18  ;;  %vm4231_vm15 = vweird.f32 %v4791_v10 }
 0x42e   :  { %v4028_v46 = vrot.slane %v4027_v28, 1  ;;  %vm3766_vm14 = vweird.f32 %v4793_v35  ;;  %v3784_v0 = vand.u32 2147483647, %v8397_v62  ;;  %v4228_v37 = vmul.f32 %v4791_v10, %v4227_v36  ;;  %vm4232_vm0 = vmor %vm4230_vm11, %vm4231_vm15 }
 0x42f   :  { %v3763_v3 = vmul.f32 %v4793_v35, %v3762_v30  ;;  %v4237_v1 = vor.u32 1.1754944e-38, %v4236_v45  ;;  %v4283_v7 = vmul.f32 %v4837_v24, %v3759_v29  ;;  %v4358_v4 = vrot.slane %v4282_v53, 4  ;;  %vm3767_vm9 = vmor %vm3765_vm7, %vm3766_vm14 }
 0x430   :  { %v8425_v60 = vadd.f32 %v4028_v46, %v4027_v28  ;;  %v4795_v39 = vpop.eup %4794  ;;  %vm3780_vm8 = vweird.f32 %v8397_v62  ;;  %v3786_v11 = vand.u32 2147483648, %v8397_v62  ;;  %v4229_v41 = vadd.f32 %v4791_v10, %v4228_v37 }
 0x431   :  { %v3764_v27 = vadd.f32 %v4793_v35, %v3763_v3  ;;  %v4797_v51 = vpop.eup %4796  ;;  %v3776_v58 = vmul.f32 %v4795_v39, %v8397_v62  ;;  %vm4245_vm10 = vweird.f32 %v8401_v8  ;;  %v4249_v12 = vand.u32 2147483647, %v8401_v8  ;;  %v4840_v62 = vld [vmem:[%s8526_s0 + $0x68] sm:$0xff] }
 0x432   :  { %4798 = vrcp.f32 %v8425_v60  ;;  %vm8442_vm6 = vcmp.eq.f32.partialorder %v3784_v0, 8.507059e+37  ;;  %v4233_v57 = vsel %vm4232_vm0, %v4791_v10, %v4229_v41  ;;  %v4241_v22 = vmul.f32 %v4797_v51, %v8401_v8 }
 0x433   :  { %v3768_v31 = vsel %vm3767_vm9, %v4793_v35, %v3764_v27  ;;  %v3777_v50 = vsub.f32 1.0, %v3776_v58  ;;  %v4238_v32 = vsel %vm8416_vm12, %v4237_v1, %v4233_v57  ;;  %v4251_v2 = vand.u32 2147483648, %v8401_v8 }
 0x434   :  { %v3773_v52 = vsel %vm8420_vm13, %v3772_v14, %v3768_v31  ;;  %v4242_v61 = vsub.f32 1.0, %v4241_v22  ;;  %v8453_v23 = vadd.f32 %v4358_v4, %v4282_v53  ;;  %v4464_v49 = vrot.slane %v8395_v43, 4  ;;  %v4839_v53 = vld [vmem:[%s8526_s0 + $0x60] sm:$0xff] }
 0x435   :  { %v3774_v29 = vmul.f32 %v8305_v21, %v3773_v52  ;;  %v3778_v47 = vmul.f32 %v4795_v39, %v3777_v50  ;;  %vm3781_vm7 = vweird.f32 %v4795_v39  ;;  %v3787_v10 = vor.u32 1.1754944e-38, %v3786_v11  ;;  %v4838_v21 = vld [vmem:[%s8527_s1 + $0x70] sm:$0xff] }
 0x436   :  { %v4239_v35 = vmul.f32 %v8295_v34, %v4238_v32  ;;  %v4243_v15 = vmul.f32 %v4797_v51, %v4242_v61  ;;  %vm4246_vm11 = vweird.f32 %v4797_v51  ;;  %vm8457_vm13 = vcmp.eq.f32.partialorder %v4249_v12, 8.507059e+37  ;;  %vm3782_vm12 = vmor %vm3780_vm8, %vm3781_vm7 }
 0x437   :  { %v4284_v18 = vmul.f32 %v4838_v21, %v3774_v29  ;;  %v3779_v28 = vadd.f32 %v4795_v39, %v3778_v47  ;;  %v4252_v45 = vor.u32 1.1754944e-38, %v4251_v2  ;;  %v4364_v44 = vrot.slane %v4283_v7, 4  ;;  %vm4247_vm15 = vmor %vm4245_vm10, %vm4246_vm11 }
 0x438   :  { %v4799_v16 = vpop.eup %4798  ;;  %v4394_v34 = vmul.f32 %v4839_v53, %v4224_v20  ;;  %v4244_v30 = vadd.f32 %v4797_v51, %v4243_v15  ;;  %v4360_v17 = vrot.slane %v8453_v23, 2  ;;  %v4465_v46 = vadd.f32 %v4464_v49, %v8395_v43  ;;  %v4843_v53 = vld [vmem:[%s8526_s0 + $0x78] sm:$0xff] }
 0x439   :  { %v4256_v36 = vmul.f32 %v4799_v16, %v8425_v60  ;;  %v3783_v5 = vsel %vm3782_vm12, %v4795_v39, %v3779_v28  ;;  %v4264_v14 = vand.u32 2147483647, %v8425_v60  ;;  %v4370_v3 = vrot.slane %v4284_v18, 4 }
 0x43a   :  { %v4395_v20 = vmul.f32 %v4840_v62, %v4239_v35  ;;  %v3788_v0 = vsel %vm8442_vm6, %v3787_v10, %v3783_v5  ;;  %v4248_v37 = vsel %vm4247_vm15, %v4797_v51, %v4244_v30  ;;  %v4266_v43 = vand.u32 2147483648, %v8425_v60  ;;  %v4841_v51 = vld [vmem:[%s8527_s1 + $0x78] sm:$0xff] }
 0x43b   :  { %v4257_v1 = vsub.f32 1.0, %v4256_v36  ;;  %v3789_v24 = vmul.f32 %v8336_v38, %v3788_v0  ;;  %v4253_v8 = vsel %vm8457_vm13, %v4252_v45, %v4248_v37  ;;  %vm4261_vm14 = vweird.f32 %v4799_v16 }
 0x43c   :  { %v4365_v4 = vadd.f32 %v4364_v44, %v4283_v7  ;;  %v4254_v39 = vmul.f32 %v8339_v13, %v4253_v8  ;;  %v4466_v11 = vrot.slane %v4465_v46, 2  ;;  %v4470_v41 = vrot.slane %v4394_v34, 4  ;;  %v4842_v7 = vld [vmem:[%s8526_s0 + $0x70] sm:$0xff]  ;;  %s4870_s0 = smov [#allocation2]  }
 0x43d   :  { %v4258_v27 = vmul.f32 %v4799_v16, %v4257_v1  ;;  %vm4260_vm8 = vweird.f32 %v8425_v60  ;;  %v4285_v58 = vmul.f32 %v4841_v51, %v3789_v24  ;;  %v4371_v12 = vadd.f32 %v4370_v3, %v4284_v18  ;;  %s4589_s22 = sshll.u32 %s4870_s0, 4  ;;  %s4590_s22 = int_to_ptr.vmem [resolvable:$true] %s4589_s22 }
 0x43e   :  { %v4476_v31 = vrot.slane %v4395_v20, 4  ;;  %vm4265_vm6 = vcmp.eq.f32.partialorder %v4264_v14, 8.507059e+37  ;;  %v4396_v48 = vmul.f32 %v4842_v7, %v4254_v39  ;;  %v4471_v13 = vadd.f32 %v4470_v41, %v4394_v34  ;;  %vm4262_vm0 = vmor %vm4260_vm8, %vm4261_vm14 }
 0x43f   :  { %v4259_v38 = vadd.f32 %v4799_v16, %v4258_v27  ;;  %v4267_v57 = vor.u32 1.1754944e-38, %v4266_v43  ;;  %v4366_v22 = vrot.slane %v4365_v4, 2  ;;  %v4376_v60 = vrot.slane %v4285_v58, 4 }
 0x440   :  { %v4477_v52 = vadd.f32 %v4476_v31, %v4395_v20  ;;  %v4467_v32 = vadd.f32 %v4466_v11, %v4465_v46  ;;  %v4472_v2 = vrot.slane %v4471_v13, 2  ;;  %v4482_v29 = vrot.slane %v4396_v48, 4 }
 0x441   :  { %v4263_v50 = vsel %vm4262_vm0, %v4799_v16, %v4259_v38  ;;  %v4372_v49 = vrot.slane %v4371_v12, 2  ;;  %v4377_v47 = vadd.f32 %v4376_v60, %v4285_v58  ;;  %v4355_v15 = vadd.f32 %v4354_v19, %v8366_v59 }
 0x442   :  { %v4268_v61 = vsel %vm4265_vm6, %v4267_v57, %v4263_v50  ;;  %v4478_v10 = vrot.slane %v4477_v52, 2  ;;  %v4473_v9 = vadd.f32 %v4472_v2, %v4471_v13  ;;  %v4483_v21 = vadd.f32 %v4482_v29, %v4396_v48 }
 0x443   :  { %v4269_v35 = vmul.f32 %v8370_v26, %v4268_v61  ;;  %v4361_v18 = vadd.f32 %v4360_v17, %v8453_v23  ;;  %v4367_v28 = vadd.f32 %v4366_v22, %v4365_v4  ;;  %v4462_v16 = vrot.slane %v8387_v25, 1 }
 0x444   :  { %v4479_v45 = vadd.f32 %v4478_v10, %v4477_v52  ;;  %v4378_v44 = vrot.slane %v4377_v47, 2  ;;  %v4468_v30 = vrot.slane %v4467_v32, 1  ;;  %v4484_v26 = vrot.slane %v4483_v21, 2 }
 0x445   :  { %v4397_v34 = vmul.f32 %v4843_v53, %v4269_v35  ;;  %v4350_v36 = vrot.slane %v8379_v56, 1  ;;  %v4373_v46 = vadd.f32 %v4372_v49, %v4371_v12  ;;  %v4457_v59 = vadd.f32 %v4456_v6, %v8318_v54 }
 0x446   :  { %v4474_v19 = vrot.slane %v4473_v9, 1  ;;  %v4356_v23 = vrot.slane %v4355_v15, 1  ;;  %v4480_v17 = vrot.slane %v4479_v45, 1  ;;  %v4485_v5 = vadd.f32 %v4484_v26, %v4483_v21 }
 0x447   :  { %v4488_v14 = vrot.slane %v4397_v34, 4  ;;  %v4362_v3 = vrot.slane %v4361_v18, 1  ;;  %v4368_v62 = vrot.slane %v4367_v28, 1  ;;  %v4451_v20 = vadd.f32 %v4450_v40, %v8299_v33 }
 0x448   :  { %v4463_v0 = vadd.f32 %v4462_v16, %v8387_v25  ;;  %v4379_v37 = vadd.f32 %v4378_v44, %v4377_v47  ;;  %v4469_v1 = vadd.f32 %v4468_v30, %v4467_v32  ;;  %v4486_v43 = vrot.slane %v4485_v5, 1 }
 0x449   :  { %v4489_v24 = vadd.f32 %v4488_v14, %v4397_v34  ;;  %v4339_v54 = vadd.f32 %v4338_v63, %v8285_v55  ;;  %v4351_v6 = vadd.f32 %v4350_v36, %v8379_v56  ;;  %v4374_v8 = vrot.slane %v4373_v46, 1 }
 0x44a   :  { %v4475_v4 = vadd.f32 %v4474_v19, %v4473_v9  ;;  %v4357_v39 = vadd.f32 %v4356_v23, %v4355_v15  ;;  %v4481_v27 = vadd.f32 %v4480_v17, %v4479_v45  ;;  %v4503_v41 = vadd.f32 %v4457_v59, %v8315_v42 }
 0x44b   :  { %v4490_v11 = vrot.slane %v4489_v24, 2  ;;  %v4363_v33 = vadd.f32 %v4362_v3, %v4361_v18  ;;  %v4487_v40 = vadd.f32 %v4486_v43, %v4485_v5  ;;  %v4502_v25 = vadd.f32 %v4451_v20, %v4339_v54 }
 0x44c   :  { %v4504_v51 = vadd.f32 %v4463_v0, %v4351_v6  ;;  %v4369_v58 = vadd.f32 %v4368_v62, %v4367_v28  ;;  %v4380_v12 = vrot.slane %v4379_v37, 1  ;;  %v4505_v38 = vadd.f32 %v4469_v1, %v4357_v39 }
 0x44d   :  { %v4491_v31 = vadd.f32 %v4490_v11, %v4489_v24  ;;  %v4375_v7 = vadd.f32 %v4374_v8, %v4373_v46  ;;  %v4506_v48 = vadd.f32 %v4475_v4, %v4363_v33  ;;  %v4549_v56 = vsel %vm3007_vm1, %v4503_v41, %v4502_v25 }
 0x44e   :  { %v4507_v63 = vadd.f32 %v4481_v27, %v4369_v58  ;;  %v4550_v57 = vsel %vm3009_vm2, %v4504_v51, %v4549_v56  ;;  %v4381_v22 = vadd.f32 %v4380_v12, %v4379_v37  ;;  %vm8758_vm9 = vcmask 1046534  }
 0x44f   :  { %v4492_v55 = vrot.slane %v4491_v31, 1  ;;  %v4508_v13 = vadd.f32 %v4487_v40, %v4375_v7  ;;  %v4551_v42 = vsel %vm3011_vm3, %v4505_v38, %v4550_v57  ;;  %vm8759_vm10 = vcmask 1047559  }
 0x450   :  { %v4552_v52 = vsel %vm3013_vm4, %v4506_v48, %v4551_v42 }
 0x451   :  { %v4493_v60 = vadd.f32 %v4492_v55, %v4491_v31  ;;  %v4553_v32 = vsel %vm3015_vm5, %v4507_v63, %v4552_v52 }
 0x452   :  { %v4554_v2 = vsel %vm8758_vm9, %v4508_v13, %v4553_v32 }
 0x453   :  { %v4509_v50 = vadd.f32 %v4493_v60, %v4381_v22 }
 0x455   :  { %v4555_v29 = vsel %vm8759_vm10, %v4509_v50, %v4554_v2 }
 0x456   :  { %4577 = vmatmul.f32.gmra.mxu3 %v4555_v29 }
 0x47c   :  { %v4575_v61 = vpop.f32.mrf.mxu3 }
 0x47d   :  { %4800 = vtanh.f32 %v4575_v61 }
 0x483   :  { %v4801_v49 = vpop.eup %4800 }
 0x484   :  { %4583 = vst [vmem:[#allocation2] sm:$0xff] %v4801_v49 }
 0x4d9   :  { %v4578_v47 = vpop.f32.mrf.mxu3 }
 0x4da   :  { %4802 = vtanh.f32 %v4578_v47 }
 0x4e0   :  { %v4803_v10 = vpop.eup %4802 }
 0x4e1   :  { %4584 = vst [vmem:[#allocation2 + $0x8] sm:$0xff] %v4803_v10 }
 0x4e2   :  { %4597 = dma.vmem_to_hbm [thread:$0]  %s4590_s22, 256, %s4592_s6, [#allocation3], %s4871_s25, %s4871_s25, %s4872_s26  }
 0x4e3   :  { %4868 = dma.done.wait [#allocation3], 256  }
 0x4e4   :  { %4869 = vsyncadd [#allocation3], 4294967040 }
 0x4e5   :  { %4602 = vsyncpa [#allocation3], 1 }

</bundles_post_ra>
